<compile_context>
chip_gen: v5e
topology: v5e:2x2
jax: 0.10.0
libtpu: 0.0.40
codegen_flags: <defaults>
</compile_context>

<pallas_src>
import jax
import jax.numpy as jnp
from jax.experimental import pallas as pl
from jax.experimental.pallas import tpu as pltpu

BN_EPS = 1e-5
CPAD = 128     # all feature-map channel dims are zero-padded to this (lane-dense)
TM = 256       # M-tile rows for the matmul grid when M is large enough


# ---------------------------------------------------------------------------
# Pallas kernels
# ---------------------------------------------------------------------------
def fused_matmul(x, w, scale, shift, extra=None, relu=False,
                 out_dtype=jnp.float32):
    """out = maybe_relu( (x @ w) * scale + shift [ + (x2 @ w2) * s2 + b2 ] ).

    x: (M, K); w: (K, N); scale/shift: (N,) broadcast over rows (folded BN+bias).
    `extra` = (x2, w2, scale2, shift2) fuses a second matmul over the same M
    rows (used for the ResidualBlock 1x1 downsample + residual add).
    """
    M, K = x.shape
    N = w.shape[1]
    scale = scale.reshape(1, N).astype(jnp.float32)
    shift = shift.reshape(1, N).astype(jnp.float32)
    operands = [x, w, scale, shift]
    if extra is not None:
        x2, w2, s2, b2 = extra
        K2 = x2.shape[1]
        operands += [x2, w2, s2.reshape(1, N).astype(jnp.float32),
                     b2.reshape(1, N).astype(jnp.float32)]

    if M > TM:                         # M-tiled, "parallel" grid (v7x: 2 TCs)
        tm, grid = TM, (pl.cdiv(M, TM),)
    else:                              # whole-array block
        tm, grid = M, (1,)

    def row_spec(k):                   # marches down M with the grid
        return pl.BlockSpec((tm, k), lambda i: (i, 0))

    def rep_spec(shape):               # constant block index -> stays resident
        return pl.BlockSpec(shape, lambda i: (0,) * len(shape))

    in_specs = [row_spec(K), rep_spec(w.shape), rep_spec((1, N)),
                rep_spec((1, N))]
    if extra is not None:
        in_specs += [row_spec(K2), rep_spec(w2.shape), rep_spec((1, N)),
                     rep_spec((1, N))]

    def kernel(*refs):
        if extra is not None:
            x_r, w_r, sc_r, sh_r, x2_r, w2_r, sc2_r, sh2_r, o_r = refs
        else:
            x_r, w_r, sc_r, sh_r, o_r = refs
        acc = jnp.dot(x_r[...], w_r[...], preferred_element_type=jnp.float32)
        acc = acc * sc_r[...] + sh_r[...]
        if extra is not None:
            acc2 = jnp.dot(x2_r[...], w2_r[...],
                           preferred_element_type=jnp.float32)
            acc = acc + acc2 * sc2_r[...] + sh2_r[...]
        if relu:
            acc = jnp.maximum(acc, 0.0)
        o_r[...] = acc.astype(o_r.dtype)

    return pl.pallas_call(
        kernel,
        grid=grid,
        in_specs=in_specs,
        out_specs=pl.BlockSpec((tm, N), lambda i: (i, 0)),
        out_shape=jax.ShapeDtypeStruct((M, N), out_dtype),
        compiler_params=pltpu.CompilerParams(
            dimension_semantics=("parallel",)),
    )(*operands)


def pool2d(x, k, stride, mode):
    """MaxPool2d(k, stride) / AvgPool2d(k, stride) on an NHWC map.

    The k*k window lives on the LEADING axis of the patch array, so the kernel
    reduces with elementwise VPU max/add over full (M, C=128) lane-dense slabs.
    """
    B, H, W, C = x.shape
    OH = (H - k) // stride + 1
    OW = (W - k) // stride + 1
    slabs = []
    for i in range(k):
        for j in range(k):
            slabs.append(x[:, i:i + stride * (OH - 1) + 1:stride,
                            j:j + stride * (OW - 1) + 1:stride, :])
    patches = jnp.stack(slabs, axis=0).reshape(k * k, B * OH * OW, C)
    kk, M, _ = patches.shape

    def kernel(p_ref, o_ref):
        acc = p_ref[0].astype(jnp.float32)
        for t in range(1, kk):                    # unrolled elementwise reduce
            v = p_ref[t].astype(jnp.float32)
            if mode == "avg":
                acc = acc + v
            else:
                acc = jnp.maximum(acc, v)
        if mode == "avg":
            acc = acc * (1.0 / kk)
        o_ref[...] = acc.astype(o_ref.dtype)

    out = pl.pallas_call(
        kernel,
        grid=(1,),
        in_specs=[pl.BlockSpec((kk, M, C), lambda i: (0, 0, 0))],
        out_specs=pl.BlockSpec((M, C), lambda i: (0, 0)),
        out_shape=jax.ShapeDtypeStruct((M, C), x.dtype),
        compiler_params=pltpu.CompilerParams(
            dimension_semantics=("arbitrary",)),
    )(patches)
    return out.reshape(B, OH, OW, C)


# ---------------------------------------------------------------------------
# XLA-side glue: im2col patch extraction (position-major, channel-minor)
# ---------------------------------------------------------------------------
def _conv_patches(x, k, stride, pad):
    """NHWC im2col: x (B,H,W,C) -> ((B*OH*OW, k*k*C), OH, OW)."""
    # TODO(synk): for large batches, generate the 7x7/stride-2 patches in-kernel
    # with strided pl.ds reads instead of materializing the replicated matrix.
    if pad:
        x = jnp.pad(x, ((0, 0), (pad, pad), (pad, pad), (0, 0)))
    B, H, W, C = x.shape
    OH = (H - k) // stride + 1
    OW = (W - k) // stride + 1
    slabs = []
    for i in range(k):
        for j in range(k):
            slabs.append(x[:, i:i + stride * (OH - 1) + 1:stride,
                            j:j + stride * (OW - 1) + 1:stride, :])
    p = jnp.stack(slabs, axis=3)                   # (B, OH, OW, kk, C)
    return p.reshape(B * OH * OW, k * k * C), OH, OW


# ---------------------------------------------------------------------------
# Model forward
# ---------------------------------------------------------------------------
def model_forward(points, pp, num_classes):
    """points: (B, num_frames, num_points, >=4).  Returns (logits, features)."""
    # X_IDX..V_IDX assumed 0..3; the 4 attribute branches ride the channel axis.
    x = points[..., :4].astype(jnp.bfloat16)               # (B, F, P, 4) NHWC
    B = x.shape[0]

    # 4x AttributeNetwork.conv1 (1->4, 7x7, stride 2) + BN + ReLU, block-diag.
    xm, OH, OW = _conv_patches(x, 7, 2, 0)
    y = fused_matmul(xm, pp["w1"], pp["s1"], pp["b1"], relu=True,
                     out_dtype=jnp.bfloat16).reshape(B, OH, OW, CPAD)

    # MaxPool2d(3, 2)
    y = pool2d(y, 3, 2, "max")

    # 4x ResidualBlock(4 -> 8), block-diagonal across branches.
    identity = y
    xm, OH, OW = _conv_patches(y, 3, 1, 1)
    y = fused_matmul(xm, pp["w_rb1"], pp["s_rb1"], pp["b_rb1"], relu=True,
                     out_dtype=jnp.bfloat16).reshape(B, OH, OW, CPAD)
    xm, OH, OW = _conv_patches(y, 3, 1, 1)
    idm = identity.reshape(B * OH * OW, CPAD)      # 1x1 downsample == matmul
    y = fused_matmul(xm, pp["w_rb2"], pp["s_rb2"], pp["b_rb2"],
                     extra=(idm, pp["w_dn"], pp["s_dn"], pp["b_dn"]),
                     relu=True, out_dtype=jnp.bfloat16).reshape(B, OH, OW, CPAD)

    # FeatureFusion: Conv(32->16, 3x3, pad 1) + BN + ReLU, then AvgPool(2,2).
    xm, OH, OW = _conv_patches(y, 3, 1, 1)
    y = fused_matmul(xm, pp["w_ff"], pp["s_ff"], pp["b_ff"], relu=True,
                     out_dtype=jnp.float32).reshape(B, OH, OW, CPAD)
    y = pool2d(y, 2, 2, "avg")

    # Flatten in PyTorch NCHW order over the 16 real channels.
    feats = jnp.transpose(y[..., :16], (0, 3, 1, 2)).reshape(B, -1)

    # FC head (f32, N padded to 128; slice back to num_classes).
    logits = fused_matmul(feats, pp["w_fc"], pp["s_fc"], pp["b_fc"],
                          relu=False, out_dtype=jnp.float32)
    return logits[:, :num_classes], feats


# ---------------------------------------------------------------------------
# One-time parameter preparation: block-diag packing, BN fold, padding, bf16
# ---------------------------------------------------------------------------
def _fold_bn(bias, bn):
    gamma, beta, mean, var = bn
    scale = gamma / jnp.sqrt(var + BN_EPS)
    shift = (bias - mean) * scale + beta
    return scale, shift


def _pad_to(v, n):
    return jnp.pad(v, (0, n - v.shape[0]))


def _blockdiag_weight(w_list, cin_pad, cout_pad=CPAD):
    """Pack per-branch PyTorch conv weights (cout,cin,kh,kw) block-diagonally
    into one (kh*kw*cin_pad, cout_pad) im2col weight matrix."""
    cout, cin, kh, kw = w_list[0].shape
    w = jnp.zeros((kh * kw, cin_pad, cout_pad), jnp.float32)
    for b, wb in enumerate(w_list):
        wr = jnp.transpose(wb, (2, 3, 1, 0)).reshape(kh * kw, cin, cout)
        w = w.at[:, b * cin:(b + 1) * cin, b * cout:(b + 1) * cout].set(wr)
    return w.reshape(kh * kw * cin_pad, cout_pad)


def prepare_params(raw):
    """Hoisted out of the forward pass: runs once, outside jit."""
    br = raw["branches"]

    def branch_scale_shift(conv_key, bn_key):
        sc, sh = zip(*(_fold_bn(b[conv_key][1], b[bn_key]) for b in br))
        return (_pad_to(jnp.concatenate(sc), CPAD),
                _pad_to(jnp.concatenate(sh), CPAD))

    def bf16(w):
        return w.astype(jnp.bfloat16)

    pp = {}
    # conv1: per-branch (4,1,7,7); inputs are the raw 4 attribute channels.
    pp["w1"] = bf16(_blockdiag_weight([b["conv1"][0] for b in br], cin_pad=4))
    pp["s1"], pp["b1"] = branch_scale_shift("conv1", "bn1")
    # ResidualBlock convs; inputs/outputs live in the CPAD-padded channel space.
    pp["w_rb1"] = bf16(_blockdiag_weight([b["rb_conv1"][0] for b in br], CPAD))
    pp["s_rb1"], pp["b_rb1"] = branch_scale_shift("rb_conv1", "rb_bn1")
    pp["w_rb2"] = bf16(_blockdiag_weight([b["rb_conv2"][0] for b in br], CPAD))
    pp["s_rb2"], pp["b_rb2"] = branch_scale_shift("rb_conv2", "rb_bn2")
    pp["w_dn"] = bf16(_blockdiag_weight([b["rb_down"][0] for b in br], CPAD))
    pp["s_dn"], pp["b_dn"] = branch_scale_shift("rb_down", "rb_down_bn")
    # FeatureFusion conv (dense across branches: 32 -> 16 real channels).
    ff_w, ff_b = raw["ff_conv"]
    kh, kw = ff_w.shape[2:]
    w_ff = jnp.zeros((kh * kw, CPAD, CPAD), jnp.float32)
    w_ff = w_ff.at[:, :32, :16].set(
        jnp.transpose(ff_w, (2, 3, 1, 0)).reshape(kh * kw, 32, 16))
    pp["w_ff"] = bf16(w_ff.reshape(kh * kw * CPAD, CPAD))
    s_ff, b_ff = _fold_bn(ff_b, raw["ff_bn"])
    pp["s_ff"], pp["b_ff"] = _pad_to(s_ff, CPAD), _pad_to(b_ff, CPAD)
    # FC head (kept f32; N padded to a lane-dense multiple of 128).
    fc_w, fc_b = raw["fc_w"], raw["fc_b"]
    ncp = ((fc_b.shape[0] + CPAD - 1) // CPAD) * CPAD
    pp["w_fc"] = jnp.pad(fc_w, ((0, 0), (0, ncp - fc_w.shape[1])))
    pp["s_fc"] = jnp.ones((ncp,), jnp.float32)
    pp["b_fc"] = _pad_to(fc_b, ncp)
    return pp


# ---------------------------------------------------------------------------
# Deterministic synthetic parameter init (shapes taken from the nn.Module)
# ---------------------------------------------------------------------------
def feature_size(F, P):
    def after(h):
        h = (h - 7) // 2 + 1   # Conv2d(1,4,7,stride=2)
        h = (h - 3) // 2 + 1   # MaxPool2d(3,2)
        h = h // 2             # AvgPool2d(2,2)
        return h
    return 16 * after(F) * after(P)


def init_params(key, feat_size, num_classes):
    keys = iter(jax.random.split(key, 128))

    def conv(cout, cin, k):
        w = 0.1 * jax.random.normal(next(keys), (cout, cin, k, k), jnp.float32)
        b = 0.1 * jax.random.normal(next(keys), (cout,), jnp.float32)
        return w, b

    def bn(c):
        gamma = 1.0 + 0.1 * jax.random.normal(next(keys), (c,), jnp.float32)
        beta = 0.1 * jax.random.normal(next(keys), (c,), jnp.float32)
        mean = 0.1 * jax.random.normal(next(keys), (c,), jnp.float32)
        var = 0.5 + jax.random.uniform(next(keys), (c,), jnp.float32)
        return (gamma, beta, mean, var)

    def attribute_net_params():
        return dict(
            conv1=conv(4, 1, 7), bn1=bn(4),
            rb_conv1=conv(8, 4, 3), rb_bn1=bn(8),
            rb_conv2=conv(8, 8, 3), rb_bn2=bn(8),
            rb_down=conv(8, 4, 1), rb_down_bn=bn(8),
        )

    return dict(
        branches=[attribute_net_params() for _ in range(4)],
        ff_conv=conv(16, 32, 3), ff_bn=bn(16),
        fc_w=0.1 * jax.random.normal(next(keys), (feat_size, num_classes),
                                     jnp.float32),
        fc_b=0.1 * jax.random.normal(next(keys), (num_classes,), jnp.float32),
    )


if __name__ == "__main__":
    key = jax.random.PRNGKey(0)
    pts_key, param_key = jax.random.split(key)

    B, F, P = 2, 32, 32          # batch, num_frames_in_window, num_points_in_frame
    num_classes = 10
    points = jax.random.normal(pts_key, (B, F, P, 5), jnp.float32)

    fs = feature_size(F, P)      # 16 * 3 * 3 = 144 for 32x32 input
    raw_params = init_params(param_key, fs, num_classes)
    pp = prepare_params(raw_params)   # one-time weight folding / packing

    fwd = jax.jit(model_forward, static_argnums=2)
    logits, features = fwd(points, pp, num_classes)
    jax.block_until_ready((logits, features))

    assert logits.shape == (B, num_classes), logits.shape
    assert features.shape == (B, fs), features.shape
    assert jnp.all(jnp.isfinite(logits)) and jnp.all(jnp.isfinite(features))
    print("KERNEL_OK")
</pallas_src>

<mosaic_0001>
module attributes {stable_mosaic.version = 11 : i64} {
  func.func @kernel(%arg0: i32, %arg1: memref<256x196xbf16, #tpu.memory_space<vmem>>, %arg2: memref<196x128xbf16, #tpu.memory_space<vmem>>, %arg3: memref<1x128xf32, #tpu.memory_space<vmem>>, %arg4: memref<1x128xf32, #tpu.memory_space<vmem>>, %arg5: memref<256x128xbf16, #tpu.memory_space<vmem>>) attributes {dimension_semantics = [#tpu.dimension_semantics<parallel>], iteration_bounds = array<i64: 2>, scalar_prefetch = 0 : i64, scratch_operands = 0 : i64, tpu.core_type = #tpu.core_type<tc>, window_params = [{transform_indices = @transform_0, window_bounds = array<i64: 256, 196>}, {pipeline_mode = #tpu.pipeline_mode<synchronous>, transform_indices = @transform_1, window_bounds = array<i64: 196, 128>}, {pipeline_mode = #tpu.pipeline_mode<synchronous>, transform_indices = @transform_2, window_bounds = array<i64: 1, 128>}, {pipeline_mode = #tpu.pipeline_mode<synchronous>, transform_indices = @transform_3, window_bounds = array<i64: 1, 128>}, {transform_indices = @transform_4, window_bounds = array<i64: 256, 128>}]} {
    %c0 = arith.constant 0 : index
    %c0_0 = arith.constant 0 : index
    %0 = vector.load %arg1[%c0, %c0_0] : memref<256x196xbf16, #tpu.memory_space<vmem>>, vector<256x196xbf16>
    %c0_1 = arith.constant 0 : index
    %c0_2 = arith.constant 0 : index
    %1 = vector.load %arg2[%c0_1, %c0_2] : memref<196x128xbf16, #tpu.memory_space<vmem>>, vector<196x128xbf16>
    %cst = arith.constant dense<0.000000e+00> : vector<256x128xf32>
    %2 = tpu.matmul %0, %1, %cst {dimension_numbers = #tpu.dot_dimension_numbers<[1], [0], [0], [1], [0, 0, 1, 1], [], []>} : vector<256x196xbf16>, vector<196x128xbf16>, vector<256x128xf32> -> vector<256x128xf32>
    %c0_3 = arith.constant 0 : index
    %c0_4 = arith.constant 0 : index
    %3 = vector.load %arg3[%c0_3, %c0_4] : memref<1x128xf32, #tpu.memory_space<vmem>>, vector<1x128xf32>
    %4 = vector.broadcast %3 : vector<1x128xf32> to vector<256x128xf32>
    %5 = arith.mulf %2, %4 : vector<256x128xf32>
    %c0_5 = arith.constant 0 : index
    %c0_6 = arith.constant 0 : index
    %6 = vector.load %arg4[%c0_5, %c0_6] : memref<1x128xf32, #tpu.memory_space<vmem>>, vector<1x128xf32>
    %7 = vector.broadcast %6 : vector<1x128xf32> to vector<256x128xf32>
    %8 = arith.addf %5, %7 : vector<256x128xf32>
    %cst_7 = arith.constant 0.000000e+00 : f32
    %9 = vector.broadcast %cst_7 : f32 to vector<256x128xf32>
    %10 = arith.maximumf %8, %9 : vector<256x128xf32>
    %11 = arith.truncf %10 : vector<256x128xf32> to vector<256x128xbf16>
    %c0_8 = arith.constant 0 : index
    %c0_9 = arith.constant 0 : index
    %12 = vector.load %arg5[%c0_8, %c0_9] : memref<256x128xbf16, #tpu.memory_space<vmem>>, vector<256x128xbf16>
    tpu.vector_store %arg5[%c0_8, %c0_9], %11 {strides = array<i32>} : memref<256x128xbf16, #tpu.memory_space<vmem>>, vector<256x128xbf16>,
    return
  }
  func.func @transform_0(%arg0: i32) -> (i32, i32) {
    %c0_i32 = arith.constant 0 : i32
    %c0_i32_0 = arith.constant 0 : i32
    return %arg0, %c0_i32 : i32, i32
  }
  func.func @transform_1(%arg0: i32) -> (i32, i32) {
    %c0_i32 = arith.constant 0 : i32
    %c0_i32_0 = arith.constant 0 : i32
    %c0_i32_1 = arith.constant 0 : i32
    return %c0_i32, %c0_i32_0 : i32, i32
  }
  func.func @transform_2(%arg0: i32) -> (i32, i32) {
    %c0_i32 = arith.constant 0 : i32
    %c0_i32_0 = arith.constant 0 : i32
    %c0_i32_1 = arith.constant 0 : i32
    return %c0_i32, %c0_i32_0 : i32, i32
  }
  func.func @transform_3(%arg0: i32) -> (i32, i32) {
    %c0_i32 = arith.constant 0 : i32
    %c0_i32_0 = arith.constant 0 : i32
    %c0_i32_1 = arith.constant 0 : i32
    return %c0_i32, %c0_i32_0 : i32, i32
  }
  func.func @transform_4(%arg0: i32) -> (i32, i32) {
    %c0_i32 = arith.constant 0 : i32
    %c0_i32_0 = arith.constant 0 : i32
    return %arg0, %c0_i32 : i32, i32
  }
}

module attributes {stable_mosaic.version = 11 : i64} {
  func.func @kernel(%arg0: i32, %arg1: memref<9x72x128xbf16, #tpu.memory_space<vmem>>, %arg2: memref<72x128xbf16, #tpu.memory_space<vmem>>) attributes {dimension_semantics = [#tpu.dimension_semantics<arbitrary>], iteration_bounds = array<i64: 1>, scalar_prefetch = 0 : i64, scratch_operands = 0 : i64, tpu.core_type = #tpu.core_type<tc>, window_params = [{pipeline_mode = #tpu.pipeline_mode<synchronous>, transform_indices = @transform_0, window_bounds = array<i64: 9, 72, 128>}, {pipeline_mode = #tpu.pipeline_mode<synchronous>, transform_indices = @transform_1, window_bounds = array<i64: 72, 128>}]} {
    %c0 = arith.constant 0 : index
    %c0_0 = arith.constant 0 : index
    %c0_1 = arith.constant 0 : index
    %0 = vector.load %arg1[%c0, %c0_0, %c0_1] : memref<9x72x128xbf16, #tpu.memory_space<vmem>>, vector<1x72x128xbf16>
    %1 = vector.shape_cast %0 : vector<1x72x128xbf16> to vector<72x128xbf16>
    %2 = arith.extf %1 : vector<72x128xbf16> to vector<72x128xf32>
    %c1 = arith.constant 1 : index
    %c0_2 = arith.constant 0 : index
    %c0_3 = arith.constant 0 : index
    %3 = vector.load %arg1[%c1, %c0_2, %c0_3] : memref<9x72x128xbf16, #tpu.memory_space<vmem>>, vector<1x72x128xbf16>
    %4 = vector.shape_cast %3 : vector<1x72x128xbf16> to vector<72x128xbf16>
    %5 = arith.extf %4 : vector<72x128xbf16> to vector<72x128xf32>
    %6 = arith.maximumf %2, %5 : vector<72x128xf32>
    %c2 = arith.constant 2 : index
    %c0_4 = arith.constant 0 : index
    %c0_5 = arith.constant 0 : index
    %7 = vector.load %arg1[%c2, %c0_4, %c0_5] : memref<9x72x128xbf16, #tpu.memory_space<vmem>>, vector<1x72x128xbf16>
    %8 = vector.shape_cast %7 : vector<1x72x128xbf16> to vector<72x128xbf16>
    %9 = arith.extf %8 : vector<72x128xbf16> to vector<72x128xf32>
    %10 = arith.maximumf %6, %9 : vector<72x128xf32>
    %c3 = arith.constant 3 : index
    %c0_6 = arith.constant 0 : index
    %c0_7 = arith.constant 0 : index
    %11 = vector.load %arg1[%c3, %c0_6, %c0_7] : memref<9x72x128xbf16, #tpu.memory_space<vmem>>, vector<1x72x128xbf16>
    %12 = vector.shape_cast %11 : vector<1x72x128xbf16> to vector<72x128xbf16>
    %13 = arith.extf %12 : vector<72x128xbf16> to vector<72x128xf32>
    %14 = arith.maximumf %10, %13 : vector<72x128xf32>
    %c4 = arith.constant 4 : index
    %c0_8 = arith.constant 0 : index
    %c0_9 = arith.constant 0 : index
    %15 = vector.load %arg1[%c4, %c0_8, %c0_9] : memref<9x72x128xbf16, #tpu.memory_space<vmem>>, vector<1x72x128xbf16>
    %16 = vector.shape_cast %15 : vector<1x72x128xbf16> to vector<72x128xbf16>
    %17 = arith.extf %16 : vector<72x128xbf16> to vector<72x128xf32>
    %18 = arith.maximumf %14, %17 : vector<72x128xf32>
    %c5 = arith.constant 5 : index
    %c0_10 = arith.constant 0 : index
    %c0_11 = arith.constant 0 : index
    %19 = vector.load %arg1[%c5, %c0_10, %c0_11] : memref<9x72x128xbf16, #tpu.memory_space<vmem>>, vector<1x72x128xbf16>
    %20 = vector.shape_cast %19 : vector<1x72x128xbf16> to vector<72x128xbf16>
    %21 = arith.extf %20 : vector<72x128xbf16> to vector<72x128xf32>
    %22 = arith.maximumf %18, %21 : vector<72x128xf32>
    %c6 = arith.constant 6 : index
    %c0_12 = arith.constant 0 : index
    %c0_13 = arith.constant 0 : index
    %23 = vector.load %arg1[%c6, %c0_12, %c0_13] : memref<9x72x128xbf16, #tpu.memory_space<vmem>>, vector<1x72x128xbf16>
    %24 = vector.shape_cast %23 : vector<1x72x128xbf16> to vector<72x128xbf16>
    %25 = arith.extf %24 : vector<72x128xbf16> to vector<72x128xf32>
    %26 = arith.maximumf %22, %25 : vector<72x128xf32>
    %c7 = arith.constant 7 : index
    %c0_14 = arith.constant 0 : index
    %c0_15 = arith.constant 0 : index
    %27 = vector.load %arg1[%c7, %c0_14, %c0_15] : memref<9x72x128xbf16, #tpu.memory_space<vmem>>, vector<1x72x128xbf16>
    %28 = vector.shape_cast %27 : vector<1x72x128xbf16> to vector<72x128xbf16>
    %29 = arith.extf %28 : vector<72x128xbf16> to vector<72x128xf32>
    %30 = arith.maximumf %26, %29 : vector<72x128xf32>
    %c8 = arith.constant 8 : index
    %c0_16 = arith.constant 0 : index
    %c0_17 = arith.constant 0 : index
    %31 = vector.load %arg1[%c8, %c0_16, %c0_17] : memref<9x72x128xbf16, #tpu.memory_space<vmem>>, vector<1x72x128xbf16>
    %32 = vector.shape_cast %31 : vector<1x72x128xbf16> to vector<72x128xbf16>
    %33 = arith.extf %32 : vector<72x128xbf16> to vector<72x128xf32>
    %34 = arith.maximumf %30, %33 : vector<72x128xf32>
    %35 = arith.truncf %34 : vector<72x128xf32> to vector<72x128xbf16>
    %c0_18 = arith.constant 0 : index
    %c0_19 = arith.constant 0 : index
    %36 = vector.load %arg2[%c0_18, %c0_19] : memref<72x128xbf16, #tpu.memory_space<vmem>>, vector<72x128xbf16>
    tpu.vector_store %arg2[%c0_18, %c0_19], %35 {strides = array<i32>} : memref<72x128xbf16, #tpu.memory_space<vmem>>, vector<72x128xbf16>,
    return
  }
  func.func @transform_0(%arg0: i32) -> (i32, i32, i32) {
    %c0_i32 = arith.constant 0 : i32
    %c0_i32_0 = arith.constant 0 : i32
    %c0_i32_1 = arith.constant 0 : i32
    %c0_i32_2 = arith.constant 0 : i32
    return %c0_i32, %c0_i32_0, %c0_i32_1 : i32, i32, i32
  }
  func.func @transform_1(%arg0: i32) -> (i32, i32) {
    %c0_i32 = arith.constant 0 : i32
    %c0_i32_0 = arith.constant 0 : i32
    %c0_i32_1 = arith.constant 0 : i32
    return %c0_i32, %c0_i32_0 : i32, i32
  }
}

module attributes {stable_mosaic.version = 11 : i64} {
  func.func @kernel(%arg0: i32, %arg1: memref<72x1152xbf16, #tpu.memory_space<vmem>>, %arg2: memref<1152x128xbf16, #tpu.memory_space<vmem>>, %arg3: memref<1x128xf32, #tpu.memory_space<vmem>>, %arg4: memref<1x128xf32, #tpu.memory_space<vmem>>, %arg5: memref<72x128xbf16, #tpu.memory_space<vmem>>) attributes {dimension_semantics = [#tpu.dimension_semantics<parallel>], iteration_bounds = array<i64: 1>, scalar_prefetch = 0 : i64, scratch_operands = 0 : i64, tpu.core_type = #tpu.core_type<tc>, window_params = [{transform_indices = @transform_0, window_bounds = array<i64: 72, 1152>}, {pipeline_mode = #tpu.pipeline_mode<synchronous>, transform_indices = @transform_1, window_bounds = array<i64: 1152, 128>}, {pipeline_mode = #tpu.pipeline_mode<synchronous>, transform_indices = @transform_2, window_bounds = array<i64: 1, 128>}, {pipeline_mode = #tpu.pipeline_mode<synchronous>, transform_indices = @transform_3, window_bounds = array<i64: 1, 128>}, {transform_indices = @transform_4, window_bounds = array<i64: 72, 128>}]} {
    %c0 = arith.constant 0 : index
    %c0_0 = arith.constant 0 : index
    %0 = vector.load %arg1[%c0, %c0_0] : memref<72x1152xbf16, #tpu.memory_space<vmem>>, vector<72x1152xbf16>
    %c0_1 = arith.constant 0 : index
    %c0_2 = arith.constant 0 : index
    %1 = vector.load %arg2[%c0_1, %c0_2] : memref<1152x128xbf16, #tpu.memory_space<vmem>>, vector<1152x128xbf16>
    %cst = arith.constant dense<0.000000e+00> : vector<72x128xf32>
    %2 = tpu.matmul %0, %1, %cst {dimension_numbers = #tpu.dot_dimension_numbers<[1], [0], [0], [1], [0, 0, 1, 1], [], []>} : vector<72x1152xbf16>, vector<1152x128xbf16>, vector<72x128xf32> -> vector<72x128xf32>
    %c0_3 = arith.constant 0 : index
    %c0_4 = arith.constant 0 : index
    %3 = vector.load %arg3[%c0_3, %c0_4] : memref<1x128xf32, #tpu.memory_space<vmem>>, vector<1x128xf32>
    %4 = vector.broadcast %3 : vector<1x128xf32> to vector<72x128xf32>
    %5 = arith.mulf %2, %4 : vector<72x128xf32>
    %c0_5 = arith.constant 0 : index
    %c0_6 = arith.constant 0 : index
    %6 = vector.load %arg4[%c0_5, %c0_6] : memref<1x128xf32, #tpu.memory_space<vmem>>, vector<1x128xf32>
    %7 = vector.broadcast %6 : vector<1x128xf32> to vector<72x128xf32>
    %8 = arith.addf %5, %7 : vector<72x128xf32>
    %cst_7 = arith.constant 0.000000e+00 : f32
    %9 = vector.broadcast %cst_7 : f32 to vector<72x128xf32>
    %10 = arith.maximumf %8, %9 : vector<72x128xf32>
    %11 = arith.truncf %10 : vector<72x128xf32> to vector<72x128xbf16>
    %c0_8 = arith.constant 0 : index
    %c0_9 = arith.constant 0 : index
    %12 = vector.load %arg5[%c0_8, %c0_9] : memref<72x128xbf16, #tpu.memory_space<vmem>>, vector<72x128xbf16>
    tpu.vector_store %arg5[%c0_8, %c0_9], %11 {strides = array<i32>} : memref<72x128xbf16, #tpu.memory_space<vmem>>, vector<72x128xbf16>,
    return
  }
  func.func @transform_0(%arg0: i32) -> (i32, i32) {
    %c0_i32 = arith.constant 0 : i32
    %c0_i32_0 = arith.constant 0 : i32
    return %arg0, %c0_i32 : i32, i32
  }
  func.func @transform_1(%arg0: i32) -> (i32, i32) {
    %c0_i32 = arith.constant 0 : i32
    %c0_i32_0 = arith.constant 0 : i32
    %c0_i32_1 = arith.constant 0 : i32
    return %c0_i32, %c0_i32_0 : i32, i32
  }
  func.func @transform_2(%arg0: i32) -> (i32, i32) {
    %c0_i32 = arith.constant 0 : i32
    %c0_i32_0 = arith.constant 0 : i32
    %c0_i32_1 = arith.constant 0 : i32
    return %c0_i32, %c0_i32_0 : i32, i32
  }
  func.func @transform_3(%arg0: i32) -> (i32, i32) {
    %c0_i32 = arith.constant 0 : i32
    %c0_i32_0 = arith.constant 0 : i32
    %c0_i32_1 = arith.constant 0 : i32
    return %c0_i32, %c0_i32_0 : i32, i32
  }
  func.func @transform_4(%arg0: i32) -> (i32, i32) {
    %c0_i32 = arith.constant 0 : i32
    %c0_i32_0 = arith.constant 0 : i32
    return %arg0, %c0_i32 : i32, i32
  }
}

module attributes {stable_mosaic.version = 11 : i64} {
  func.func @kernel(%arg0: i32, %arg1: memref<72x1152xbf16, #tpu.memory_space<vmem>>, %arg2: memref<1152x128xbf16, #tpu.memory_space<vmem>>, %arg3: memref<1x128xf32, #tpu.memory_space<vmem>>, %arg4: memref<1x128xf32, #tpu.memory_space<vmem>>, %arg5: memref<72x128xbf16, #tpu.memory_space<vmem>>, %arg6: memref<128x128xbf16, #tpu.memory_space<vmem>>, %arg7: memref<1x128xf32, #tpu.memory_space<vmem>>, %arg8: memref<1x128xf32, #tpu.memory_space<vmem>>, %arg9: memref<72x128xbf16, #tpu.memory_space<vmem>>) attributes {dimension_semantics = [#tpu.dimension_semantics<parallel>], iteration_bounds = array<i64: 1>, scalar_prefetch = 0 : i64, scratch_operands = 0 : i64, tpu.core_type = #tpu.core_type<tc>, window_params = [{transform_indices = @transform_0, window_bounds = array<i64: 72, 1152>}, {pipeline_mode = #tpu.pipeline_mode<synchronous>, transform_indices = @transform_1, window_bounds = array<i64: 1152, 128>}, {pipeline_mode = #tpu.pipeline_mode<synchronous>, transform_indices = @transform_2, window_bounds = array<i64: 1, 128>}, {pipeline_mode = #tpu.pipeline_mode<synchronous>, transform_indices = @transform_3, window_bounds = array<i64: 1, 128>}, {transform_indices = @transform_4, window_bounds = array<i64: 72, 128>}, {pipeline_mode = #tpu.pipeline_mode<synchronous>, transform_indices = @transform_5, window_bounds = array<i64: 128, 128>}, {pipeline_mode = #tpu.pipeline_mode<synchronous>, transform_indices = @transform_6, window_bounds = array<i64: 1, 128>}, {pipeline_mode = #tpu.pipeline_mode<synchronous>, transform_indices = @transform_7, window_bounds = array<i64: 1, 128>}, {transform_indices = @transform_8, window_bounds = array<i64: 72, 128>}]} {
    %c0 = arith.constant 0 : index
    %c0_0 = arith.constant 0 : index
    %0 = vector.load %arg1[%c0, %c0_0] : memref<72x1152xbf16, #tpu.memory_space<vmem>>, vector<72x1152xbf16>
    %c0_1 = arith.constant 0 : index
    %c0_2 = arith.constant 0 : index
    %1 = vector.load %arg2[%c0_1, %c0_2] : memref<1152x128xbf16, #tpu.memory_space<vmem>>, vector<1152x128xbf16>
    %cst = arith.constant dense<0.000000e+00> : vector<72x128xf32>
    %2 = tpu.matmul %0, %1, %cst {dimension_numbers = #tpu.dot_dimension_numbers<[1], [0], [0], [1], [0, 0, 1, 1], [], []>} : vector<72x1152xbf16>, vector<1152x128xbf16>, vector<72x128xf32> -> vector<72x128xf32>
    %c0_3 = arith.constant 0 : index
    %c0_4 = arith.constant 0 : index
    %3 = vector.load %arg3[%c0_3, %c0_4] : memref<1x128xf32, #tpu.memory_space<vmem>>, vector<1x128xf32>
    %4 = vector.broadcast %3 : vector<1x128xf32> to vector<72x128xf32>
    %5 = arith.mulf %2, %4 : vector<72x128xf32>
    %c0_5 = arith.constant 0 : index
    %c0_6 = arith.constant 0 : index
    %6 = vector.load %arg4[%c0_5, %c0_6] : memref<1x128xf32, #tpu.memory_space<vmem>>, vector<1x128xf32>
    %7 = vector.broadcast %6 : vector<1x128xf32> to vector<72x128xf32>
    %8 = arith.addf %5, %7 : vector<72x128xf32>
    %c0_7 = arith.constant 0 : index
    %c0_8 = arith.constant 0 : index
    %9 = vector.load %arg5[%c0_7, %c0_8] : memref<72x128xbf16, #tpu.memory_space<vmem>>, vector<72x128xbf16>
    %c0_9 = arith.constant 0 : index
    %c0_10 = arith.constant 0 : index
    %10 = vector.load %arg6[%c0_9, %c0_10] : memref<128x128xbf16, #tpu.memory_space<vmem>>, vector<128x128xbf16>
    %cst_11 = arith.constant dense<0.000000e+00> : vector<72x128xf32>
    %11 = tpu.matmul %9, %10, %cst_11 {dimension_numbers = #tpu.dot_dimension_numbers<[1], [0], [0], [1], [0, 0, 1, 1], [], []>} : vector<72x128xbf16>, vector<128x128xbf16>, vector<72x128xf32> -> vector<72x128xf32>
    %c0_12 = arith.constant 0 : index
    %c0_13 = arith.constant 0 : index
    %12 = vector.load %arg7[%c0_12, %c0_13] : memref<1x128xf32, #tpu.memory_space<vmem>>, vector<1x128xf32>
    %13 = vector.broadcast %12 : vector<1x128xf32> to vector<72x128xf32>
    %14 = arith.mulf %11, %13 : vector<72x128xf32>
    %15 = arith.addf %8, %14 : vector<72x128xf32>
    %c0_14 = arith.constant 0 : index
    %c0_15 = arith.constant 0 : index
    %16 = vector.load %arg8[%c0_14, %c0_15] : memref<1x128xf32, #tpu.memory_space<vmem>>, vector<1x128xf32>
    %17 = vector.broadcast %16 : vector<1x128xf32> to vector<72x128xf32>
    %18 = arith.addf %15, %17 : vector<72x128xf32>
    %cst_16 = arith.constant 0.000000e+00 : f32
    %19 = vector.broadcast %cst_16 : f32 to vector<72x128xf32>
    %20 = arith.maximumf %18, %19 : vector<72x128xf32>
    %21 = arith.truncf %20 : vector<72x128xf32> to vector<72x128xbf16>
    %c0_17 = arith.constant 0 : index
    %c0_18 = arith.constant 0 : index
    %22 = vector.load %arg9[%c0_17, %c0_18] : memref<72x128xbf16, #tpu.memory_space<vmem>>, vector<72x128xbf16>
    tpu.vector_store %arg9[%c0_17, %c0_18], %21 {strides = array<i32>} : memref<72x128xbf16, #tpu.memory_space<vmem>>, vector<72x128xbf16>,
    return
  }
  func.func @transform_0(%arg0: i32) -> (i32, i32) {
    %c0_i32 = arith.constant 0 : i32
    %c0_i32_0 = arith.constant 0 : i32
    return %arg0, %c0_i32 : i32, i32
  }
  func.func @transform_1(%arg0: i32) -> (i32, i32) {
    %c0_i32 = arith.constant 0 : i32
    %c0_i32_0 = arith.constant 0 : i32
    %c0_i32_1 = arith.constant 0 : i32
    return %c0_i32, %c0_i32_0 : i32, i32
  }
  func.func @transform_2(%arg0: i32) -> (i32, i32) {
    %c0_i32 = arith.constant 0 : i32
    %c0_i32_0 = arith.constant 0 : i32
    %c0_i32_1 = arith.constant 0 : i32
    return %c0_i32, %c0_i32_0 : i32, i32
  }
  func.func @transform_3(%arg0: i32) -> (i32, i32) {
    %c0_i32 = arith.constant 0 : i32
    %c0_i32_0 = arith.constant 0 : i32
    %c0_i32_1 = arith.constant 0 : i32
    return %c0_i32, %c0_i32_0 : i32, i32
  }
  func.func @transform_4(%arg0: i32) -> (i32, i32) {
    %c0_i32 = arith.constant 0 : i32
    %c0_i32_0 = arith.constant 0 : i32
    return %arg0, %c0_i32 : i32, i32
  }
  func.func @transform_5(%arg0: i32) -> (i32, i32) {
    %c0_i32 = arith.constant 0 : i32
    %c0_i32_0 = arith.constant 0 : i32
    %c0_i32_1 = arith.constant 0 : i32
    return %c0_i32, %c0_i32_0 : i32, i32
  }
  func.func @transform_6(%arg0: i32) -> (i32, i32) {
    %c0_i32 = arith.constant 0 : i32
    %c0_i32_0 = arith.constant 0 : i32
    %c0_i32_1 = arith.constant 0 : i32
    return %c0_i32, %c0_i32_0 : i32, i32
  }
  func.func @transform_7(%arg0: i32) -> (i32, i32) {
    %c0_i32 = arith.constant 0 : i32
    %c0_i32_0 = arith.constant 0 : i32
    %c0_i32_1 = arith.constant 0 : i32
    return %c0_i32, %c0_i32_0 : i32, i32
  }
  func.func @transform_8(%arg0: i32) -> (i32, i32) {
    %c0_i32 = arith.constant 0 : i32
    %c0_i32_0 = arith.constant 0 : i32
    return %arg0, %c0_i32 : i32, i32
  }
}

module attributes {stable_mosaic.version = 11 : i64} {
  func.func @kernel(%arg0: i32, %arg1: memref<72x1152xbf16, #tpu.memory_space<vmem>>, %arg2: memref<1152x128xbf16, #tpu.memory_space<vmem>>, %arg3: memref<1x128xf32, #tpu.memory_space<vmem>>, %arg4: memref<1x128xf32, #tpu.memory_space<vmem>>, %arg5: memref<72x128xf32, #tpu.memory_space<vmem>>) attributes {dimension_semantics = [#tpu.dimension_semantics<parallel>], iteration_bounds = array<i64: 1>, scalar_prefetch = 0 : i64, scratch_operands = 0 : i64, tpu.core_type = #tpu.core_type<tc>, window_params = [{transform_indices = @transform_0, window_bounds = array<i64: 72, 1152>}, {pipeline_mode = #tpu.pipeline_mode<synchronous>, transform_indices = @transform_1, window_bounds = array<i64: 1152, 128>}, {pipeline_mode = #tpu.pipeline_mode<synchronous>, transform_indices = @transform_2, window_bounds = array<i64: 1, 128>}, {pipeline_mode = #tpu.pipeline_mode<synchronous>, transform_indices = @transform_3, window_bounds = array<i64: 1, 128>}, {transform_indices = @transform_4, window_bounds = array<i64: 72, 128>}]} {
    %c0 = arith.constant 0 : index
    %c0_0 = arith.constant 0 : index
    %0 = vector.load %arg1[%c0, %c0_0] : memref<72x1152xbf16, #tpu.memory_space<vmem>>, vector<72x1152xbf16>
    %c0_1 = arith.constant 0 : index
    %c0_2 = arith.constant 0 : index
    %1 = vector.load %arg2[%c0_1, %c0_2] : memref<1152x128xbf16, #tpu.memory_space<vmem>>, vector<1152x128xbf16>
    %cst = arith.constant dense<0.000000e+00> : vector<72x128xf32>
    %2 = tpu.matmul %0, %1, %cst {dimension_numbers = #tpu.dot_dimension_numbers<[1], [0], [0], [1], [0, 0, 1, 1], [], []>} : vector<72x1152xbf16>, vector<1152x128xbf16>, vector<72x128xf32> -> vector<72x128xf32>
    %c0_3 = arith.constant 0 : index
    %c0_4 = arith.constant 0 : index
    %3 = vector.load %arg3[%c0_3, %c0_4] : memref<1x128xf32, #tpu.memory_space<vmem>>, vector<1x128xf32>
    %4 = vector.broadcast %3 : vector<1x128xf32> to vector<72x128xf32>
    %5 = arith.mulf %2, %4 : vector<72x128xf32>
    %c0_5 = arith.constant 0 : index
    %c0_6 = arith.constant 0 : index
    %6 = vector.load %arg4[%c0_5, %c0_6] : memref<1x128xf32, #tpu.memory_space<vmem>>, vector<1x128xf32>
    %7 = vector.broadcast %6 : vector<1x128xf32> to vector<72x128xf32>
    %8 = arith.addf %5, %7 : vector<72x128xf32>
    %cst_7 = arith.constant 0.000000e+00 : f32
    %9 = vector.broadcast %cst_7 : f32 to vector<72x128xf32>
    %10 = arith.maximumf %8, %9 : vector<72x128xf32>
    %c0_8 = arith.constant 0 : index
    %c0_9 = arith.constant 0 : index
    %11 = vector.load %arg5[%c0_8, %c0_9] : memref<72x128xf32, #tpu.memory_space<vmem>>, vector<72x128xf32>
    tpu.vector_store %arg5[%c0_8, %c0_9], %10 {strides = array<i32>} : memref<72x128xf32, #tpu.memory_space<vmem>>, vector<72x128xf32>,
    return
  }
  func.func @transform_0(%arg0: i32) -> (i32, i32) {
    %c0_i32 = arith.constant 0 : i32
    %c0_i32_0 = arith.constant 0 : i32
    return %arg0, %c0_i32 : i32, i32
  }
  func.func @transform_1(%arg0: i32) -> (i32, i32) {
    %c0_i32 = arith.constant 0 : i32
    %c0_i32_0 = arith.constant 0 : i32
    %c0_i32_1 = arith.constant 0 : i32
    return %c0_i32, %c0_i32_0 : i32, i32
  }
  func.func @transform_2(%arg0: i32) -> (i32, i32) {
    %c0_i32 = arith.constant 0 : i32
    %c0_i32_0 = arith.constant 0 : i32
    %c0_i32_1 = arith.constant 0 : i32
    return %c0_i32, %c0_i32_0 : i32, i32
  }
  func.func @transform_3(%arg0: i32) -> (i32, i32) {
    %c0_i32 = arith.constant 0 : i32
    %c0_i32_0 = arith.constant 0 : i32
    %c0_i32_1 = arith.constant 0 : i32
    return %c0_i32, %c0_i32_0 : i32, i32
  }
  func.func @transform_4(%arg0: i32) -> (i32, i32) {
    %c0_i32 = arith.constant 0 : i32
    %c0_i32_0 = arith.constant 0 : i32
    return %arg0, %c0_i32 : i32, i32
  }
}

module attributes {stable_mosaic.version = 11 : i64} {
  func.func @kernel(%arg0: i32, %arg1: memref<4x18x128xf32, #tpu.memory_space<vmem>>, %arg2: memref<18x128xf32, #tpu.memory_space<vmem>>) attributes {dimension_semantics = [#tpu.dimension_semantics<arbitrary>], iteration_bounds = array<i64: 1>, scalar_prefetch = 0 : i64, scratch_operands = 0 : i64, tpu.core_type = #tpu.core_type<tc>, window_params = [{pipeline_mode = #tpu.pipeline_mode<synchronous>, transform_indices = @transform_0, window_bounds = array<i64: 4, 18, 128>}, {pipeline_mode = #tpu.pipeline_mode<synchronous>, transform_indices = @transform_1, window_bounds = array<i64: 18, 128>}]} {
    %c0 = arith.constant 0 : index
    %c0_0 = arith.constant 0 : index
    %c0_1 = arith.constant 0 : index
    %0 = vector.load %arg1[%c0, %c0_0, %c0_1] : memref<4x18x128xf32, #tpu.memory_space<vmem>>, vector<1x18x128xf32>
    %1 = vector.shape_cast %0 : vector<1x18x128xf32> to vector<18x128xf32>
    %c1 = arith.constant 1 : index
    %c0_2 = arith.constant 0 : index
    %c0_3 = arith.constant 0 : index
    %2 = vector.load %arg1[%c1, %c0_2, %c0_3] : memref<4x18x128xf32, #tpu.memory_space<vmem>>, vector<1x18x128xf32>
    %3 = vector.shape_cast %2 : vector<1x18x128xf32> to vector<18x128xf32>
    %4 = arith.addf %1, %3 : vector<18x128xf32>
    %c2 = arith.constant 2 : index
    %c0_4 = arith.constant 0 : index
    %c0_5 = arith.constant 0 : index
    %5 = vector.load %arg1[%c2, %c0_4, %c0_5] : memref<4x18x128xf32, #tpu.memory_space<vmem>>, vector<1x18x128xf32>
    %6 = vector.shape_cast %5 : vector<1x18x128xf32> to vector<18x128xf32>
    %7 = arith.addf %4, %6 : vector<18x128xf32>
    %c3 = arith.constant 3 : index
    %c0_6 = arith.constant 0 : index
    %c0_7 = arith.constant 0 : index
    %8 = vector.load %arg1[%c3, %c0_6, %c0_7] : memref<4x18x128xf32, #tpu.memory_space<vmem>>, vector<1x18x128xf32>
    %9 = vector.shape_cast %8 : vector<1x18x128xf32> to vector<18x128xf32>
    %10 = arith.addf %7, %9 : vector<18x128xf32>
    %cst = arith.constant 2.500000e-01 : f32
    %11 = vector.broadcast %cst : f32 to vector<18x128xf32>
    %12 = arith.mulf %10, %11 : vector<18x128xf32>
    %c0_8 = arith.constant 0 : index
    %c0_9 = arith.constant 0 : index
    %13 = vector.load %arg2[%c0_8, %c0_9] : memref<18x128xf32, #tpu.memory_space<vmem>>, vector<18x128xf32>
    tpu.vector_store %arg2[%c0_8, %c0_9], %12 {strides = array<i32>} : memref<18x128xf32, #tpu.memory_space<vmem>>, vector<18x128xf32>,
    return
  }
  func.func @transform_0(%arg0: i32) -> (i32, i32, i32) {
    %c0_i32 = arith.constant 0 : i32
    %c0_i32_0 = arith.constant 0 : i32
    %c0_i32_1 = arith.constant 0 : i32
    %c0_i32_2 = arith.constant 0 : i32
    return %c0_i32, %c0_i32_0, %c0_i32_1 : i32, i32, i32
  }
  func.func @transform_1(%arg0: i32) -> (i32, i32) {
    %c0_i32 = arith.constant 0 : i32
    %c0_i32_0 = arith.constant 0 : i32
    %c0_i32_1 = arith.constant 0 : i32
    return %c0_i32, %c0_i32_0 : i32, i32
  }
}

module attributes {stable_mosaic.version = 11 : i64} {
  func.func @kernel(%arg0: i32, %arg1: memref<2x144xf32, #tpu.memory_space<vmem>>, %arg2: memref<144x128xf32, #tpu.memory_space<vmem>>, %arg3: memref<1x128xf32, #tpu.memory_space<vmem>>, %arg4: memref<1x128xf32, #tpu.memory_space<vmem>>, %arg5: memref<2x128xf32, #tpu.memory_space<vmem>>) attributes {dimension_semantics = [#tpu.dimension_semantics<parallel>], iteration_bounds = array<i64: 1>, scalar_prefetch = 0 : i64, scratch_operands = 0 : i64, tpu.core_type = #tpu.core_type<tc>, window_params = [{transform_indices = @transform_0, window_bounds = array<i64: 2, 144>}, {pipeline_mode = #tpu.pipeline_mode<synchronous>, transform_indices = @transform_1, window_bounds = array<i64: 144, 128>}, {pipeline_mode = #tpu.pipeline_mode<synchronous>, transform_indices = @transform_2, window_bounds = array<i64: 1, 128>}, {pipeline_mode = #tpu.pipeline_mode<synchronous>, transform_indices = @transform_3, window_bounds = array<i64: 1, 128>}, {transform_indices = @transform_4, window_bounds = array<i64: 2, 128>}]} {
    %c0 = arith.constant 0 : index
    %c0_0 = arith.constant 0 : index
    %0 = vector.load %arg1[%c0, %c0_0] : memref<2x144xf32, #tpu.memory_space<vmem>>, vector<2x144xf32>
    %c0_1 = arith.constant 0 : index
    %c0_2 = arith.constant 0 : index
    %1 = vector.load %arg2[%c0_1, %c0_2] : memref<144x128xf32, #tpu.memory_space<vmem>>, vector<144x128xf32>
    %cst = arith.constant dense<0.000000e+00> : vector<2x128xf32>
    %2 = tpu.matmul %0, %1, %cst {dimension_numbers = #tpu.dot_dimension_numbers<[1], [0], [0], [1], [0, 0, 1, 1], [], []>} : vector<2x144xf32>, vector<144x128xf32>, vector<2x128xf32> -> vector<2x128xf32>
    %c0_3 = arith.constant 0 : index
    %c0_4 = arith.constant 0 : index
    %3 = vector.load %arg3[%c0_3, %c0_4] : memref<1x128xf32, #tpu.memory_space<vmem>>, vector<1x128xf32>
    %4 = vector.broadcast %3 : vector<1x128xf32> to vector<2x128xf32>
    %5 = arith.mulf %2, %4 : vector<2x128xf32>
    %c0_5 = arith.constant 0 : index
    %c0_6 = arith.constant 0 : index
    %6 = vector.load %arg4[%c0_5, %c0_6] : memref<1x128xf32, #tpu.memory_space<vmem>>, vector<1x128xf32>
    %7 = vector.broadcast %6 : vector<1x128xf32> to vector<2x128xf32>
    %8 = arith.addf %5, %7 : vector<2x128xf32>
    %c0_7 = arith.constant 0 : index
    %c0_8 = arith.constant 0 : index
    %9 = vector.load %arg5[%c0_7, %c0_8] : memref<2x128xf32, #tpu.memory_space<vmem>>, vector<2x128xf32>
    tpu.vector_store %arg5[%c0_7, %c0_8], %8 {strides = array<i32>} : memref<2x128xf32, #tpu.memory_space<vmem>>, vector<2x128xf32>,
    return
  }
  func.func @transform_0(%arg0: i32) -> (i32, i32) {
    %c0_i32 = arith.constant 0 : i32
    %c0_i32_0 = arith.constant 0 : i32
    return %arg0, %c0_i32 : i32, i32
  }
  func.func @transform_1(%arg0: i32) -> (i32, i32) {
    %c0_i32 = arith.constant 0 : i32
    %c0_i32_0 = arith.constant 0 : i32
    %c0_i32_1 = arith.constant 0 : i32
    return %c0_i32, %c0_i32_0 : i32, i32
  }
  func.func @transform_2(%arg0: i32) -> (i32, i32) {
    %c0_i32 = arith.constant 0 : i32
    %c0_i32_0 = arith.constant 0 : i32
    %c0_i32_1 = arith.constant 0 : i32
    return %c0_i32, %c0_i32_0 : i32, i32
  }
  func.func @transform_3(%arg0: i32) -> (i32, i32) {
    %c0_i32 = arith.constant 0 : i32
    %c0_i32_0 = arith.constant 0 : i32
    %c0_i32_1 = arith.constant 0 : i32
    return %c0_i32, %c0_i32_0 : i32, i32
  }
  func.func @transform_4(%arg0: i32) -> (i32, i32) {
    %c0_i32 = arith.constant 0 : i32
    %c0_i32_0 = arith.constant 0 : i32
    return %arg0, %c0_i32 : i32, i32
  }
}

</mosaic_0001>

<bundles_post_ra>
// kernel: model_forward.7
= control target key start
LH: loop header
LB: loop body
LE: loop exit
PB: predicated region body
PF: predicated region fallthrough
CT: control target
= control target key end

     0   :  { %s1819_s15 = smov 0   ;;  %s1821_s16 = smov 0   ;;  %s2218_s0 = inlined_call_operand.vmem [shape: bf16[338,196], index: 0, kind: input, shape index: {}]   ;;  %s2219_s1 = inlined_call_operand.vmem [shape: bf16[196,128], index: 1, kind: input, shape index: {}]   ;;  %s2220_s2 = inlined_call_operand.vmem [shape: f32[1,128], index: 2, kind: input, shape index: {}]   ;;  %s2221_s3 = inlined_call_operand.vmem [shape: f32[1,128], index: 3, kind: input, shape index: {}]   ;;  %s2222_s4 = inlined_call_operand.vmem [shape: bf16[338,128], index: 4, kind: output, shape index: {}]  }
   0x1   :  { %s1823_s17 = smov 0  }
   0x2 LB: > { %s1832_s18 = sadd.s32 4294967295, %s1760_s17   ;;  %s1834_s19 = sadd.s32 1, %s1760_s17   ;;  %s1760_s17 = sphi %s1823_s17, %s2231_s17   ;;  %s1756_s16 = sphi %s1821_s16, %s2230_s16   ;;  %s1752_s15 = sphi %s1819_s15, %s2229_s15  }
   0x3   : > { %s107_s20 = ssub.s32 %s1760_s17, %s1834_s19  ;;  %s110_s21 = sadd.s32 1, %s1756_s16 }
   0x4   : > { %p108_p0 = scmp.eq.s32.totalorder %s107_s20, 0  ;;  %p120_p1 = scmp.ne.s32.totalorder %s1756_s16, %s1752_s15 }
   0x5   : > { %p121_p2 = scmp.eq.s32.totalorder %s1832_s18, 1  ;;  %p1246_p3 = scmp.ge.s32.totalorder %s1760_s17, 1 }
   0x6   : > { %s1842_s22 = scalar_select %p108_p0, %s1756_s16, %s110_s21  }
   0x7   : > { %p1844_p4 = por %p121_p2, %p120_p1  ;;  %p174_p5 = scmp.lt.s32.totalorder %s1760_s17, 3 }
   0x9   : > { %p175_p6 = pnand %p1246_p3, %p174_p5 }
   0xa   : > { %s1855_s28 = sshll.u32 (!%p175_p6), %s1832_s18, 5  ;;  %s202_s17 = sand.u32 (!%p175_p6), 1, %s1752_s15  }
   0xb   : > { %178 = sbr.rel (%p175_p6) target bundleno = 378 (0x17a), region = 36  ;;  %p211_p7 = scmp.lt.s32.totalorder (!%p175_p6), %s1855_s28, 42 }
   0xc   : > { %s1247_s20 = sshll.u32 (!%p175_p6), %s202_s17, 7 }
   0xd   : > { %s1996_s21 = scalar_lea.vmem (!%p175_p6), [#allocation2], %s1247_s20  }
  0x10   : > { %v1500_v0 = vld [vmem:[%s2219_s1 + $0x38] sm:$0xff]  ;;  %v284_v1 = vld [vmem:[%s2219_s1 + $0x60] sm:$0x3]  ;;  %vm553_vm0 = vcmask 1041408   ;;  %v1499_v3 = vld [vmem:[%s2219_s1 + $0x30] sm:$0xff]  ;;  %s212_s9 = scalar_select %p211_p7, %s1855_s28, 42 }
  0x11   : > { %v478_v2 = vunpack.c.l.b16 %v284_v1  ;;  %557 = vmatpush.bf16.msra.mxu0 %v1500_v0  ;;  %1603 = vmatpush.bf16.msra.mxu2 %v1500_v0  ;;  %v1504_v6 = vld [vmem:[%s2219_s1 + $0x58] sm:$0xff]  ;;  %v1498_v7 = vld [vmem:[%s2219_s1 + $0x28] sm:$0xff]  ;;  %v1503_v8 = vld [vmem:[%s2219_s1 + $0x50] sm:$0xff]  ;;  %vm504_vm1 = vcmask 556032   ;;  %s911_s15 = ssub.s32 (%p1844_p4), 43, %s1855_s28  ;;  %s1505_s24 = sshll.u32 (%p1844_p4), %s1832_s18, 7 }
  0x12   : > { %v1497_v9 = vld [vmem:[%s2219_s1 + $0x20] sm:$0xff]  ;;  %s1460_s14 = sshll.u32 %s212_s9, 3  ;;  %v1502_v10 = vld [vmem:[%s2219_s1 + $0x48] sm:$0xff]  ;;  %v1496_v11 = vld [vmem:[%s2219_s1 + $0x18] sm:$0xff]  ;;  %p912_p8 = scmp.lt.s32.totalorder (%p1844_p4), %s911_s15, 32 }
  0x13   : > { %v491_v4 = vpack.c.b16 %v478_v2, %v478_v2  ;;  %s1883_s27 = scalar_lea.vmem %s2218_s0, %s1460_s14  ;;  %v1501_v12 = vld [vmem:[%s2219_s1 + $0x40] sm:$0xff]  ;;  %v1495_v13 = vld [vmem:[%s2219_s1 + $0x10] sm:$0xff]  ;;  %v1494_v19 = vld [vmem:[%s2219_s1 + $0x8] sm:$0xff] }
  0x14   : > { %v1461_v14 = vld [vmem:[%s1883_s27 + $0x4] sm:$0xf]  ;;  %v1255_v15 = vld [vmem:[%s1883_s27 + $0x8] sm:$0xf0]  ;;  %v1479_v16 = vld [vmem:[%s1883_s27 + $0x94] sm:$0xf] }
  0x15   : > { %v555_v5 = vsel %vm553_vm0, %v491_v4, 0  ;;  %558 = vmatpush.bf16.msra.mxu0 %v1499_v3  ;;  %1604 = vmatpush.bf16.msra.mxu2 %v1499_v3  ;;  %v1327_v17 = vld [vmem:[%s1883_s27 + $0x98] sm:$0xf0]  ;;  %v1258_v18 = vor.u32 %v1461_v14, %v1255_v15  ;;  %v1493_v21 = vld [vmem:[%s2219_s1] sm:$0xff]  ;;  %v1462_v23 = vld [vmem:[%s1883_s27 + $0x4] sm:$0xf0] }
  0x16   : > { %649 = vmatpush.bf16.msra.mxu1 %v555_v5  ;;  %1611 = vmatpush.bf16.msra.mxu3 %v555_v5  ;;  %v1330_v20 = vor.u32 %v1479_v16, %v1327_v17  ;;  %v1253_v22 = vld [vmem:[%s1883_s27] sm:$0xf]  ;;  %v1478_v25 = vld [vmem:[%s1883_s27 + $0x84] sm:$0xf0]  ;;  %v1463_v28 = vld [vmem:[%s1883_s27 + $0x14] sm:$0xf] }
  0x17   : > { %v1317_v24 = vld [vmem:[%s1883_s27 + $0x80] sm:$0xf]  ;;  %v1254_v26 = vor.u32 %v1462_v23, %v1253_v22  ;;  %v1263_v29 = vld [vmem:[%s1883_s27 + $0x18] sm:$0xf0]  ;;  %v1481_v30 = vld [vmem:[%s1883_s27 + $0xa4] sm:$0xf] }
  0x18   : > { %v1318_v27 = vor.u32 %v1478_v25, %v1317_v24  ;;  %v1335_v31 = vld [vmem:[%s1883_s27 + $0xa8] sm:$0xf0]  ;;  %v1266_v32 = vor.u32 %v1463_v28, %v1263_v29  ;;  %v1261_v34 = vld [vmem:[%s1883_s27 + $0x10] sm:$0xf]  ;;  %v1464_v35 = vld [vmem:[%s1883_s27 + $0x14] sm:$0xf0] }
  0x19   : > { %559 = vmatpush.bf16.msra.mxu0 %v1498_v7  ;;  %1605 = vmatpush.bf16.msra.mxu2 %v1498_v7  ;;  %v1338_v33 = vor.u32 %v1481_v30, %v1335_v31  ;;  %v1325_v36 = vld [vmem:[%s1883_s27 + $0x90] sm:$0xf]  ;;  %v1480_v37 = vld [vmem:[%s1883_s27 + $0x94] sm:$0xf0]  ;;  %v1262_v38 = vor.u32 %v1464_v35, %v1261_v34  ;;  %v1465_v40 = vld [vmem:[%s1883_s27 + $0x24] sm:$0xf] }
  0x1a   : > { %650 = vmatpush.bf16.msra.mxu1 %v1504_v6  ;;  %1612 = vmatpush.bf16.msra.mxu3 %v1504_v6  ;;  %v1326_v39 = vor.u32 %v1480_v37, %v1325_v36  ;;  %v1271_v41 = vld [vmem:[%s1883_s27 + $0x28] sm:$0xf0]  ;;  %v1483_v42 = vld [vmem:[%s1883_s27 + $0xb4] sm:$0xf]  ;;  %v1343_v43 = vld [vmem:[%s1883_s27 + $0xb8] sm:$0xf0] }
  0x1b   : > { %v1274_v44 = vor.u32 %v1465_v40, %v1271_v41  ;;  %v1346_v45 = vor.u32 %v1483_v42, %v1343_v43  ;;  %v1269_v46 = vld [vmem:[%s1883_s27 + $0x20] sm:$0xf]  ;;  %v1466_v47 = vld [vmem:[%s1883_s27 + $0x24] sm:$0xf0]  ;;  %v1467_v52 = vld [vmem:[%s1883_s27 + $0x34] sm:$0xf] }
  0x1c   : > { %v1333_v48 = vld [vmem:[%s1883_s27 + $0xa0] sm:$0xf]  ;;  %v1482_v49 = vld [vmem:[%s1883_s27 + $0xa4] sm:$0xf0]  ;;  %v1270_v50 = vor.u32 %v1466_v47, %v1269_v46  ;;  %v1279_v53 = vld [vmem:[%s1883_s27 + $0x38] sm:$0xf0] }
  0x1d   : > { %560 = vmatpush.bf16.msra.mxu0 %v1497_v9  ;;  %1606 = vmatpush.bf16.msra.mxu2 %v1497_v9  ;;  %v1334_v51 = vor.u32 %v1482_v49, %v1333_v48  ;;  %v1485_v54 = vld [vmem:[%s1883_s27 + $0xc4] sm:$0xf]  ;;  %v1351_v55 = vld [vmem:[%s1883_s27 + $0xc8] sm:$0xf0]  ;;  %v1282_v56 = vor.u32 %v1467_v52, %v1279_v53  ;;  %v1277_v58 = vld [vmem:[%s1883_s27 + $0x30] sm:$0xf] }
  0x1e   : > { %651 = vmatpush.bf16.msra.mxu1 %v1503_v8  ;;  %1613 = vmatpush.bf16.msra.mxu3 %v1503_v8  ;;  %v1354_v57 = vor.u32 %v1485_v54, %v1351_v55  ;;  %v1468_v59 = vld [vmem:[%s1883_s27 + $0x34] sm:$0xf0]  ;;  %v1341_v60 = vld [vmem:[%s1883_s27 + $0xb0] sm:$0xf]  ;;  %v1469_v0 = vld [vmem:[%s1883_s27 + $0x44] sm:$0xf] }
  0x1f   : > { %v1484_v61 = vld [vmem:[%s1883_s27 + $0xb4] sm:$0xf0]  ;;  %v1278_v62 = vor.u32 %v1468_v59, %v1277_v58  ;;  %v1287_v1 = vld [vmem:[%s1883_s27 + $0x48] sm:$0xf0]  ;;  %v1487_v2 = vld [vmem:[%s1883_s27 + $0xd4] sm:$0xf] }
  0x20   : > { %v1342_v63 = vor.u32 %v1484_v61, %v1341_v60  ;;  %v1359_v3 = vld [vmem:[%s1883_s27 + $0xd8] sm:$0xf0]  ;;  %v1290_v4 = vor.u32 %v1469_v0, %v1287_v1  ;;  %v1285_v6 = vld [vmem:[%s1883_s27 + $0x40] sm:$0xf]  ;;  %v1470_v7 = vld [vmem:[%s1883_s27 + $0x44] sm:$0xf0] }
  0x21   : > { %561 = vmatpush.bf16.msra.mxu0 %v1496_v11  ;;  %1607 = vmatpush.bf16.msra.mxu2 %v1496_v11  ;;  %v1362_v5 = vor.u32 %v1487_v2, %v1359_v3  ;;  %v1349_v8 = vld [vmem:[%s1883_s27 + $0xc0] sm:$0xf]  ;;  %v1486_v9 = vld [vmem:[%s1883_s27 + $0xc4] sm:$0xf0]  ;;  %v1489_v14 = vld [vmem:[%s1883_s27 + $0xe4] sm:$0xf] }
  0x22   : > { %652 = vmatpush.bf16.msra.mxu1 %v1502_v10  ;;  %1614 = vmatpush.bf16.msra.mxu3 %v1502_v10  ;;  %v1286_v10 = vor.u32 %v1470_v7, %v1285_v6  ;;  %v1350_v11 = vor.u32 %v1486_v9, %v1349_v8  ;;  %v1367_v15 = vld [vmem:[%s1883_s27 + $0xe8] sm:$0xf0]  ;;  %v1473_v24 = vld [vmem:[%s1883_s27 + $0x64] sm:$0xf]  ;;  %v1301_v30 = vld [vmem:[%s1883_s27 + $0x60] sm:$0xf] }
  0x23   : > { %v1370_v17 = vor.u32 %v1489_v14, %v1367_v15  ;;  %v1303_v25 = vld [vmem:[%s1883_s27 + $0x68] sm:$0xf0]  ;;  %v1474_v31 = vld [vmem:[%s1883_s27 + $0x64] sm:$0xf0]  ;;  %v1475_v36 = vld [vmem:[%s1883_s27 + $0x74] sm:$0xf] }
  0x24   : > { %v1306_v28 = vor.u32 %v1473_v24, %v1303_v25  ;;  %v1302_v34 = vor.u32 %v1474_v31, %v1301_v30  ;;  %v1311_v37 = vld [vmem:[%s1883_s27 + $0x78] sm:$0xf0]  ;;  %v1476_v40 = vld [vmem:[%s1883_s27 + $0x74] sm:$0xf0]  ;;  %v1373_v41 = vld [vmem:[%s1883_s27 + $0xf0] sm:$0xf] }
  0x25   : > { %562 = vmatpush.bf16.msra.mxu0 %v1495_v13  ;;  %1608 = vmatpush.bf16.msra.mxu2 %v1495_v13  ;;  %v1295_v13 = vld [vmem:[%s1883_s27 + $0x58] sm:$0xf0]  ;;  %v1492_v42 = vld [vmem:[%s1883_s27 + $0xf4] sm:$0xf0]  ;;  %v1319_v46 = vld [vmem:[%s1883_s27 + $0x88] sm:$0xf0] }
  0x26   : > { %653 = vmatpush.bf16.msra.mxu1 %v1501_v12  ;;  %1615 = vmatpush.bf16.msra.mxu3 %v1501_v12  ;;  %v1471_v12 = vld [vmem:[%s1883_s27 + $0x54] sm:$0xf]  ;;  %v1980_v53 = vld [vmem:[%s2220_s2] ss:$0 sm:$0xff] }
  0x27   : > { %v1298_v16 = vor.u32 %v1471_v12, %v1295_v13  ;;  %v1986_v55 = vld [vmem:[%s2221_s3] ss:$0 sm:$0xff] }
  0x29   : > { %1427 = vmatmul.msk.bf16.vlgmr.msra.gmra.mxu1 %vm504_vm1, %v1258_v18  ;;  %563 = vmatpush.bf16.msra.mxu0 %v1494_v19  ;;  %v1293_v18 = vld [vmem:[%s1883_s27 + $0x50] sm:$0xf] }
  0x2a   : > { %1436 = vmatmul.msk.bf16.vlgmr.msra.gmra.mxu3 %vm504_vm1, %v1330_v20  ;;  %1609 = vmatpush.bf16.msra.mxu2 %v1494_v19  ;;  %v1472_v19 = vld [vmem:[%s1883_s27 + $0x54] sm:$0xf0]  ;;  %v1357_v20 = vld [vmem:[%s1883_s27 + $0xd0] sm:$0xf] }
  0x2b   : > { %v1294_v22 = vor.u32 %v1472_v19, %v1293_v18 }
  0x2d   : > { %564 = vmatpush.bf16.msra.mxu0 %v1493_v21 }
  0x2e   : > { %1610 = vmatpush.bf16.msra.mxu2 %v1493_v21  ;;  %v1488_v21 = vld [vmem:[%s1883_s27 + $0xd4] sm:$0xf0] }
  0x2f   : > { %v1358_v23 = vor.u32 %v1488_v21, %v1357_v20 }
  0x30   : > { %565 = vmatmul.bf16.vlgmr.msra.gmra.mxu0 %v1254_v26  ;;  %v1491_v26 = vld [vmem:[%s1883_s27 + $0xf4] sm:$0xf] }
  0x31   : > { %605 = vmatmul.bf16.vlgmr.msra.gmra.mxu2 %v1318_v27  ;;  %v1375_v27 = vld [vmem:[%s1883_s27 + $0xf8] sm:$0xf0] }
  0x32   : > { %v1378_v29 = vor.u32 %v1491_v26, %v1375_v27 }
  0x39   : > { %1428 = vmatmul.msk.bf16.gmra.mxu1 %vm504_vm1, %v1266_v32  ;;  %v1365_v32 = vld [vmem:[%s1883_s27 + $0xe0] sm:$0xf] }
  0x3a   : > { %1437 = vmatmul.msk.bf16.gmra.mxu3 %vm504_vm1, %v1338_v33  ;;  %v1490_v33 = vld [vmem:[%s1883_s27 + $0xe4] sm:$0xf0] }
  0x3b   : > { %v1366_v35 = vor.u32 %v1490_v33, %v1365_v32 }
  0x40   : > { %570 = vmatmul.bf16.gmra.mxu0 %v1262_v38  ;;  %v1314_v38 = vor.u32 %v1475_v36, %v1311_v37 }
  0x41   : > { %610 = vmatmul.bf16.gmra.mxu2 %v1326_v39  ;;  %v1309_v39 = vld [vmem:[%s1883_s27 + $0x70] sm:$0xf] }
  0x42   : > { %v1310_v43 = vor.u32 %v1476_v40, %v1309_v39 }
  0x49   : > { %1429 = vmatmul.msk.bf16.gmra.mxu1 %vm504_vm1, %v1274_v44  ;;  %v1374_v44 = vor.u32 %v1492_v42, %v1373_v41 }
  0x4a   : > { %1438 = vmatmul.msk.bf16.gmra.mxu3 %vm504_vm1, %v1346_v45  ;;  %v1477_v45 = vld [vmem:[%s1883_s27 + $0x84] sm:$0xf]  ;;  %s2083_s27 = scalar_lea.vmem (%p1844_p4), %s2222_s4, %s1505_s24  }
  0x4b   : > { %v1322_v47 = vor.u32 %v1477_v45, %v1319_v46 }
  0x50   : > { %575 = vmatmul.bf16.gmra.mxu0 %v1270_v50 }
  0x51   : > { %615 = vmatmul.bf16.gmra.mxu2 %v1334_v51 }
  0x59   : > { %1430 = vmatmul.msk.bf16.gmra.mxu1 %vm504_vm1, %v1282_v56 }
  0x5a   : > { %1439 = vmatmul.msk.bf16.gmra.mxu3 %vm504_vm1, %v1354_v57 }
  0x60   : > { %580 = vmatmul.bf16.gmra.mxu0 %v1278_v62 }
  0x61   : > { %620 = vmatmul.bf16.gmra.mxu2 %v1342_v63 }
  0x69   : > { %1431 = vmatmul.msk.bf16.gmra.mxu1 %vm504_vm1, %v1290_v4 }
  0x6a   : > { %1440 = vmatmul.msk.bf16.gmra.mxu3 %vm504_vm1, %v1362_v5 }
  0x70   : > { %585 = vmatmul.bf16.gmra.mxu0 %v1286_v10 }
  0x71   : > { %625 = vmatmul.bf16.gmra.mxu2 %v1350_v11 }
  0x79   : > { %1432 = vmatmul.msk.bf16.gmra.mxu1 %vm504_vm1, %v1298_v16 }
  0x7a   : > { %1441 = vmatmul.msk.bf16.gmra.mxu3 %vm504_vm1, %v1370_v17 }
  0x80   : > { %590 = vmatmul.bf16.gmra.mxu0 %v1294_v22 }
  0x81   : > { %630 = vmatmul.bf16.gmra.mxu2 %v1358_v23 }
  0x89   : > { %1433 = vmatmul.msk.bf16.gmra.mxu1 %vm504_vm1, %v1306_v28 }
  0x8a   : > { %1442 = vmatmul.msk.bf16.gmra.mxu3 %vm504_vm1, %v1378_v29 }
  0x90   : > { %595 = vmatmul.bf16.gmra.mxu0 %v1302_v34 }
  0x91   : > { %635 = vmatmul.bf16.gmra.mxu2 %v1366_v35 }
  0x99   : > { %1434 = vmatmul.msk.bf16.gmra.mxu1 %vm504_vm1, %v1314_v38 }
  0xa0   : > { %600 = vmatmul.bf16.gmra.mxu0 %v1310_v43 }
  0xa1   : > { %640 = vmatmul.bf16.gmra.mxu2 %v1374_v44 }
  0xa6   : > { %v655_v48 = vpop.f32.mrf.mxu1 }
  0xa9   : > { %1435 = vmatmul.msk.bf16.gmra.mxu1 %vm504_vm1, %v1322_v47 }
  0xad   : > { %v700_v49 = vpop.f32.mrf.mxu3  ;;  %v566_v51 = vpop.f32.mrf.mxu0 }
  0xae   : > { %v657_v50 = vpop.f32.mrf.mxu1  ;;  %v656_v52 = vadd.f32 %v655_v48, %v566_v51 }
  0xb0   : > { %v739_v54 = vmul.f32 %v1980_v53, %v656_v52 }
  0xb2   : > { %v775_v61 = vadd.f32 %v1986_v55, %v739_v54 }
  0xb4   : > { %v1988_v56 = vpop.f32.mrf.mxu2  ;;  %v807_v0 = vmax.f32 %v775_v61, 0.0 }
  0xb5   : > { %v702_v57 = vpop.f32.mrf.mxu3  ;;  %v568_v59 = vpop.f32.mrf.mxu0 }
  0xb6   : > { %v660_v58 = vpop.f32.mrf.mxu1  ;;  %v658_v60 = vadd.f32 %v657_v50, %v568_v59 }
  0xb8   : > { %v740_v62 = vmul.f32 %v1980_v53, %v658_v60 }
  0xba   : > { %v776_v63 = vadd.f32 %v1986_v55, %v740_v62 }
  0xbc   : > { %v808_v1 = vmax.f32 %v776_v63, 0.0  ;;  %v1994_v2 = vpop.f32.mrf.mxu2 }
  0xbd   : > { %v571_v4 = vpop.f32.mrf.mxu0  ;;  %v705_v6 = vpop.f32.mrf.mxu3 }
  0xbe   : > { %v662_v3 = vpop.f32.mrf.mxu1  ;;  %v1511_v5 = vpack.c.bf16 %v808_v1, %v807_v0  ;;  %v661_v7 = vadd.f32 %v660_v58, %v571_v4 }
  0xc0   : > { %1512 = vst [vmem:[%s1996_s21] sm:$0xff] %v1511_v5   ;;  %v741_v8 = vmul.f32 %v1980_v53, %v661_v7 }
  0xc2   : > { %v777_v14 = vadd.f32 %v1986_v55, %v741_v8 }
  0xc4   : > { %v611_v9 = vpop.f32.mrf.mxu2  ;;  %v809_v19 = vmax.f32 %v777_v14, 0.0 }
  0xc5   : > { %v573_v11 = vpop.f32.mrf.mxu0  ;;  %v701_v13 = vadd.f32 %v700_v49, %v611_v9  ;;  %v707_v16 = vpop.f32.mrf.mxu3 }
  0xc6   : > { %v665_v10 = vpop.f32.mrf.mxu1  ;;  %v663_v12 = vadd.f32 %v662_v3, %v573_v11 }
  0xc7   : > { %v757_v18 = vmul.f32 %v1980_v53, %v701_v13 }
  0xc8   : > { %v742_v15 = vmul.f32 %v1980_v53, %v663_v12 }
  0xc9   : > { %v793_v26 = vadd.f32 %v1986_v55, %v757_v18 }
  0xca   : > { %v778_v17 = vadd.f32 %v1986_v55, %v742_v15 }
  0xcb   : > { %v825_v31 = vmax.f32 %v793_v26, 0.0 }
  0xcc   : > { %v810_v20 = vmax.f32 %v778_v17, 0.0  ;;  %v613_v21 = vpop.f32.mrf.mxu2 }
  0xcd   : > { %v703_v22 = vadd.f32 %v702_v57, %v613_v21  ;;  %v576_v24 = vpop.f32.mrf.mxu0  ;;  %v710_v30 = vpop.f32.mrf.mxu3 }
  0xce   : > { %v667_v23 = vpop.f32.mrf.mxu1  ;;  %v1516_v25 = vpack.c.bf16 %v810_v20, %v809_v19  ;;  %v666_v28 = vadd.f32 %v665_v10, %v576_v24 }
  0xcf   : > { %v758_v27 = vmul.f32 %v1980_v53, %v703_v22 }
  0xd0   : > { %1588 = vst [vmem:[%s1996_s21 + $0x8] sm:$0xff] %v1516_v25   ;;  %v743_v33 = vmul.f32 %v1980_v53, %v666_v28 }
  0xd1   : > { %v794_v29 = vadd.f32 %v1986_v55, %v758_v27 }
  0xd2   : > { %v779_v40 = vadd.f32 %v1986_v55, %v743_v33 }
  0xd3   : > { %v826_v32 = vmax.f32 %v794_v29, 0.0 }
  0xd4   : > { %v616_v34 = vpop.f32.mrf.mxu2  ;;  %v811_v44 = vmax.f32 %v779_v40, 0.0 }
  0xd5   : > { %v1556_v35 = vpack.c.bf16 %v826_v32, %v825_v31  ;;  %v578_v37 = vpop.f32.mrf.mxu0  ;;  %v706_v39 = vadd.f32 %v705_v6, %v616_v34  ;;  %v712_v47 = vpop.f32.mrf.mxu3 }
  0xd6   : > { %v670_v36 = vpop.f32.mrf.mxu1  ;;  %v668_v38 = vadd.f32 %v667_v23, %v578_v37 }
  0xd7   : > { %1596 = vst [vmem:[%s1996_s21 + $0x48] sm:$0xff] %v1556_v35   ;;  %v759_v43 = vmul.f32 %v1980_v53, %v706_v39 }
  0xd8   : > { %v744_v41 = vmul.f32 %v1980_v53, %v668_v38 }
  0xd9   : > { %v795_v52 = vadd.f32 %v1986_v55, %v759_v43 }
  0xda   : > { %v780_v42 = vadd.f32 %v1986_v55, %v744_v41 }
  0xdb   : > { %v827_v59 = vmax.f32 %v795_v52, 0.0 }
  0xdc   : > { %v812_v45 = vmax.f32 %v780_v42, 0.0  ;;  %v618_v46 = vpop.f32.mrf.mxu2 }
  0xdd   : > { %v708_v48 = vadd.f32 %v707_v16, %v618_v46  ;;  %v581_v50 = vpop.f32.mrf.mxu0  ;;  %v715_v4 = vpop.f32.mrf.mxu3 }
  0xde   : > { %v672_v49 = vpop.f32.mrf.mxu1  ;;  %v1521_v51 = vpack.c.bf16 %v812_v45, %v811_v44  ;;  %v671_v57 = vadd.f32 %v670_v36, %v581_v50 }
  0xdf   : > { %v760_v54 = vmul.f32 %v1980_v53, %v708_v48 }
  0xe0   : > { %1589 = vst [vmem:[%s1996_s21 + $0x10] sm:$0xff] %v1521_v51   ;;  %v745_v61 = vmul.f32 %v1980_v53, %v671_v57 }
  0xe1   : > { %v796_v58 = vadd.f32 %v1986_v55, %v760_v54 }
  0xe2   : > { %v781_v6 = vadd.f32 %v1986_v55, %v745_v61 }
  0xe3   : > { %v828_v60 = vmax.f32 %v796_v58, 0.0 }
  0xe4   : > { %v621_v62 = vpop.f32.mrf.mxu2  ;;  %v813_v10 = vmax.f32 %v781_v6, 0.0 }
  0xe5   : > { %v1561_v63 = vpack.c.bf16 %v828_v60, %v827_v59  ;;  %v583_v1 = vpop.f32.mrf.mxu0  ;;  %v711_v5 = vadd.f32 %v710_v30, %v621_v62  ;;  %v717_v20 = vpop.f32.mrf.mxu3 }
  0xe6   : > { %v675_v0 = vpop.f32.mrf.mxu1  ;;  %v673_v3 = vadd.f32 %v672_v49, %v583_v1 }
  0xe7   : > { %1597 = vst [vmem:[%s1996_s21 + $0x50] sm:$0xff] %v1561_v63   ;;  %v761_v9 = vmul.f32 %v1980_v53, %v711_v5 }
  0xe8   : > { %v746_v7 = vmul.f32 %v1980_v53, %v673_v3 }
  0xe9   : > { %v797_v17 = vadd.f32 %v1986_v55, %v761_v9 }
  0xea   : > { %v782_v8 = vadd.f32 %v1986_v55, %v746_v7 }
  0xeb   : > { %v829_v22 = vmax.f32 %v797_v17, 0.0 }
  0xec   : > { %v814_v11 = vmax.f32 %v782_v8, 0.0  ;;  %v623_v12 = vpop.f32.mrf.mxu2 }
  0xed   : > { %v713_v13 = vadd.f32 %v712_v47, %v623_v12  ;;  %v586_v15 = vpop.f32.mrf.mxu0  ;;  %v720_v34 = vpop.f32.mrf.mxu3 }
  0xee   : > { %v677_v14 = vpop.f32.mrf.mxu1  ;;  %v1526_v16 = vpack.c.bf16 %v814_v11, %v813_v10  ;;  %v676_v19 = vadd.f32 %v675_v0, %v586_v15 }
  0xef   : > { %v762_v18 = vmul.f32 %v1980_v53, %v713_v13 }
  0xf0   : > { %1590 = vst [vmem:[%s1996_s21 + $0x18] sm:$0xff] %v1526_v16   ;;  %v747_v24 = vmul.f32 %v1980_v53, %v676_v19 }
  0xf1   : > { %v798_v21 = vadd.f32 %v1986_v55, %v762_v18 }
  0xf2   : > { %v783_v31 = vadd.f32 %v1986_v55, %v747_v24 }
  0xf3   : > { %v830_v23 = vmax.f32 %v798_v21, 0.0 }
  0xf4   : > { %v626_v25 = vpop.f32.mrf.mxu2  ;;  %v815_v36 = vmax.f32 %v783_v31, 0.0 }
  0xf5   : > { %v1566_v26 = vpack.c.bf16 %v830_v23, %v829_v22  ;;  %v588_v28 = vpop.f32.mrf.mxu0  ;;  %v716_v30 = vadd.f32 %v715_v4, %v626_v25  ;;  %v722_v51 = vpop.f32.mrf.mxu3 }
  0xf6   : > { %v680_v27 = vpop.f32.mrf.mxu1  ;;  %v678_v29 = vadd.f32 %v677_v14, %v588_v28 }
  0xf7   : > { %1598 = vst [vmem:[%s1996_s21 + $0x58] sm:$0xff] %v1566_v26   ;;  %v763_v35 = vmul.f32 %v1980_v53, %v716_v30 }
  0xf8   : > { %v748_v32 = vmul.f32 %v1980_v53, %v678_v29 }
  0xf9   : > { %v799_v43 = vadd.f32 %v1986_v55, %v763_v35 }
  0xfa   : > { %v784_v33 = vadd.f32 %v1986_v55, %v748_v32 }
  0xfb   : > { %v831_v47 = vmax.f32 %v799_v43, 0.0 }
  0xfc   : > { %v816_v37 = vmax.f32 %v784_v33, 0.0  ;;  %v628_v38 = vpop.f32.mrf.mxu2 }
  0xfd   : > { %v718_v39 = vadd.f32 %v717_v20, %v628_v38  ;;  %v591_v41 = vpop.f32.mrf.mxu0  ;;  %v725_v8 = vpop.f32.mrf.mxu3 }
  0xfe   : > { %v682_v40 = vpop.f32.mrf.mxu1  ;;  %v1531_v42 = vpack.c.bf16 %v816_v37, %v815_v36  ;;  %v681_v45 = vadd.f32 %v680_v27, %v591_v41 }
  0xff   : > { %v764_v44 = vmul.f32 %v1980_v53, %v718_v39 }
 0x100   : > { %1591 = vst [vmem:[%s1996_s21 + $0x20] sm:$0xff] %v1531_v42   ;;  %v749_v49 = vmul.f32 %v1980_v53, %v681_v45 }
 0x101   : > { %v800_v46 = vadd.f32 %v1986_v55, %v764_v44 }
 0x102   : > { %v785_v60 = vadd.f32 %v1986_v55, %v749_v49 }
 0x103   : > { %v832_v48 = vmax.f32 %v800_v46, 0.0 }
 0x104   : > { %v631_v50 = vpop.f32.mrf.mxu2  ;;  %v817_v0 = vmax.f32 %v785_v60, 0.0 }
 0x105   : > { %v1571_v52 = vpack.c.bf16 %v832_v48, %v831_v47  ;;  %v593_v57 = vpop.f32.mrf.mxu0  ;;  %v721_v59 = vadd.f32 %v720_v34, %v631_v50  ;;  %v727_v23 = vpop.f32.mrf.mxu3 }
 0x106   : > { %v685_v54 = vpop.f32.mrf.mxu1  ;;  %v683_v58 = vadd.f32 %v682_v40, %v593_v57 }
 0x107   : > { %1599 = vst [vmem:[%s1996_s21 + $0x60] sm:$0xff] %v1571_v52   ;;  %v765_v63 = vmul.f32 %v1980_v53, %v721_v59 }
 0x108   : > { %v750_v61 = vmul.f32 %v1980_v53, %v683_v58 }
 0x109   : > { %v801_v9 = vadd.f32 %v1986_v55, %v765_v63 }
 0x10a   : > { %v786_v62 = vadd.f32 %v1986_v55, %v750_v61 }
 0x10b   : > { %v833_v13 = vmax.f32 %v801_v9, 0.0 }
 0x10c   : > { %v818_v1 = vmax.f32 %v786_v62, 0.0  ;;  %v633_v3 = vpop.f32.mrf.mxu2 }
 0x10d   : > { %v723_v4 = vadd.f32 %v722_v51, %v633_v3  ;;  %v596_v6 = vpop.f32.mrf.mxu0  ;;  %v730_v38 = vpop.f32.mrf.mxu3 }
 0x10e   : > { %v687_v5 = vpop.f32.mrf.mxu1  ;;  %v1536_v7 = vpack.c.bf16 %v818_v1, %v817_v0  ;;  %v686_v11 = vadd.f32 %v685_v54, %v596_v6 }
 0x10f   : > { %v766_v10 = vmul.f32 %v1980_v53, %v723_v4 }
 0x110   : > { %1592 = vst [vmem:[%s1996_s21 + $0x28] sm:$0xff] %v1536_v7   ;;  %v751_v15 = vmul.f32 %v1980_v53, %v686_v11 }
 0x111   : > { %v802_v12 = vadd.f32 %v1986_v55, %v766_v10 }
 0x112   : > { %v787_v22 = vadd.f32 %v1986_v55, %v751_v15 }
 0x113   : > { %v834_v14 = vmax.f32 %v802_v12, 0.0 }
 0x114   : > { %v636_v16 = vpop.f32.mrf.mxu2  ;;  %v819_v27 = vmax.f32 %v787_v22, 0.0 }
 0x115   : > { %v1576_v17 = vpack.c.bf16 %v834_v14, %v833_v13  ;;  %v598_v19 = vpop.f32.mrf.mxu0  ;;  %v726_v21 = vadd.f32 %v725_v8, %v636_v16  ;;  %v732_v58 = vpop.f32.mrf.mxu3 }
 0x116   : > { %v690_v18 = vpop.f32.mrf.mxu1  ;;  %v688_v20 = vadd.f32 %v687_v5, %v598_v19 }
 0x117   : > { %1600 = vst [vmem:[%s1996_s21 + $0x68] sm:$0xff] %v1576_v17   ;;  %v767_v26 = vmul.f32 %v1980_v53, %v726_v21 }
 0x118   : > { %v752_v24 = vmul.f32 %v1980_v53, %v688_v20 }
 0x119   : > { %v803_v34 = vadd.f32 %v1986_v55, %v767_v26 }
 0x11a   : > { %v788_v25 = vadd.f32 %v1986_v55, %v752_v24 }
 0x11b   : > { %v835_v39 = vmax.f32 %v803_v34, 0.0 }
 0x11c   : > { %v820_v28 = vmax.f32 %v788_v25, 0.0  ;;  %v638_v29 = vpop.f32.mrf.mxu2 }
 0x11d   : > { %v728_v30 = vadd.f32 %v727_v23, %v638_v29  ;;  %v601_v32 = vpop.f32.mrf.mxu0 }
 0x11e   : > { %v692_v31 = vpop.f32.mrf.mxu1  ;;  %v1541_v33 = vpack.c.bf16 %v820_v28, %v819_v27  ;;  %v691_v36 = vadd.f32 %v690_v18, %v601_v32 }
 0x11f   : > { %v768_v35 = vmul.f32 %v1980_v53, %v728_v30 }
 0x120   : > { %1593 = vst [vmem:[%s1996_s21 + $0x30] sm:$0xff] %v1541_v33   ;;  %v753_v41 = vmul.f32 %v1980_v53, %v691_v36 }
 0x121   : > { %v804_v37 = vadd.f32 %v1986_v55, %v768_v35 }
 0x122   : > { %v789_v48 = vadd.f32 %v1986_v55, %v753_v41 }
 0x123   : > { %v836_v40 = vmax.f32 %v804_v37, 0.0 }
 0x124   : > { %v641_v42 = vpop.f32.mrf.mxu2  ;;  %v821_v54 = vmax.f32 %v789_v48, 0.0 }
 0x125   : > { %v1581_v43 = vpack.c.bf16 %v836_v40, %v835_v39  ;;  %v603_v45 = vpop.f32.mrf.mxu0  ;;  %v731_v47 = vadd.f32 %v730_v38, %v641_v42 }
 0x126   : > { %v695_v44 = vpop.f32.mrf.mxu1  ;;  %v693_v46 = vadd.f32 %v692_v31, %v603_v45 }
 0x127   : > { %1601 = vst [vmem:[%s1996_s21 + $0x70] sm:$0xff] %v1581_v43   ;;  %v696_v49 = vadd.f32 %v695_v44, %v1988_v56  ;;  %v769_v52 = vmul.f32 %v1980_v53, %v731_v47 }
 0x128   : > { %v754_v50 = vmul.f32 %v1980_v53, %v693_v46 }
 0x129   : > { %v755_v57 = vmul.f32 %v1980_v53, %v696_v49  ;;  %v805_v0 = vadd.f32 %v1986_v55, %v769_v52 }
 0x12a   : > { %v790_v51 = vadd.f32 %v1986_v55, %v754_v50 }
 0x12b   : > { %v791_v3 = vadd.f32 %v1986_v55, %v755_v57  ;;  %v837_v7 = vmax.f32 %v805_v0, 0.0 }
 0x12c   : > { %v822_v59 = vmax.f32 %v790_v51, 0.0  ;;  %v643_v60 = vpop.f32.mrf.mxu2 }
 0x12d   : > { %v733_v61 = vadd.f32 %v732_v58, %v643_v60  ;;  %v823_v9 = vmax.f32 %v791_v3, 0.0 }
 0x12e   : > { %v697_v62 = vpop.f32.mrf.mxu1  ;;  %v1546_v63 = vpack.c.bf16 %v822_v59, %v821_v54 }
 0x12f   : > { %v698_v56 = vadd.f32 %v697_v62, %v1994_v2  ;;  %v770_v1 = vmul.f32 %v1980_v53, %v733_v61 }
 0x130   : > { %1594 = vst [vmem:[%s1996_s21 + $0x38] sm:$0xff] %v1546_v63  }
 0x131   : > { %v756_v4 = vmul.f32 %v1980_v53, %v698_v56  ;;  %v806_v5 = vadd.f32 %v1986_v55, %v770_v1 }
 0x133   : > { %v792_v6 = vadd.f32 %v1986_v55, %v756_v4  ;;  %v838_v8 = vmax.f32 %v806_v5, 0.0 }
 0x135   : > { %v824_v10 = vmax.f32 %v792_v6, 0.0  ;;  %v1586_v11 = vpack.c.bf16 %v838_v8, %v837_v7  ;;  %909 = sbr.rel (!%p1844_p4) target bundleno = 378 (0x17a), region = 40 }
 0x137   : > { %v1551_v12 = vpack.c.bf16 %v824_v10, %v823_v9  ;;  %1602 = vst [vmem:[%s1996_s21 + $0x78] sm:$0xff] %v1586_v11  }
 0x139   : > { %1595 = vst [vmem:[%s1996_s21 + $0x40] sm:$0xff] %v1551_v12  }
 0x13a   : > { %s2233_s15 = smov (!%p912_p8, %s911_s15), 32 }
 0x13b   : > { %s1445_s29 = sshll.u32 %s2233_s15, 2 }
 0x13c   : > { %p1448_p9 = scmp.eq.s32.totalorder %s1445_s29, 0 }
 0x13d   : > { %s2089_s30 = sshrl.u32 (!%p1448_p9), %s2233_s15, 5 }
 0x13e   : > { %920 = sbr.rel (%p1448_p9) target bundleno = 378 (0x17a), region = 44  ;;  %p1449_p10 = scmp.le.s32.totalorder (!%p1448_p9), %s2089_s30, 0 }
 0x143   : > { %1199 = sbr.rel (%p1449_p10) target bundleno = 361 (0x169), region = 116  ;;  %s2224_s18 = smov (!%p1449_p10), %s2083_s27 }
 0x144   : > { %s2225_s23 = smov (!%p1449_p10), %s1996_s21  ;;  %s2098_s28 = smov (!%p1449_p10), 0  }
 0x145   : > { %s2100_s5 = smov (!%p1449_p10), 0  }
 0x148 LB: >> { %v937_v53 = vld [vmem:[%s1768_s23] sm:$0xf]  ;;  %v939_v55 = vld [vmem:[%s1768_s23 + $0x4] sm:$0xf]  ;;  %v941_v2 = vld [vmem:[%s1768_s23 + $0x8] sm:$0xf]  ;;  %s1776_s5 = sphi %s2100_s5, %s931_s5   ;;  %s1772_s28 = sphi %s2098_s28, %s2228_s28   ;;  %s1768_s23 = sphi %s2225_s23, %s2227_s23   ;;  %s1764_s18 = sphi %s2224_s18, %s2226_s18  }
 0x149   : >> { %938 = vst [vmem:[%s1764_s18] sm:$0xf] %v937_v53  ;;  %v943_v13 = vld [vmem:[%s1768_s23 + $0xc] sm:$0xf]  ;;  %v945_v14 = vld [vmem:[%s1768_s23 + $0x10] sm:$0xf]  ;;  %s1001_s6 = sadd.s32 1, %s1772_s28 }
 0x14a   : >> { %940 = vst [vmem:[%s1764_s18 + $0x4] sm:$0xf] %v939_v55  ;;  %v947_v15 = vld [vmem:[%s1768_s23 + $0x14] sm:$0xf]  ;;  %v949_v16 = vld [vmem:[%s1768_s23 + $0x18] sm:$0xf]  ;;  %p1002_p11 = scmp.ge.s32.totalorder %s1001_s6, %s2089_s30 }
 0x14b   : >> { %942 = vst [vmem:[%s1764_s18 + $0x8] sm:$0xf] %v941_v2  ;;  %v951_v17 = vld [vmem:[%s1768_s23 + $0x1c] sm:$0xf]  ;;  %v953_v18 = vld [vmem:[%s1768_s23 + $0x20] sm:$0xf] }
 0x14c   : >> { %944 = vst [vmem:[%s1764_s18 + $0xc] sm:$0xf] %v943_v13  ;;  %v955_v19 = vld [vmem:[%s1768_s23 + $0x24] sm:$0xf]  ;;  %v957_v20 = vld [vmem:[%s1768_s23 + $0x28] sm:$0xf] }
 0x14d   : >> { %946 = vst [vmem:[%s1764_s18 + $0x10] sm:$0xf] %v945_v14  ;;  %v959_v21 = vld [vmem:[%s1768_s23 + $0x2c] sm:$0xf]  ;;  %v961_v22 = vld [vmem:[%s1768_s23 + $0x30] sm:$0xf] }
 0x14e   : >> { %948 = vst [vmem:[%s1764_s18 + $0x14] sm:$0xf] %v947_v15  ;;  %v963_v23 = vld [vmem:[%s1768_s23 + $0x34] sm:$0xf]  ;;  %v965_v24 = vld [vmem:[%s1768_s23 + $0x38] sm:$0xf] }
 0x14f   : >> { %950 = vst [vmem:[%s1764_s18 + $0x18] sm:$0xf] %v949_v16  ;;  %v967_v25 = vld [vmem:[%s1768_s23 + $0x3c] sm:$0xf]  ;;  %v969_v26 = vld [vmem:[%s1768_s23 + $0x40] sm:$0xf] }
 0x150   : >> { %952 = vst [vmem:[%s1764_s18 + $0x1c] sm:$0xf] %v951_v17  ;;  %v971_v27 = vld [vmem:[%s1768_s23 + $0x44] sm:$0xf]  ;;  %s2235_s6 = smov (%p1002_p11, %s1001_s6), 0  ;;  %s931_s5 = sadd.s32 1, %s1776_s5  }
 0x151   : >> { %954 = vst [vmem:[%s1764_s18 + $0x20] sm:$0xf] %v953_v18  ;;  %v973_v28 = vld [vmem:[%s1768_s23 + $0x48] sm:$0xf]  ;;  %v975_v29 = vld [vmem:[%s1768_s23 + $0x4c] sm:$0xf]  ;;  %p930_p12 = scmp.ge.s32.totalorder %s931_s5, %s2089_s30  ;;  %s2228_s28 = smov %s2235_s6 }
 0x152   : >> { %956 = vst [vmem:[%s1764_s18 + $0x24] sm:$0xf] %v955_v19  ;;  %s1450_s7 = sshll.u32 %s2235_s6, 7  ;;  %v977_v30 = vld [vmem:[%s1768_s23 + $0x50] sm:$0xf] }
 0x153   : >> { %958 = vst [vmem:[%s1764_s18 + $0x28] sm:$0xf] %v957_v20  ;;  %s2159_s8 = scalar_lea.vmem %s1996_s21, %s1450_s7 [#allocation2]   ;;  %s1007_s9 = scalar_lea.vmem %s2083_s27, %s1450_s7   ;;  %v979_v31 = vld [vmem:[%s1768_s23 + $0x54] sm:$0xf]  ;;  %v981_v32 = vld [vmem:[%s1768_s23 + $0x58] sm:$0xf] }
 0x154   : >> { %960 = vst [vmem:[%s1764_s18 + $0x2c] sm:$0xf] %v959_v21  ;;  %v983_v33 = vld [vmem:[%s1768_s23 + $0x5c] sm:$0xf]  ;;  %v985_v34 = vld [vmem:[%s1768_s23 + $0x60] sm:$0xf] }
 0x155   : >> { %962 = vst [vmem:[%s1764_s18 + $0x30] sm:$0xf] %v961_v22  ;;  %v987_v35 = vld [vmem:[%s1768_s23 + $0x64] sm:$0xf]  ;;  %v989_v36 = vld [vmem:[%s1768_s23 + $0x68] sm:$0xf] }
 0x156   : >> { %964 = vst [vmem:[%s1764_s18 + $0x34] sm:$0xf] %v963_v23  ;;  %v991_v37 = vld [vmem:[%s1768_s23 + $0x6c] sm:$0xf]  ;;  %v993_v38 = vld [vmem:[%s1768_s23 + $0x70] sm:$0xf] }
 0x157   : >> { %966 = vst [vmem:[%s1764_s18 + $0x38] sm:$0xf] %v965_v24  ;;  %v995_v39 = vld [vmem:[%s1768_s23 + $0x74] sm:$0xf]  ;;  %v997_v40 = vld [vmem:[%s1768_s23 + $0x78] sm:$0xf] }
 0x158   : >> { %968 = vst [vmem:[%s1764_s18 + $0x3c] sm:$0xf] %v967_v25  ;;  %v999_v41 = vld [vmem:[%s1768_s23 + $0x7c] sm:$0xf]  ;;  %s2227_s23 = smov %s2159_s8 }
 0x159   : >> { %970 = vst [vmem:[%s1764_s18 + $0x40] sm:$0xf] %v969_v26 }
 0x15a   : >> { %972 = vst [vmem:[%s1764_s18 + $0x44] sm:$0xf] %v971_v27 }
 0x15b   : >> { %974 = vst [vmem:[%s1764_s18 + $0x48] sm:$0xf] %v973_v28 }
 0x15c   : >> { %976 = vst [vmem:[%s1764_s18 + $0x4c] sm:$0xf] %v975_v29 }
 0x15d   : >> { %978 = vst [vmem:[%s1764_s18 + $0x50] sm:$0xf] %v977_v30 }
 0x15e   : >> { %980 = vst [vmem:[%s1764_s18 + $0x54] sm:$0xf] %v979_v31 }
 0x15f   : >> { %982 = vst [vmem:[%s1764_s18 + $0x58] sm:$0xf] %v981_v32 }
 0x160   : >> { %984 = vst [vmem:[%s1764_s18 + $0x5c] sm:$0xf] %v983_v33 }
 0x161   : >> { %986 = vst [vmem:[%s1764_s18 + $0x60] sm:$0xf] %v985_v34 }
 0x162   : >> { %988 = vst [vmem:[%s1764_s18 + $0x64] sm:$0xf] %v987_v35 }
 0x163   : >> { %990 = vst [vmem:[%s1764_s18 + $0x68] sm:$0xf] %v989_v36 }
 0x164   : >> { %992 = vst [vmem:[%s1764_s18 + $0x6c] sm:$0xf] %v991_v37  ;;  %933 = sbr.rel (!%p930_p12) target bundleno = 328 (0x148), region = 122 }
 0x165   : >> { %994 = vst [vmem:[%s1764_s18 + $0x70] sm:$0xf] %v993_v38 }
 0x166   : >> { %996 = vst [vmem:[%s1764_s18 + $0x74] sm:$0xf] %v995_v39 }
 0x167   : >> { %998 = vst [vmem:[%s1764_s18 + $0x78] sm:$0xf] %v997_v40 }
 0x168   : >> { %1000 = vst [vmem:[%s1764_s18 + $0x7c] sm:$0xf] %v999_v41  ;;  %s2226_s18 = smov %s1007_s9 }
 0x169 PF: > { %s2200_s10 = sand.u32 31, %s2233_s15   ;;  %s1506_s11 = sshll.u32 %s2089_s30, 7 }
 0x16a   : > { %s1012_s12 = scalar_lea.vmem %s1996_s21, %s1506_s11 [#allocation2]   ;;  %s1014_s13 = scalar_lea.vmem %s2083_s27, %s1506_s11  }
 0x16b   : > { %p1455_p13 = scmp.le.s32.totalorder %s2200_s10, 0 }
 0x16c   : > { %s1778_s14 = smov (!%p1455_p13), %s1014_s13   ;;  %s1782_s17 = smov (!%p1455_p13), %s1012_s12  }
 0x16d   : > { %1213 = sbr.rel (%p1455_p13) target bundleno = 378 (0x17a), region = 127  ;;  %s1786_s20 = smov (!%p1455_p13), 0  }
 0x16e   : > { %s1790_s24 = smov (!%p1455_p13), 0  }
 0x172 LB: >> { %v1024_v42 = vld [vmem:[%s1784_s17] sm:$0xf]  ;;  %s1026_s15 = sadd.s32 1, %s1788_s20  ;;  %s1018_s24 = sadd.s32 1, %s1792_s24   ;;  %s1792_s24 = sphi %s1790_s24, %s1018_s24   ;;  %s1788_s20 = sphi %s1786_s20, %s1787_s20   ;;  %s1784_s17 = sphi %s1782_s17, %s1031_s17   ;;  %s1780_s14 = sphi %s1778_s14, %s1032_s14  }
 0x173   : >> { %1025 = vst [vmem:[%s1780_s14] sm:$0xf] %v1024_v42  ;;  %p1027_p0 = scmp.ge.s32.totalorder %s1026_s15, %s2200_s10  ;;  %p1017_p1 = scmp.ge.s32.totalorder %s1018_s24, %s2200_s10 }
 0x175   : >> { %s2237_s15 = smov (%p1027_p0, %s1026_s15), 0  ;;  %1020 = sbr.rel (!%p1017_p1) target bundleno = 370 (0x172), region = 133 }
 0x176   : >> { %s1456_s21 = sshll.u32 %s2237_s15, 2  ;;  %s1787_s20 = smov %s2237_s15  }
 0x177   : >> { %s1031_s17 = scalar_lea.vmem %s1012_s12, %s1456_s21 [#allocation2]   ;;  %s1032_s14 = scalar_lea.vmem %s1014_s13, %s1456_s21  }
 0x17a PF: > { %p11_p2 = scmp.ge.s32.totalorder %s1834_s19, 4   ;;  %s2229_s15 = smov %s1756_s16 }
 0x17b   : > { %s2230_s16 = smov %s1842_s22  ;;  %s2231_s17 = smov %s1834_s19 }
 0x17c   :  { %13 = sbr.rel (!%p11_p2) target bundleno = 2 (0x2), region = 144 }

// kernel: model_forward.8
= control target key start
LH: loop header
LB: loop body
LE: loop exit
PB: predicated region body
PF: predicated region fallthrough
CT: control target
= control target key end

     0   :  { %s758_s0 = inlined_call_operand.vmem [shape: bf16[9,72,128], index: 0, kind: input, shape index: {}]   ;;  %s759_s1 = inlined_call_operand.vmem [shape: bf16[72,128], index: 1, kind: output, shape index: {}]  }
   0x1   :  { %v345_v0 = vld [vmem:[%s758_s0] sm:$0xff]   ;;  %v511_v2 = vld [vmem:[%s758_s0 + $0x28] sm:$0xff]   ;;  %v574_v8 = vld [vmem:[%s758_s0 + $0x70] sm:$0xff]  }
   0x2   :  { %v562_v1 = vld [vmem:[%s758_s0 + $0x20] sm:$0xff]   ;;  %v346_v3 = vunpack.c.l.bf16 %v345_v0  ;;  %v347_v4 = vunpack.c.h.bf16 %v345_v0  ;;  %v362_v5 = vunpack.c.l.bf16 %v511_v2  ;;  %v515_v7 = vld [vmem:[%s758_s0 + $0x48] sm:$0xff]   ;;  %v394_v12 = vunpack.c.l.bf16 %v574_v8  ;;  %v523_v13 = vld [vmem:[%s758_s0 + $0x90] sm:$0xff]  }
   0x3   :  { %v36_v6 = vunpack.c.h.bf16 %v562_v1  ;;  %v378_v9 = vunpack.c.l.bf16 %v515_v7  ;;  %v379_v10 = vunpack.c.h.bf16 %v515_v7  ;;  %v579_v11 = vld [vmem:[%s758_s0 + $0x68] sm:$0xff]   ;;  %v588_v14 = vld [vmem:[%s758_s0 + $0xb8] sm:$0xff]   ;;  %v410_v18 = vunpack.c.l.bf16 %v523_v13  ;;  %v594_v19 = vld [vmem:[%s758_s0 + $0xb0] sm:$0xff]  }
   0x4   :  { %v46_v16 = vmax.f32 %v347_v4, %v362_v5  ;;  %v92_v17 = vunpack.c.h.bf16 %v579_v11  ;;  %v531_v20 = vld [vmem:[%s758_s0 + $0xd8] sm:$0xff]   ;;  %v602_v21 = vld [vmem:[%s758_s0 + $0x100] sm:$0xff]   ;;  %v411_v22 = vunpack.c.h.bf16 %v523_v13  ;;  %v426_v23 = vunpack.c.l.bf16 %v588_v14  ;;  %v508_v27 = vld [vmem:[%s758_s0 + $0x8] sm:$0xff]  }
   0x5   :  { %v45_v15 = vmax.f32 %v346_v3, %v36_v6  ;;  %v148_v24 = vunpack.c.h.bf16 %v594_v19  ;;  %v442_v25 = vunpack.c.l.bf16 %v531_v20  ;;  %v609_v26 = vld [vmem:[%s758_s0 + $0x120] sm:$0xff]   ;;  %v617_v28 = vld [vmem:[%s758_s0 + $0x30] sm:$0xff]   ;;  %v443_v31 = vunpack.c.h.bf16 %v531_v20  ;;  %v622_v32 = vld [vmem:[%s758_s0 + $0xf8] sm:$0xff]  }
   0x6   :  { %v74_v30 = vmax.f32 %v46_v16, %v379_v10  ;;  %v458_v33 = vunpack.c.l.bf16 %v602_v21  ;;  %v516_v34 = vld [vmem:[%s758_s0 + $0x50] sm:$0xff]   ;;  %v631_v35 = vld [vmem:[%s758_s0 + $0x78] sm:$0xff]   ;;  %v204_v36 = vunpack.c.h.bf16 %v622_v32  ;;  %v474_v37 = vunpack.c.l.bf16 %v609_v26  ;;  %v644_v53 = vld [vmem:[%s758_s0 + $0xc0] sm:$0xff]  }
   0x7   :  { %v73_v29 = vmax.f32 %v45_v15, %v378_v9  ;;  %v350_v38 = vunpack.c.l.bf16 %v508_v27  ;;  %v351_v39 = vunpack.c.h.bf16 %v508_v27  ;;  %v363_v42 = vunpack.c.h.bf16 %v511_v2  ;;  %v524_v44 = vld [vmem:[%s758_s0 + $0x98] sm:$0xff]   ;;  %v532_v54 = vld [vmem:[%s758_s0 + $0xe0] sm:$0xff]   ;;  %v654_v63 = vld [vmem:[%s758_s0 + $0x108] sm:$0xff]  }
   0x8   :  { %v102_v41 = vmax.f32 %v74_v30, %v394_v12  ;;  %v366_v43 = vunpack.c.l.bf16 %v617_v28  ;;  %v382_v45 = vunpack.c.l.bf16 %v516_v34  ;;  %v383_v46 = vunpack.c.h.bf16 %v516_v34  ;;  %v540_v0 = vld [vmem:[%s758_s0 + $0x128] sm:$0xff]   ;;  %v509_v2 = vld [vmem:[%s758_s0 + $0x10] sm:$0xff]   ;;  %v667_v12 = vld [vmem:[%s758_s0 + $0x38] sm:$0xff]  }
   0x9   :  { %v101_v40 = vmax.f32 %v73_v29, %v92_v17  ;;  %v395_v47 = vunpack.c.h.bf16 %v574_v8  ;;  %v398_v48 = vunpack.c.l.bf16 %v631_v35  ;;  %v47_v51 = vmax.f32 %v350_v38, %v363_v42  ;;  %v517_v13 = vld [vmem:[%s758_s0 + $0x58] sm:$0xff]  }
   0xa   :  { %v130_v50 = vmax.f32 %v102_v41, %v411_v22  ;;  %v48_v52 = vmax.f32 %v351_v39, %v366_v43  ;;  %v475_v55 = vunpack.c.h.bf16 %v609_v26  ;;  %v414_v56 = vunpack.c.l.bf16 %v524_v44 }
   0xb   :  { %v129_v49 = vmax.f32 %v101_v40, %v410_v18  ;;  %v415_v57 = vunpack.c.h.bf16 %v524_v44  ;;  %v427_v58 = vunpack.c.h.bf16 %v588_v14  ;;  %v75_v61 = vmax.f32 %v47_v51, %v382_v45  ;;  %v533_v44 = vld [vmem:[%s758_s0 + $0xe8] sm:$0xff]   ;;  %v700_v51 = vld [vmem:[%s758_s0 + $0x110] sm:$0xff]  }
   0xc   :  { %v158_v60 = vmax.f32 %v130_v50, %v426_v23  ;;  %v76_v62 = vmax.f32 %v48_v52, %v383_v46  ;;  %v430_v3 = vunpack.c.l.bf16 %v644_v53  ;;  %v446_v4 = vunpack.c.l.bf16 %v532_v54  ;;  %v676_v23 = vld [vmem:[%s758_s0 + $0x80] sm:$0xff]   ;;  %v510_v52 = vld [vmem:[%s758_s0 + $0x18] sm:$0xff]  }
   0xd   :  { %v157_v59 = vmax.f32 %v129_v49, %v148_v24  ;;  %v447_v5 = vunpack.c.h.bf16 %v532_v54  ;;  %v459_v6 = vunpack.c.h.bf16 %v602_v21  ;;  %v103_v9 = vmax.f32 %v75_v61, %v395_v47 }
   0xe   :  { %v186_v8 = vmax.f32 %v158_v60, %v443_v31  ;;  %v104_v10 = vmax.f32 %v76_v62, %v398_v48  ;;  %v462_v14 = vunpack.c.l.bf16 %v654_v63  ;;  %v478_v15 = vunpack.c.l.bf16 %v540_v0  ;;  %v518_v62 = vld [vmem:[%s758_s0 + $0x60] sm:$0xff]  }
   0xf   :  { %v185_v7 = vmax.f32 %v157_v59, %v442_v25  ;;  %v354_v16 = vunpack.c.l.bf16 %v509_v2  ;;  %v355_v17 = vunpack.c.h.bf16 %v509_v2  ;;  %v131_v21 = vmax.f32 %v103_v9, %v414_v56 }
  0x10   :  { %v214_v20 = vmax.f32 %v186_v8, %v458_v33  ;;  %v132_v22 = vmax.f32 %v104_v10, %v415_v57  ;;  %v367_v24 = vunpack.c.h.bf16 %v617_v28  ;;  %v370_v25 = vunpack.c.l.bf16 %v667_v12  ;;  %v525_v33 = vld [vmem:[%s758_s0 + $0xa0] sm:$0xff]  }
  0x11   :  { %v213_v18 = vmax.f32 %v185_v7, %v204_v36  ;;  %v386_v26 = vunpack.c.l.bf16 %v517_v13  ;;  %v387_v27 = vunpack.c.h.bf16 %v517_v13  ;;  %v159_v31 = vmax.f32 %v131_v21, %v427_v58  ;;  %v514_v58 = vld [vmem:[%s758_s0 + $0x40] sm:$0xff]   ;;  %v541_v7 = vld [vmem:[%s758_s0 + $0x130] sm:$0xff]  }
  0x12   :  { %v242_v30 = vmax.f32 %v214_v20, %v475_v55  ;;  %v160_v34 = vmax.f32 %v132_v22, %v430_v3  ;;  %v49_v36 = vmax.f32 %v354_v16, %v367_v24  ;;  %v50_v38 = vmax.f32 %v355_v17, %v370_v25  ;;  %v526_v16 = vld [vmem:[%s758_s0 + $0xa8] sm:$0xff]  }
  0x13   :  { %v241_v29 = vmax.f32 %v213_v18, %v474_v37  ;;  %v399_v39 = vunpack.c.h.bf16 %v631_v35  ;;  %v402_v40 = vunpack.c.l.bf16 %v676_v23  ;;  %v187_v28 = vmax.f32 %v159_v31, %v446_v4  ;;  %v688_v37 = vld [vmem:[%s758_s0 + $0xc8] sm:$0xff]  }
  0x14   :  { %v188_v42 = vmax.f32 %v160_v34, %v447_v5  ;;  %v479_v43 = vunpack.c.h.bf16 %v540_v0  ;;  %v77_v45 = vmax.f32 %v49_v36, %v386_v26  ;;  %v78_v46 = vmax.f32 %v50_v38, %v387_v27  ;;  %v522_v5 = vld [vmem:[%s758_s0 + $0x88] sm:$0xff]   ;;  %v530_v26 = vld [vmem:[%s758_s0 + $0xd0] sm:$0xff]  }
  0x15   :  { %v491_v41 = vpack.c.bf16 %v242_v30, %v241_v29  ;;  %v418_v47 = vunpack.c.l.bf16 %v525_v33  ;;  %v419_v48 = vunpack.c.h.bf16 %v525_v33  ;;  %v215_v35 = vmax.f32 %v187_v28, %v459_v6  ;;  %v534_v34 = vld [vmem:[%s758_s0 + $0xf0] sm:$0xff]  }
  0x16   :  { %v216_v49 = vmax.f32 %v188_v42, %v462_v14  ;;  %v431_v50 = vunpack.c.h.bf16 %v644_v53  ;;  %v105_v54 = vmax.f32 %v77_v45, %v399_v39  ;;  %v106_v55 = vmax.f32 %v78_v46, %v402_v40 }
  0x17   :  { %492 = vst [vmem:[%s759_s1] sm:$0xff] %v491_v41   ;;  %v434_v56 = vunpack.c.l.bf16 %v688_v37  ;;  %v450_v57 = vunpack.c.l.bf16 %v533_v44  ;;  %v243_v59 = vmax.f32 %v215_v35, %v478_v15  ;;  %v451_v60 = vunpack.c.h.bf16 %v533_v44  ;;  %v538_v41 = vld [vmem:[%s758_s0 + $0x118] sm:$0xff]  }
  0x18   :  { %v244_v53 = vmax.f32 %v216_v49, %v479_v43  ;;  %v463_v61 = vunpack.c.h.bf16 %v654_v63  ;;  %v133_v0 = vmax.f32 %v105_v54, %v418_v47  ;;  %v134_v2 = vmax.f32 %v106_v55, %v419_v48  ;;  %v542_v47 = vld [vmem:[%s758_s0 + $0x138] sm:$0xff]  }
  0x19   :  { %v466_v3 = vunpack.c.l.bf16 %v700_v51  ;;  %v358_v4 = vunpack.c.l.bf16 %v510_v52  ;;  %v359_v8 = vunpack.c.h.bf16 %v510_v52  ;;  %v371_v63 = vunpack.c.h.bf16 %v667_v12 }
  0x1a   :  { %v496_v6 = vpack.c.bf16 %v244_v53, %v243_v59  ;;  %v374_v9 = vunpack.c.l.bf16 %v514_v58  ;;  %v161_v10 = vmax.f32 %v133_v0, %v431_v50  ;;  %v162_v13 = vmax.f32 %v134_v2, %v434_v56 }
  0x1b   :  { %v390_v14 = vunpack.c.l.bf16 %v518_v62  ;;  %v391_v15 = vunpack.c.h.bf16 %v518_v62  ;;  %v51_v17 = vmax.f32 %v358_v4, %v371_v63  ;;  %v403_v20 = vunpack.c.h.bf16 %v676_v23 }
  0x1c   :  { %543 = vst [vmem:[%s759_s1 + $0x8] sm:$0xff] %v496_v6   ;;  %v52_v18 = vmax.f32 %v359_v8, %v374_v9  ;;  %v406_v21 = vunpack.c.l.bf16 %v522_v5  ;;  %v189_v22 = vmax.f32 %v161_v10, %v450_v57  ;;  %v190_v12 = vmax.f32 %v162_v13, %v451_v60  ;;  %v343_v6 = vld [vmem:[%s758_s0 + $0x140] sm:$0xf] }
  0x1d   :  { %v482_v24 = vunpack.c.l.bf16 %v541_v7  ;;  %v483_v25 = vunpack.c.h.bf16 %v541_v7  ;;  %v79_v27 = vmax.f32 %v51_v17, %v390_v14  ;;  %v422_v30 = vunpack.c.l.bf16 %v526_v16 }
  0x1e   :  { %v80_v29 = vmax.f32 %v52_v18, %v391_v15  ;;  %v423_v31 = vunpack.c.h.bf16 %v526_v16  ;;  %v217_v33 = vmax.f32 %v189_v22, %v463_v61  ;;  %v218_v36 = vmax.f32 %v190_v12, %v466_v3 }
  0x1f   :  { %v107_v23 = vmax.f32 %v79_v27, %v403_v20  ;;  %v435_v39 = vunpack.c.h.bf16 %v688_v37  ;;  %v438_v40 = vunpack.c.l.bf16 %v530_v26  ;;  %v454_v43 = vunpack.c.l.bf16 %v534_v34 }
  0x20   :  { %v108_v38 = vmax.f32 %v80_v29, %v406_v21  ;;  %v245_v28 = vmax.f32 %v217_v33, %v482_v24  ;;  %v246_v42 = vmax.f32 %v218_v36, %v483_v25  ;;  %v455_v44 = vunpack.c.h.bf16 %v534_v34 }
  0x21   :  { %v135_v45 = vmax.f32 %v107_v23, %v422_v30  ;;  %v25_v48 = vunpack.c.l.bf16 %v562_v1  ;;  %v375_v35 = vunpack.c.h.bf16 %v514_v58  ;;  %v467_v37 = vunpack.c.h.bf16 %v700_v51 }
  0x22   :  { %v136_v46 = vmax.f32 %v108_v38, %v423_v31  ;;  %v501_v49 = vpack.c.bf16 %v246_v42, %v245_v28  ;;  %v470_v50 = vunpack.c.l.bf16 %v538_v41  ;;  %v72_v52 = vunpack.c.l.bf16 %v579_v11 }
  0x23   :  { %v163_v54 = vmax.f32 %v135_v45, %v435_v39  ;;  %v53_v56 = vmax.f32 %v25_v48, %v375_v35  ;;  %v407_v57 = vunpack.c.h.bf16 %v522_v5  ;;  %v486_v59 = vunpack.c.l.bf16 %v542_v47 }
  0x24   :  { %v164_v55 = vmax.f32 %v136_v46, %v438_v40  ;;  %544 = vst [vmem:[%s759_s1 + $0x10] sm:$0xff] %v501_v49   ;;  %v487_v53 = vunpack.c.h.bf16 %v542_v47  ;;  %v128_v58 = vunpack.c.l.bf16 %v594_v19  ;;  %v439_v2 = vunpack.c.h.bf16 %v530_v26 }
  0x25   :  { %v191_v60 = vmax.f32 %v163_v54, %v454_v43  ;;  %v81_v1 = vmax.f32 %v53_v56, %v72_v52  ;;  %v184_v5 = vunpack.c.l.bf16 %v622_v32  ;;  %v471_v63 = vunpack.c.h.bf16 %v538_v41 }
  0x26   :  { %v192_v61 = vmax.f32 %v164_v55, %v455_v44  ;;  %v240_v9 = vunpack.c.l.bf16 %v343_v6 }
  0x27   :  { %v219_v62 = vmax.f32 %v191_v60, %v467_v37  ;;  %v109_v0 = vmax.f32 %v81_v1, %v407_v57 }
  0x28   :  { %v220_v51 = vmax.f32 %v192_v61, %v470_v50 }
  0x29   :  { %v247_v11 = vmax.f32 %v219_v62, %v486_v59  ;;  %v137_v4 = vmax.f32 %v109_v0, %v128_v58 }
  0x2a   :  { %v248_v3 = vmax.f32 %v220_v51, %v487_v53 }
  0x2b   :  { %v165_v8 = vmax.f32 %v137_v4, %v439_v2 }
  0x2c   :  { %v506_v7 = vpack.c.bf16 %v248_v3, %v247_v11 }
  0x2d   :  { %v193_v19 = vmax.f32 %v165_v8, %v184_v5 }
  0x2e   :  { %545 = vst [vmem:[%s759_s1 + $0x18] sm:$0xff] %v506_v7  }
  0x2f   :  { %v221_v10 = vmax.f32 %v193_v19, %v471_v63 }
  0x31   :  { %v249_v13 = vmax.f32 %v221_v10, %v240_v9 }
  0x33   :  { %v258_v14 = vpack.c.bf16 %v249_v13, %v249_v13 }
  0x35   :  { %267 = vst [vmem:[%s759_s1 + $0x20] sm:$0xf] %v258_v14 }

// kernel: model_forward.9
= control target key start
LH: loop header
LB: loop body
LE: loop exit
PB: predicated region body
PF: predicated region fallthrough
CT: control target
= control target key end

     0   :  { %s2354_s1 = inlined_call_operand.vmem [shape: bf16[1152,128], index: 1, kind: input, shape index: {}]   ;;  %s2355_s0 = inlined_call_operand.vmem [shape: bf16[72,1152], index: 0, kind: input, shape index: {}]   ;;  %s2356_s2 = inlined_call_operand.vmem [shape: f32[1,128], index: 2, kind: input, shape index: {}]   ;;  %s2357_s3 = inlined_call_operand.vmem [shape: f32[1,128], index: 3, kind: input, shape index: {}]   ;;  %s2358_s4 = inlined_call_operand.vmem [shape: bf16[72,128], index: 4, kind: output, shape index: {}]  }
   0x1   :  { %v1683_v0 = vld [vmem:[%s2354_s1 + $0x38] sm:$0xff]  ;;  %v1682_v1 = vld [vmem:[%s2354_s1 + $0x30] sm:$0xff]  ;;  %v1681_v4 = vld [vmem:[%s2354_s1 + $0x28] sm:$0xff] }
   0x2   :  { %854 = vmatpush.bf16.msra.mxu0 %v1683_v0  ;;  %1771 = vmatpush.bf16.msra.mxu1 %v1683_v0  ;;  %v1707_v2 = vld [vmem:[%s2354_s1 + $0xf8] sm:$0xff]  ;;  %v1706_v3 = vld [vmem:[%s2354_s1 + $0xf0] sm:$0xff]  ;;  %v1705_v5 = vld [vmem:[%s2354_s1 + $0xe8] sm:$0xff] }
   0x3   :  { %1772 = vmatpush.bf16.msra.mxu2 %v1683_v0  ;;  %953 = vmatpush.bf16.msra.mxu3 %v1707_v2  ;;  %v1680_v6 = vld [vmem:[%s2354_s1 + $0x20] sm:$0xff]  ;;  %v1679_v8 = vld [vmem:[%s2354_s1 + $0x18] sm:$0xff]  ;;  %v1678_v10 = vld [vmem:[%s2354_s1 + $0x10] sm:$0xff] }
   0x4   :  { %v1704_v7 = vld [vmem:[%s2354_s1 + $0xe0] sm:$0xff]  ;;  %v1703_v9 = vld [vmem:[%s2354_s1 + $0xd8] sm:$0xff]  ;;  %v1702_v11 = vld [vmem:[%s2354_s1 + $0xd0] sm:$0xff] }
   0x5   :  { %v1677_v12 = vld [vmem:[%s2354_s1 + $0x8] sm:$0xff]  ;;  %v1856_v13 = vld [vmem:[%s2355_s0 + $0x120] sm:$0xff]  ;;  %v1282_v18 = vld [vmem:[%s2355_s0 + $0x90] sm:$0xf] }
   0x6   :  { %855 = vmatpush.bf16.msra.mxu0 %v1682_v1  ;;  %1773 = vmatpush.bf16.msra.mxu1 %v1682_v1  ;;  %v1701_v14 = vld [vmem:[%s2354_s1 + $0xc8] sm:$0xff]  ;;  %v1676_v15 = vld [vmem:[%s2354_s1] sm:$0xff]  ;;  %v1662_v19 = vld [vmem:[%s2355_s0 + $0xb0] sm:$0xf0]  ;;  %v323_v20 = vunpack.c.l.b16 %v1856_v13 }
   0x7   :  { %1774 = vmatpush.bf16.msra.mxu2 %v1682_v1  ;;  %954 = vmatpush.bf16.msra.mxu3 %v1706_v3  ;;  %v1210_v16 = vld [vmem:[%s2355_s0] sm:$0xf]  ;;  %v1644_v17 = vld [vmem:[%s2355_s0 + $0x20] sm:$0xf0]  ;;  %v1691_v21 = vld [vmem:[%s2354_s1 + $0x78] sm:$0xff]  ;;  %v1283_v25 = vor.u32 %v1662_v19, %v1282_v18 }
   0x8   :  { %v1699_v22 = vld [vmem:[%s2354_s1 + $0xb8] sm:$0xff]  ;;  %v1211_v24 = vor.u32 %v1644_v17, %v1210_v16  ;;  %v368_v26 = vpack.c.b16 %v323_v20, %v323_v20  ;;  %v1700_v27 = vld [vmem:[%s2354_s1 + $0xc0] sm:$0xff]  ;;  %v1641_v28 = vld [vmem:[%s2355_s0 + $0xc] sm:$0xf] }
   0x9   :  { %v1715_v23 = vld [vmem:[%s2354_s1 + $0x138] sm:$0xff]  ;;  %v1220_v29 = vld [vmem:[%s2355_s0 + $0x2c] sm:$0xf0]  ;;  %v1689_v35 = vld [vmem:[%s2354_s1 + $0x68] sm:$0xff] }
   0xa   :  { %856 = vmatpush.bf16.msra.mxu0 %v1681_v4  ;;  %1775 = vmatpush.bf16.msra.mxu1 %v1681_v4  ;;  %v1690_v30 = vld [vmem:[%s2354_s1 + $0x70] sm:$0xff]  ;;  %v1739_v31 = vld [vmem:[%s2354_s1 + $0x1f8] sm:$0xff]  ;;  %v1223_v34 = vor.u32 %v1641_v28, %v1220_v29  ;;  %v1697_v37 = vld [vmem:[%s2354_s1 + $0xa8] sm:$0xff] }
   0xb   :  { %1776 = vmatpush.bf16.msra.mxu2 %v1681_v4  ;;  %955 = vmatpush.bf16.msra.mxu3 %v1705_v5  ;;  %v1698_v32 = vld [vmem:[%s2354_s1 + $0xb0] sm:$0xff]  ;;  %v1713_v38 = vld [vmem:[%s2354_s1 + $0x128] sm:$0xff]  ;;  %v1688_v39 = vld [vmem:[%s2354_s1 + $0x60] sm:$0xff] }
   0xc   :  { %v1714_v33 = vld [vmem:[%s2354_s1 + $0x130] sm:$0xff]  ;;  %v1696_v40 = vld [vmem:[%s2354_s1 + $0xa0] sm:$0xff]  ;;  %v1246_v42 = vld [vmem:[%s2355_s0 + $0x48] sm:$0xf] }
   0xd   :  { %v1738_v36 = vld [vmem:[%s2354_s1 + $0x1f0] sm:$0xff]  ;;  %v1712_v41 = vld [vmem:[%s2354_s1 + $0x120] sm:$0xff]  ;;  %v1653_v43 = vld [vmem:[%s2355_s0 + $0x68] sm:$0xf0] }
   0xe   :  { %857 = vmatpush.bf16.msra.mxu0 %v1680_v6  ;;  %1777 = vmatpush.bf16.msra.mxu1 %v1680_v6  ;;  %v1318_v44 = vld [vmem:[%s2355_s0 + $0xd8] sm:$0xf]  ;;  %v1671_v45 = vld [vmem:[%s2355_s0 + $0xf8] sm:$0xf0]  ;;  %v1247_v49 = vor.u32 %v1653_v43, %v1246_v42  ;;  %v1650_v51 = vld [vmem:[%s2355_s0 + $0x54] sm:$0xf] }
   0xf   :  { %1778 = vmatpush.bf16.msra.mxu2 %v1680_v6  ;;  %956 = vmatpush.bf16.msra.mxu3 %v1704_v7  ;;  %v1687_v46 = vld [vmem:[%s2354_s1 + $0x58] sm:$0xff]  ;;  %v1319_v50 = vor.u32 %v1671_v45, %v1318_v44  ;;  %v1686_v53 = vld [vmem:[%s2354_s1 + $0x50] sm:$0xff]  ;;  %v1737_v57 = vld [vmem:[%s2354_s1 + $0x1e8] sm:$0xff] }
  0x10   :  { %v1695_v47 = vld [vmem:[%s2354_s1 + $0x98] sm:$0xff]  ;;  %v1694_v54 = vld [vmem:[%s2354_s1 + $0x90] sm:$0xff]  ;;  %v1685_v58 = vld [vmem:[%s2354_s1 + $0x48] sm:$0xff] }
  0x11   :  { %v1711_v48 = vld [vmem:[%s2354_s1 + $0x118] sm:$0xff]  ;;  %v1710_v55 = vld [vmem:[%s2354_s1 + $0x110] sm:$0xff]  ;;  %v1693_v59 = vld [vmem:[%s2354_s1 + $0x88] sm:$0xff] }
  0x12   :  { %858 = vmatpush.bf16.msra.mxu0 %v1679_v8  ;;  %1779 = vmatpush.bf16.msra.mxu1 %v1679_v8  ;;  %v1256_v52 = vld [vmem:[%s2355_s0 + $0x74] sm:$0xf0]  ;;  %v1709_v60 = vld [vmem:[%s2354_s1 + $0x108] sm:$0xff]  ;;  %v1692_v61 = vld [vmem:[%s2354_s1 + $0x80] sm:$0xff] }
  0x13   :  { %1780 = vmatpush.bf16.msra.mxu2 %v1679_v8  ;;  %957 = vmatpush.bf16.msra.mxu3 %v1703_v9  ;;  %v1259_v56 = vor.u32 %v1650_v51, %v1256_v52  ;;  %v1684_v62 = vld [vmem:[%s2354_s1 + $0x40] sm:$0xff]  ;;  %v1218_v63 = vld [vmem:[%s2355_s0 + $0x8] sm:$0xf]  ;;  %v1645_v0 = vld [vmem:[%s2355_s0 + $0x28] sm:$0xf0] }
  0x14   :  { %v1708_v1 = vld [vmem:[%s2354_s1 + $0x100] sm:$0xff]  ;;  %v1731_v2 = vld [vmem:[%s2354_s1 + $0x1b8] sm:$0xff]  ;;  %v1212_v4 = vld [vmem:[%s2355_s0 + $0x24] sm:$0xf0]  ;;  %v1219_v9 = vor.u32 %v1645_v0, %v1218_v63 }
  0x15   :  { %v1640_v3 = vld [vmem:[%s2355_s0 + $0x4] sm:$0xf]  ;;  %v1723_v5 = vld [vmem:[%s2354_s1 + $0x178] sm:$0xff]  ;;  %v1226_v6 = vld [vmem:[%s2355_s0 + $0x10] sm:$0xf] }
  0x16   :  { %859 = vmatpush.bf16.msra.mxu0 %v1678_v10  ;;  %1781 = vmatpush.bf16.msra.mxu1 %v1678_v10  ;;  %v1646_v7 = vld [vmem:[%s2355_s0 + $0x30] sm:$0xf0]  ;;  %v1747_v8 = vld [vmem:[%s2354_s1 + $0x238] sm:$0xff]  ;;  %v1292_v16 = vld [vmem:[%s2355_s0 + $0xbc] sm:$0xf0] }
  0x17   :  { %1782 = vmatpush.bf16.msra.mxu2 %v1678_v10  ;;  %958 = vmatpush.bf16.msra.mxu3 %v1702_v11  ;;  %v1215_v10 = vor.u32 %v1640_v3, %v1212_v4  ;;  %v1227_v11 = vor.u32 %v1646_v7, %v1226_v6  ;;  %v1746_v17 = vld [vmem:[%s2354_s1 + $0x230] sm:$0xff]  ;;  %v1736_v18 = vld [vmem:[%s2354_s1 + $0x1e0] sm:$0xff]  ;;  %v1729_v20 = vld [vmem:[%s2354_s1 + $0x1a8] sm:$0xff] }
  0x18   :  { %v1654_v28 = vld [vmem:[%s2355_s0 + $0x70] sm:$0xf0]  ;;  %v1649_v29 = vld [vmem:[%s2355_s0 + $0x4c] sm:$0xf]  ;;  %v1284_v51 = vld [vmem:[%s2355_s0 + $0xb4] sm:$0xf0] }
  0x19   :  { %v1734_v43 = vld [vmem:[%s2354_s1 + $0x1d0] sm:$0xff]  ;;  %v1725_v45 = vld [vmem:[%s2354_s1 + $0x188] sm:$0xff]  ;;  %v1298_v52 = vld [vmem:[%s2355_s0 + $0xa0] sm:$0xf] }
  0x1a   :  { %860 = vmatpush.bf16.msra.mxu0 %v1677_v12  ;;  %1783 = vmatpush.bf16.msra.mxu1 %v1677_v12  ;;  %v1718_v44 = vld [vmem:[%s2354_s1 + $0x150] sm:$0xff]  ;;  %v1732_v63 = vld [vmem:[%s2354_s1 + $0x1c0] sm:$0xff]  ;;  %v1667_v3 = vld [vmem:[%s2355_s0 + $0xdc] sm:$0xf] }
  0x1b   :  { %1784 = vmatpush.bf16.msra.mxu2 %v1677_v12  ;;  %959 = vmatpush.bf16.msra.mxu3 %v1701_v14  ;;  %v1730_v12 = vld [vmem:[%s2354_s1 + $0x1b0] sm:$0xff]  ;;  %v1716_v0 = vld [vmem:[%s2354_s1 + $0x140] sm:$0xff]  ;;  %v1673_v6 = vld [vmem:[%s2355_s0 + $0x108] sm:$0xf0] }
  0x1c   :  { %v1722_v14 = vld [vmem:[%s2354_s1 + $0x170] sm:$0xff]  ;;  %v1320_v4 = vld [vmem:[%s2355_s0 + $0xfc] sm:$0xf0] }
  0x1e   :  { %861 = vmatpush.bf16.msra.mxu0 %v1676_v15  ;;  %1785 = vmatpush.bf16.msra.mxu1 %v1676_v15 }
  0x1f   :  { %1786 = vmatpush.bf16.msra.mxu2 %v1676_v15  ;;  %960 = vmatpush.bf16.msra.mxu3 %v1700_v27  ;;  %v1659_v15 = vld [vmem:[%s2355_s0 + $0x9c] sm:$0xf]  ;;  %v1254_v27 = vld [vmem:[%s2355_s0 + $0x50] sm:$0xf] }
  0x20   :  { %v1295_v19 = vor.u32 %v1659_v15, %v1292_v16  ;;  %v2168_v15 = vld [vmem:[%s2355_s0 + $0x130] sm:$0xff] }
  0x21   :  { %862 = vmatmul.bf16.vlgmr.msra.gmra.mxu0 %v1211_v24  ;;  %872 = vmatmul.bf16.vlgmr.msra.gmra.mxu1 %v1283_v25  ;;  %v1728_v24 = vld [vmem:[%s2354_s1 + $0x1a0] sm:$0xff] }
  0x22   :  { %887 = vmatpush.bf16.msrb.mxu1 %v1691_v21  ;;  %986 = vmatpush.bf16.msrb.mxu0 %v1715_v23  ;;  %v1721_v21 = vld [vmem:[%s2354_s1 + $0x168] sm:$0xff]  ;;  %v1735_v23 = vld [vmem:[%s2354_s1 + $0x1d8] sm:$0xff]  ;;  %v1720_v25 = vld [vmem:[%s2354_s1 + $0x160] sm:$0xff] }
  0x23   :  { %920 = vmatpush.bf16.msrb.mxu2 %v1699_v22  ;;  %1085 = vmatpush.bf16.msrb.mxu3 %v1739_v31  ;;  %v1745_v22 = vld [vmem:[%s2354_s1 + $0x228] sm:$0xff]  ;;  %v1262_v31 = vld [vmem:[%s2355_s0 + $0x58] sm:$0xf] }
  0x24   :  { %882 = vmatmul.bf16.vlgmr.msra.gmra.mxu2 %v368_v26  ;;  %961 = vmatmul.bf16.vlgmr.msra.gmra.mxu3 %v1223_v34  ;;  %v1744_v26 = vld [vmem:[%s2354_s1 + $0x220] sm:$0xff]  ;;  %v1719_v34 = vld [vmem:[%s2354_s1 + $0x158] sm:$0xff] }
  0x26   :  { %888 = vmatpush.bf16.msrb.mxu1 %v1690_v30  ;;  %987 = vmatpush.bf16.msrb.mxu0 %v1714_v33  ;;  %v1248_v30 = vld [vmem:[%s2355_s0 + $0x6c] sm:$0xf0]  ;;  %v1727_v33 = vld [vmem:[%s2354_s1 + $0x198] sm:$0xff] }
  0x27   :  { %921 = vmatpush.bf16.msrb.mxu2 %v1698_v32  ;;  %1086 = vmatpush.bf16.msrb.mxu3 %v1738_v36  ;;  %v1655_v32 = vld [vmem:[%s2355_s0 + $0x78] sm:$0xf0]  ;;  %v1251_v36 = vor.u32 %v1649_v29, %v1248_v30  ;;  %v1648_v29 = vld [vmem:[%s2355_s0 + $0x40] sm:$0xf0] }
  0x2a   :  { %889 = vmatpush.bf16.msrb.mxu1 %v1689_v35  ;;  %988 = vmatpush.bf16.msrb.mxu0 %v1713_v38  ;;  %v1255_v35 = vor.u32 %v1654_v28, %v1254_v27  ;;  %v1668_v38 = vld [vmem:[%s2355_s0 + $0xe4] sm:$0xf]  ;;  %v1228_v27 = vld [vmem:[%s2355_s0 + $0x34] sm:$0xf0]  ;;  %v1242_v28 = vld [vmem:[%s2355_s0 + $0x20] sm:$0xf] }
  0x2b   :  { %922 = vmatpush.bf16.msrb.mxu2 %v1697_v37  ;;  %1087 = vmatpush.bf16.msrb.mxu3 %v1737_v57  ;;  %v1263_v37 = vor.u32 %v1655_v32, %v1262_v31  ;;  %v1243_v32 = vor.u32 %v1648_v29, %v1242_v28  ;;  %v61_v28 = vld [vmem:[%s2355_s0 + $0x140] sm:$0xf] }
  0x2e   :  { %890 = vmatpush.bf16.msrb.mxu1 %v1688_v39  ;;  %989 = vmatpush.bf16.msrb.mxu0 %v1712_v41  ;;  %v1328_v39 = vld [vmem:[%s2355_s0 + $0x104] sm:$0xf0]  ;;  %v1743_v41 = vld [vmem:[%s2354_s1 + $0x218] sm:$0xff] }
  0x2f   :  { %923 = vmatpush.bf16.msrb.mxu2 %v1696_v40  ;;  %1088 = vmatpush.bf16.msrb.mxu3 %v1736_v18  ;;  %v1726_v40 = vld [vmem:[%s2354_s1 + $0x190] sm:$0xff]  ;;  %v1331_v42 = vor.u32 %v1668_v38, %v1328_v39  ;;  %v327_v18 = vunpack.c.l.b16 %v2168_v15  ;;  %v1651_v38 = vld [vmem:[%s2355_s0 + $0x5c] sm:$0xf]  ;;  %v1264_v39 = vld [vmem:[%s2355_s0 + $0x7c] sm:$0xf0] }
  0x31   :  { %867 = vmatmul.bf16.gmra.mxu0 %v1247_v49  ;;  %877 = vmatmul.bf16.gmra.mxu1 %v1319_v50  ;;  %v1663_v49 = vld [vmem:[%s2355_s0 + $0xb8] sm:$0xf0]  ;;  %v1658_v50 = vld [vmem:[%s2355_s0 + $0x94] sm:$0xf] }
  0x32   :  { %891 = vmatpush.bf16.msrb.mxu1 %v1687_v46  ;;  %990 = vmatpush.bf16.msrb.mxu0 %v1711_v48  ;;  %v1742_v46 = vld [vmem:[%s2354_s1 + $0x210] sm:$0xff]  ;;  %v1290_v48 = vld [vmem:[%s2355_s0 + $0x98] sm:$0xf] }
  0x33   :  { %924 = vmatpush.bf16.msrb.mxu2 %v1695_v47  ;;  %1089 = vmatpush.bf16.msrb.mxu3 %v1735_v23  ;;  %v1733_v47 = vld [vmem:[%s2354_s1 + $0x1c8] sm:$0xff] }
  0x34   :  { %966 = vmatmul.bf16.gmra.mxu3 %v1259_v56  ;;  %v1287_v56 = vor.u32 %v1658_v50, %v1284_v51  ;;  %v1272_v23 = vld [vmem:[%s2355_s0 + $0x84] sm:$0xf0] }
  0x36   :  { %892 = vmatpush.bf16.msrb.mxu1 %v1686_v53  ;;  %991 = vmatpush.bf16.msrb.mxu0 %v1710_v55  ;;  %v1664_v53 = vld [vmem:[%s2355_s0 + $0xc0] sm:$0xf0]  ;;  %v1291_v55 = vor.u32 %v1663_v49, %v1290_v48  ;;  %v1344_v48 = vld [vmem:[%s2355_s0 + $0x114] sm:$0xf0] }
  0x37   :  { %925 = vmatpush.bf16.msrb.mxu2 %v1694_v54  ;;  %1090 = vmatpush.bf16.msrb.mxu3 %v1734_v43  ;;  %v58_v54 = vld [vmem:[%s2355_s0 + $0x128] sm:$0xff]  ;;  %v1299_v57 = vor.u32 %v1664_v53, %v1298_v52  ;;  %v1267_v43 = vor.u32 %v1651_v38, %v1264_v39 }
  0x38   :  { %v325_v16 = vunpack.c.l.b16 %v58_v54  ;;  %v1306_v53 = vld [vmem:[%s2355_s0 + $0xa8] sm:$0xf] }
  0x3a   :  { %893 = vmatpush.bf16.msrb.mxu1 %v1685_v58  ;;  %992 = vmatpush.bf16.msrb.mxu0 %v1709_v60  ;;  %v326_v58 = vunpack.c.h.b16 %v58_v54  ;;  %v1665_v54 = vld [vmem:[%s2355_s0 + $0xc8] sm:$0xf0] }
  0x3b   :  { %926 = vmatpush.bf16.msrb.mxu2 %v1693_v59  ;;  %1091 = vmatpush.bf16.msrb.mxu3 %v1733_v47  ;;  %v1717_v59 = vld [vmem:[%s2354_s1 + $0x148] sm:$0xff]  ;;  %v1670_v47 = vld [vmem:[%s2355_s0 + $0xf4] sm:$0xf] }
  0x3c   :  { %v371_v60 = vpack.c.b16 %v326_v58, %v326_v58  ;;  %v1347_v49 = vor.u32 %v1670_v47, %v1344_v48  ;;  %v1314_v58 = vld [vmem:[%s2355_s0 + $0xb0] sm:$0xf] }
  0x3e   :  { %894 = vmatpush.bf16.msrb.mxu1 %v1684_v62  ;;  %993 = vmatpush.bf16.msrb.mxu0 %v1708_v1  ;;  %v1741_v62 = vld [vmem:[%s2354_s1 + $0x208] sm:$0xff]  ;;  %v1326_v1 = vld [vmem:[%s2355_s0 + $0xe0] sm:$0xf] }
  0x3f   :  { %927 = vmatpush.bf16.msrb.mxu2 %v1692_v61  ;;  %v1724_v61 = vld [vmem:[%s2354_s1 + $0x180] sm:$0xff]  ;;  %1092 = vmatpush.bf16.msrb.mxu3 %v1732_v63 }
  0x41   :  { %895 = vmatmul.bf16.vlgmr.msrb.gmra.mxu1 %v1215_v10  ;;  %994 = vmatmul.bf16.vlgmr.msrb.gmra.mxu0 %v1227_v11  ;;  %v1740_v10 = vld [vmem:[%s2354_s1 + $0x200] sm:$0xff]  ;;  %v1643_v11 = vld [vmem:[%s2355_s0 + $0x1c] sm:$0xf] }
  0x42   :  { %1019 = vmatpush.bf16.msra.mxu1 %v1723_v5  ;;  %1118 = vmatpush.bf16.msra.mxu0 %v1747_v8  ;;  %v1334_v5 = vld [vmem:[%s2355_s0 + $0xe8] sm:$0xf]  ;;  %v1323_v8 = vor.u32 %v1667_v3, %v1320_v4 }
  0x43   :  { %1052 = vmatpush.bf16.msra.mxu2 %v1731_v2  ;;  %v1672_v2 = vld [vmem:[%s2355_s0 + $0x100] sm:$0xf0] }
  0x44   :  { %928 = vmatmul.bf16.vlgmr.msrb.gmra.mxu2 %v1219_v9  ;;  %971 = vmatmul.bf16.gmra.mxu3 %v1295_v19  ;;  %v1327_v7 = vor.u32 %v1672_v2, %v1326_v1  ;;  %v1335_v9 = vor.u32 %v1673_v6, %v1334_v5  ;;  %v370_v19 = vpack.c.b16 %v325_v16, %v325_v16  ;;  %v1675_v16 = vld [vmem:[%s2355_s0 + $0x118] sm:$0xf0] }
  0x46   :  { %1020 = vmatpush.bf16.msra.mxu1 %v1722_v14  ;;  %1119 = vmatpush.bf16.msra.mxu0 %v1746_v17  ;;  %v324_v17 = vunpack.c.h.b16 %v1856_v13  ;;  %v1234_v13 = vld [vmem:[%s2355_s0 + $0x18] sm:$0xf] }
  0x47   :  { %1053 = vmatpush.bf16.msra.mxu2 %v1730_v12  ;;  %v1236_v12 = vld [vmem:[%s2355_s0 + $0x3c] sm:$0xf0] }
  0x48   :  { %v1239_v14 = vor.u32 %v1643_v11, %v1236_v12  ;;  %v1669_v11 = vld [vmem:[%s2355_s0 + $0xec] sm:$0xf]  ;;  %v1336_v12 = vld [vmem:[%s2355_s0 + $0x10c] sm:$0xf0] }
  0x4a   :  { %1021 = vmatpush.bf16.msra.mxu1 %v1721_v21  ;;  %1120 = vmatpush.bf16.msra.mxu0 %v1745_v22  ;;  %v372_v21 = vpack.c.b16 %v327_v18, %v327_v18  ;;  %v1652_v22 = vld [vmem:[%s2355_s0 + $0x64] sm:$0xf]  ;;  %v1339_v18 = vor.u32 %v1669_v11, %v1336_v12 }
  0x4b   :  { %1054 = vmatpush.bf16.msra.mxu2 %v1729_v20  ;;  %v369_v20 = vpack.c.b16 %v324_v17, %v324_v17 }
  0x4e   :  { %1022 = vmatpush.bf16.msra.mxu1 %v1720_v25  ;;  %1121 = vmatpush.bf16.msra.mxu0 %v1744_v26  ;;  %v1647_v25 = vld [vmem:[%s2355_s0 + $0x38] sm:$0xf0]  ;;  %v1642_v26 = vld [vmem:[%s2355_s0 + $0x14] sm:$0xf] }
  0x4f   :  { %1055 = vmatpush.bf16.msra.mxu2 %v1728_v24  ;;  %v1275_v24 = vor.u32 %v1652_v22, %v1272_v23  ;;  %v1235_v30 = vor.u32 %v1647_v25, %v1234_v13  ;;  %v1231_v31 = vor.u32 %v1642_v26, %v1228_v27 }
  0x51   :  { %900 = vmatmul.bf16.gmra.mxu1 %v1251_v36  ;;  %999 = vmatmul.bf16.gmra.mxu0 %v1263_v37  ;;  %v1270_v36 = vld [vmem:[%s2355_s0 + $0x60] sm:$0xf]  ;;  %v1656_v37 = vld [vmem:[%s2355_s0 + $0x80] sm:$0xf0] }
  0x52   :  { %1023 = vmatpush.bf16.msra.mxu1 %v1719_v34  ;;  %1122 = vmatpush.bf16.msra.mxu0 %v1743_v41  ;;  %v1308_v34 = vld [vmem:[%s2355_s0 + $0xcc] sm:$0xf0]  ;;  %v1657_v41 = vld [vmem:[%s2355_s0 + $0x88] sm:$0xf0] }
  0x53   :  { %1056 = vmatpush.bf16.msra.mxu2 %v1727_v33  ;;  %v1661_v33 = vld [vmem:[%s2355_s0 + $0xac] sm:$0xf] }
  0x54   :  { %933 = vmatmul.bf16.gmra.mxu2 %v1255_v35  ;;  %976 = vmatmul.bf16.gmra.mxu3 %v1331_v42  ;;  %v1311_v35 = vor.u32 %v1661_v33, %v1308_v34  ;;  %v1271_v42 = vor.u32 %v1656_v37, %v1270_v36  ;;  %v328_v33 = vunpack.c.h.b16 %v2168_v15  ;;  %v331_v34 = vunpack.c.l.b16 %v61_v28 }
  0x56   :  { %1024 = vmatpush.bf16.msra.mxu1 %v1718_v44  ;;  %1123 = vmatpush.bf16.msra.mxu0 %v1742_v46  ;;  %v373_v39 = vpack.c.b16 %v328_v33, %v328_v33 }
  0x57   :  { %1057 = vmatpush.bf16.msra.mxu2 %v1726_v40  ;;  %v1278_v40 = vld [vmem:[%s2355_s0 + $0x68] sm:$0xf] }
  0x58   :  { %v1279_v44 = vor.u32 %v1657_v41, %v1278_v40  ;;  %v376_v40 = vpack.c.b16 %v331_v34, %v331_v34 }
  0x5a   :  { %1025 = vmatpush.bf16.msra.mxu1 %v1717_v59  ;;  %1124 = vmatpush.bf16.msra.mxu0 %v1741_v62  ;;  %v1666_v59 = vld [vmem:[%s2355_s0 + $0xd0] sm:$0xf0] }
  0x5b   :  { %1058 = vmatpush.bf16.msra.mxu2 %v1725_v45 }
  0x5e   :  { %1026 = vmatpush.bf16.msra.mxu1 %v1716_v0  ;;  %1125 = vmatpush.bf16.msra.mxu0 %v1740_v10  ;;  %v1315_v0 = vor.u32 %v1666_v59, %v1314_v58 }
  0x5f   :  { %1059 = vmatpush.bf16.msra.mxu2 %v1724_v61  ;;  %v1307_v61 = vor.u32 %v1665_v54, %v1306_v53 }
  0x61   :  { %905 = vmatmul.bf16.gmra.mxu1 %v1287_v56  ;;  %1004 = vmatmul.bf16.gmra.mxu0 %v1299_v57  ;;  %v1660_v56 = vld [vmem:[%s2355_s0 + $0xa4] sm:$0xf]  ;;  %v1300_v57 = vld [vmem:[%s2355_s0 + $0xc4] sm:$0xf0] }
  0x62   :  { %v1303_v63 = vor.u32 %v1660_v56, %v1300_v57 }
  0x64   :  { %938 = vmatmul.bf16.gmra.mxu2 %v1291_v55  ;;  %981 = vmatmul.bf16.gmra.mxu3 %v371_v60  ;;  %v60_v60 = vld [vmem:[%s2355_s0 + $0x138] sm:$0xff] }
  0x65   :  { %v330_v1 = vunpack.c.h.b16 %v60_v60 }
  0x67   :  { %v375_v5 = vpack.c.b16 %v330_v1, %v330_v1 }
  0x71   :  { %910 = vmatmul.bf16.gmra.mxu1 %v1323_v8  ;;  %1009 = vmatmul.bf16.gmra.mxu0 %v1335_v9  ;;  %v1342_v8 = vld [vmem:[%s2355_s0 + $0xf0] sm:$0xf]  ;;  %v1674_v9 = vld [vmem:[%s2355_s0 + $0x110] sm:$0xf0] }
  0x72   :  { %v1343_v17 = vor.u32 %v1674_v9, %v1342_v8 }
  0x74   :  { %943 = vmatmul.bf16.gmra.mxu2 %v1327_v7  ;;  %1093 = vmatmul.bf16.vlgmr.msrb.gmra.mxu3 %v1239_v14  ;;  %v1350_v14 = vld [vmem:[%s2355_s0 + $0xf8] sm:$0xf] }
  0x81   :  { %915 = vmatmul.bf16.gmra.mxu1 %v369_v20  ;;  %1014 = vmatmul.bf16.gmra.mxu0 %v372_v21 }
  0x84   :  { %948 = vmatmul.bf16.gmra.mxu2 %v370_v19  ;;  %1098 = vmatmul.bf16.gmra.mxu3 %v1275_v24  ;;  %v1351_v19 = vor.u32 %v1675_v16, %v1350_v14 }
  0x91   :  { %1027 = vmatmul.bf16.vlgmr.msra.gmra.mxu1 %v1231_v31  ;;  %1126 = vmatmul.bf16.vlgmr.msra.gmra.mxu0 %v1243_v32 }
  0x94   :  { %1060 = vmatmul.bf16.vlgmr.msra.gmra.mxu2 %v1235_v30  ;;  %1103 = vmatmul.bf16.gmra.mxu3 %v1311_v35  ;;  %v329_v30 = vunpack.c.l.b16 %v60_v60 }
  0x96   :  { %v374_v37 = vpack.c.b16 %v329_v30, %v329_v30 }
  0x9e   :  { %v863_v45 = vpop.f32.mrf.mxu0  ;;  %v2220_v46 = vpop.f32.mrf.mxu1 }
  0xa1   :  { %1032 = vmatmul.bf16.gmra.mxu1 %v1267_v43  ;;  %1131 = vmatmul.bf16.gmra.mxu0 %v1279_v44 }
  0xa4   :  { %1065 = vmatmul.bf16.gmra.mxu2 %v1271_v42  ;;  %1108 = vmatmul.bf16.gmra.mxu3 %v1347_v49 }
  0xa6   :  { %v865_v51 = vpop.f32.mrf.mxu0  ;;  %v2230_v52 = vpop.f32.mrf.mxu1 }
  0xa7   :  { %v2228_v50 = vpop.f32.mrf.mxu2  ;;  %v962_v55 = vpop.f32.mrf.mxu3 }
  0xae   :  { %v868_v2 = vpop.f32.mrf.mxu0  ;;  %v2253_v3 = vpop.f32.mrf.mxu1 }
  0xaf   :  { %v885_v62 = vpop.f32.mrf.mxu2  ;;  %v964_v4 = vpop.f32.mrf.mxu3 }
  0xb1   :  { %1037 = vmatmul.bf16.gmra.mxu1 %v1303_v63  ;;  %1136 = vmatmul.bf16.gmra.mxu0 %v1315_v0 }
  0xb4   :  { %1070 = vmatmul.bf16.gmra.mxu2 %v1307_v61  ;;  %1113 = vmatmul.bf16.gmra.mxu3 %v375_v5 }
  0xb6   :  { %v870_v6 = vpop.f32.mrf.mxu0  ;;  %v2255_v7 = vpop.f32.mrf.mxu1 }
  0xb7   :  { %v967_v10 = vpop.f32.mrf.mxu3 }
  0xbe   :  { %v896_v20 = vpop.f32.mrf.mxu1  ;;  %v995_v21 = vpop.f32.mrf.mxu0 }
  0xbf   :  { %v897_v22 = vadd.f32 %v896_v20, %v863_v45  ;;  %v969_v23 = vpop.f32.mrf.mxu3 }
  0xc1   :  { %1042 = vmatmul.bf16.gmra.mxu1 %v1339_v18  ;;  %1141 = vmatmul.bf16.gmra.mxu0 %v1351_v19 }
  0xc4   :  { %1075 = vmatmul.bf16.gmra.mxu2 %v1343_v17 }
  0xc6   :  { %v898_v26 = vpop.f32.mrf.mxu1  ;;  %v997_v27 = vpop.f32.mrf.mxu0 }
  0xc7   :  { %v929_v24 = vpop.f32.mrf.mxu2  ;;  %v899_v29 = vadd.f32 %v898_v26, %v865_v51  ;;  %v972_v32 = vpop.f32.mrf.mxu3 }
  0xc8   :  { %v930_v13 = vadd.f32 %v929_v24, %v897_v22 }
  0xca   :  { %v963_v25 = vadd.f32 %v962_v55, %v930_v13 }
  0xcc   :  { %v2278_v31 = vadd.f32 %v995_v21, %v963_v25 }
  0xce   :  { %v901_v41 = vpop.f32.mrf.mxu1  ;;  %v1000_v42 = vpop.f32.mrf.mxu0 }
  0xcf   :  { %v931_v35 = vpop.f32.mrf.mxu2  ;;  %v902_v43 = vadd.f32 %v901_v41, %v868_v2  ;;  %v974_v45 = vpop.f32.mrf.mxu3 }
  0xd0   :  { %v932_v36 = vadd.f32 %v931_v35, %v899_v29 }
  0xd1   :  { %1047 = vmatmul.bf16.gmra.mxu1 %v373_v39  ;;  %1146 = vmatmul.bf16.gmra.mxu0 %v376_v40 }
  0xd2   :  { %v965_v38 = vadd.f32 %v964_v4, %v932_v36 }
  0xd4   :  { %1080 = vmatmul.bf16.gmra.mxu2 %v374_v37  ;;  %v2281_v44 = vadd.f32 %v997_v27, %v965_v38 }
  0xd6   :  { %v903_v15 = vpop.f32.mrf.mxu1  ;;  %v1002_v51 = vpop.f32.mrf.mxu0 }
  0xd7   :  { %v934_v47 = vpop.f32.mrf.mxu2  ;;  %v904_v53 = vadd.f32 %v903_v15, %v870_v6  ;;  %v977_v55 = vpop.f32.mrf.mxu3 }
  0xd8   :  { %v935_v48 = vadd.f32 %v934_v47, %v902_v43 }
  0xda   :  { %v968_v49 = vadd.f32 %v967_v10, %v935_v48 }
  0xdc   :  { %v2283_v54 = vadd.f32 %v1000_v42, %v968_v49 }
  0xde   :  { %v906_v59 = vpop.f32.mrf.mxu1  ;;  %v1005_v60 = vpop.f32.mrf.mxu0 }
  0xdf   :  { %v936_v56 = vpop.f32.mrf.mxu2  ;;  %v907_v61 = vadd.f32 %v906_v59, %v2220_v46  ;;  %v979_v63 = vpop.f32.mrf.mxu3 }
  0xe0   :  { %v937_v57 = vadd.f32 %v936_v56, %v904_v53 }
  0xe2   :  { %v970_v58 = vadd.f32 %v969_v23, %v937_v57 }
  0xe4   :  { %v2286_v62 = vadd.f32 %v1002_v51, %v970_v58 }
  0xe6   :  { %v908_v4 = vpop.f32.mrf.mxu1  ;;  %v1007_v5 = vpop.f32.mrf.mxu0 }
  0xe7   :  { %v939_v0 = vpop.f32.mrf.mxu2  ;;  %v909_v6 = vadd.f32 %v908_v4, %v2230_v52  ;;  %v982_v9 = vpop.f32.mrf.mxu3 }
  0xe8   :  { %v940_v1 = vadd.f32 %v939_v0, %v907_v61 }
  0xea   :  { %v973_v2 = vadd.f32 %v972_v32, %v940_v1 }
  0xec   :  { %v2289_v8 = vadd.f32 %v1005_v60, %v973_v2 }
  0xee   :  { %v911_v14 = vpop.f32.mrf.mxu1  ;;  %v1010_v16 = vpop.f32.mrf.mxu0 }
  0xef   :  { %v941_v10 = vpop.f32.mrf.mxu2  ;;  %v912_v46 = vadd.f32 %v911_v14, %v2253_v3  ;;  %v984_v18 = vpop.f32.mrf.mxu3 }
  0xf0   :  { %v942_v11 = vadd.f32 %v941_v10, %v909_v6 }
  0xf2   :  { %v975_v12 = vadd.f32 %v974_v45, %v942_v11 }
  0xf4   :  { %v2292_v17 = vadd.f32 %v1007_v5, %v975_v12 }
  0xf6   :  { %v913_v22 = vpop.f32.mrf.mxu1  ;;  %v1012_v23 = vpop.f32.mrf.mxu0 }
  0xf7   :  { %v944_v19 = vpop.f32.mrf.mxu2  ;;  %v914_v52 = vadd.f32 %v913_v22, %v2255_v7  ;;  %v1094_v13 = vpop.f32.mrf.mxu3 }
  0xf8   :  { %v945_v20 = vadd.f32 %v944_v19, %v912_v46 }
  0xfa   :  { %v978_v21 = vadd.f32 %v977_v55, %v945_v20  ;;  %v2307_v55 = vld [vmem:[%s2356_s2] ss:$0 sm:$0xff] }
  0xfc   :  { %v2295_v24 = vadd.f32 %v1010_v16, %v978_v21 }
  0xfe   :  { %v916_v28 = vpop.f32.mrf.mxu1  ;;  %v1015_v29 = vpop.f32.mrf.mxu0 }
  0xff   :  { %v946_v25 = vpop.f32.mrf.mxu2  ;;  %v917_v3 = vadd.f32 %v916_v28, %v2228_v50  ;;  %v1096_v32 = vpop.f32.mrf.mxu3 }
 0x100   :  { %v947_v26 = vadd.f32 %v946_v25, %v914_v52 }
 0x102   :  { %v980_v27 = vadd.f32 %v979_v63, %v947_v26 }
 0x104   :  { %v2298_v30 = vadd.f32 %v1012_v23, %v980_v27 }
 0x106   :  { %v918_v36 = vpop.f32.mrf.mxu1  ;;  %v1017_v37 = vpop.f32.mrf.mxu0 }
 0x107   :  { %v949_v33 = vpop.f32.mrf.mxu2  ;;  %v1099_v7 = vpop.f32.mrf.mxu3 }
 0x108   :  { %v950_v34 = vadd.f32 %v949_v33, %v917_v3 }
 0x10a   :  { %v983_v35 = vadd.f32 %v982_v9, %v950_v34 }
 0x10c   :  { %v2300_v38 = vadd.f32 %v1015_v29, %v983_v35 }
 0x10e   :  { %v1028_v40 = vpop.f32.mrf.mxu1  ;;  %v1127_v41 = vpop.f32.mrf.mxu0 }
 0x10f   :  { %v951_v39 = vpop.f32.mrf.mxu2  ;;  %v1029_v42 = vadd.f32 %v1028_v40, %v2278_v31  ;;  %v1101_v43 = vpop.f32.mrf.mxu3  ;;  %v2313_v31 = vld [vmem:[%s2357_s3] ss:$0 sm:$0xff] }
 0x116   :  { %v1030_v48 = vpop.f32.mrf.mxu1  ;;  %v1129_v49 = vpop.f32.mrf.mxu0 }
 0x117   :  { %v1061_v45 = vpop.f32.mrf.mxu2  ;;  %v1031_v15 = vadd.f32 %v1030_v48, %v2281_v44  ;;  %v1104_v51 = vpop.f32.mrf.mxu3 }
 0x118   :  { %v1062_v47 = vadd.f32 %v1061_v45, %v1029_v42 }
 0x11a   :  { %v1095_v50 = vadd.f32 %v1094_v13, %v1062_v47 }
 0x11c   :  { %v1128_v53 = vadd.f32 %v1127_v41, %v1095_v50 }
 0x11e   :  { %v1155_v58 = vmul.f32 %v2307_v55, %v1128_v53  ;;  %v1033_v60 = vpop.f32.mrf.mxu1  ;;  %v1132_v61 = vpop.f32.mrf.mxu0 }
 0x11f   :  { %v1063_v56 = vpop.f32.mrf.mxu2  ;;  %v1034_v63 = vadd.f32 %v1033_v60, %v2283_v54  ;;  %v1106_v0 = vpop.f32.mrf.mxu3 }
 0x120   :  { %v1064_v57 = vadd.f32 %v1063_v56, %v1031_v15  ;;  %v1168_v1 = vadd.f32 %v2313_v31, %v1155_v58 }
 0x122   :  { %v1097_v59 = vadd.f32 %v1096_v32, %v1064_v57  ;;  %v1177_v9 = vmax.f32 %v1168_v1, 0.0 }
 0x124   :  { %v1130_v44 = vadd.f32 %v1129_v49, %v1097_v59 }
 0x126   :  { %v1156_v2 = vmul.f32 %v2307_v55, %v1130_v44  ;;  %v1035_v12 = vpop.f32.mrf.mxu1  ;;  %v1134_v14 = vpop.f32.mrf.mxu0 }
 0x127   :  { %v1066_v4 = vpop.f32.mrf.mxu2  ;;  %v1036_v46 = vadd.f32 %v1035_v12, %v2286_v62  ;;  %v1109_v18 = vpop.f32.mrf.mxu3 }
 0x128   :  { %v1169_v5 = vadd.f32 %v2313_v31, %v1156_v2  ;;  %v1067_v6 = vadd.f32 %v1066_v4, %v1034_v63 }
 0x12a   :  { %v1178_v10 = vmax.f32 %v1169_v5, 0.0  ;;  %v1100_v11 = vadd.f32 %v1099_v7, %v1067_v6 }
 0x12c   :  { %v1751_v16 = vpack.c.bf16 %v1178_v10, %v1177_v9  ;;  %v1133_v54 = vadd.f32 %v1132_v61, %v1100_v11 }
 0x12e   :  { %1752 = vst [vmem:[%s2358_s4] sm:$0xff] %v1751_v16   ;;  %v1157_v21 = vmul.f32 %v2307_v55, %v1133_v54  ;;  %v1038_v23 = vpop.f32.mrf.mxu1  ;;  %v1137_v52 = vpop.f32.mrf.mxu0 }
 0x12f   :  { %v1068_v19 = vpop.f32.mrf.mxu2  ;;  %v1039_v25 = vadd.f32 %v1038_v23, %v2289_v8  ;;  %v1111_v26 = vpop.f32.mrf.mxu3 }
 0x130   :  { %v1069_v20 = vadd.f32 %v1068_v19, %v1036_v46  ;;  %v1170_v27 = vadd.f32 %v2313_v31, %v1157_v21 }
 0x132   :  { %v1102_v22 = vadd.f32 %v1101_v43, %v1069_v20  ;;  %v1179_v32 = vmax.f32 %v1170_v27, 0.0 }
 0x134   :  { %v1135_v13 = vadd.f32 %v1134_v14, %v1102_v22 }
 0x136   :  { %v1158_v62 = vmul.f32 %v2307_v55, %v1135_v13  ;;  %v1040_v35 = vpop.f32.mrf.mxu1  ;;  %v1139_v36 = vpop.f32.mrf.mxu0 }
 0x137   :  { %v1071_v28 = vpop.f32.mrf.mxu2  ;;  %v1041_v7 = vadd.f32 %v1040_v35, %v2292_v17  ;;  %v1114_v39 = vpop.f32.mrf.mxu3 }
 0x138   :  { %v1171_v29 = vadd.f32 %v2313_v31, %v1158_v62  ;;  %v1072_v3 = vadd.f32 %v1071_v28, %v1039_v25 }
 0x13a   :  { %v1180_v33 = vmax.f32 %v1171_v29, 0.0  ;;  %v1105_v34 = vadd.f32 %v1104_v51, %v1072_v3 }
 0x13c   :  { %v1756_v37 = vpack.c.bf16 %v1180_v33, %v1179_v32  ;;  %v1138_v8 = vadd.f32 %v1137_v52, %v1105_v34 }
 0x13e   :  { %1768 = vst [vmem:[%s2358_s4 + $0x8] sm:$0xff] %v1756_v37   ;;  %v1159_v42 = vmul.f32 %v2307_v55, %v1138_v8  ;;  %v1043_v45 = vpop.f32.mrf.mxu1  ;;  %v1142_v47 = vpop.f32.mrf.mxu0 }
 0x13f   :  { %v1073_v40 = vpop.f32.mrf.mxu2  ;;  %v1044_v48 = vadd.f32 %v1043_v45, %v2295_v24  ;;  %v1116_v49 = vpop.f32.mrf.mxu3 }
 0x140   :  { %v1074_v41 = vadd.f32 %v1073_v40, %v1041_v7  ;;  %v1172_v15 = vadd.f32 %v2313_v31, %v1159_v42 }
 0x142   :  { %v1107_v43 = vadd.f32 %v1106_v0, %v1074_v41  ;;  %v1181_v57 = vmax.f32 %v1172_v15, 0.0 }
 0x144   :  { %v1140_v50 = vadd.f32 %v1139_v36, %v1107_v43 }
 0x146   :  { %v1160_v17 = vmul.f32 %v2307_v55, %v1140_v50  ;;  %v1045_v60 = vpop.f32.mrf.mxu1  ;;  %v1144_v61 = vpop.f32.mrf.mxu0 }
 0x147   :  { %v1076_v51 = vpop.f32.mrf.mxu2  ;;  %v1046_v63 = vadd.f32 %v1045_v60, %v2298_v30 }
 0x148   :  { %v1173_v53 = vadd.f32 %v2313_v31, %v1160_v17  ;;  %v1077_v56 = vadd.f32 %v1076_v51, %v1044_v48 }
 0x14a   :  { %v1182_v58 = vmax.f32 %v1173_v53, 0.0  ;;  %v1110_v59 = vadd.f32 %v1109_v18, %v1077_v56 }
 0x14c   :  { %v1761_v44 = vpack.c.bf16 %v1182_v58, %v1181_v57  ;;  %v1143_v24 = vadd.f32 %v1142_v47, %v1110_v59 }
 0x14e   :  { %1769 = vst [vmem:[%s2358_s4 + $0x10] sm:$0xff] %v1761_v44   ;;  %v1161_v2 = vmul.f32 %v2307_v55, %v1143_v24  ;;  %v1048_v5 = vpop.f32.mrf.mxu1  ;;  %v1147_v6 = vpop.f32.mrf.mxu0 }
 0x14f   :  { %v1078_v0 = vpop.f32.mrf.mxu2  ;;  %v1049_v10 = vadd.f32 %v1048_v5, %v2300_v38 }
 0x150   :  { %v1079_v1 = vadd.f32 %v1078_v0, %v1046_v63  ;;  %v1174_v11 = vadd.f32 %v2313_v31, %v1161_v2 }
 0x152   :  { %v1112_v4 = vadd.f32 %v1111_v26, %v1079_v1  ;;  %v1183_v46 = vmax.f32 %v1174_v11, 0.0 }
 0x154   :  { %v1145_v9 = vadd.f32 %v1144_v61, %v1112_v4 }
 0x156   :  { %v1162_v12 = vmul.f32 %v2307_v55, %v1145_v9  ;;  %v1050_v19 = vpop.f32.mrf.mxu1  ;;  %v1149_v20 = vpop.f32.mrf.mxu0 }
 0x157   :  { %v1081_v30 = vpop.f32.mrf.mxu2 }
 0x158   :  { %v1175_v14 = vadd.f32 %v2313_v31, %v1162_v12  ;;  %v1082_v16 = vadd.f32 %v1081_v30, %v1049_v10 }
 0x15a   :  { %v1184_v18 = vmax.f32 %v1175_v14, 0.0  ;;  %v1115_v54 = vadd.f32 %v1114_v39, %v1082_v16 }
 0x15c   :  { %v1766_v21 = vpack.c.bf16 %v1184_v18, %v1183_v46  ;;  %v1148_v22 = vadd.f32 %v1147_v6, %v1115_v54 }
 0x15e   :  { %1770 = vst [vmem:[%s2358_s4 + $0x18] sm:$0xff] %v1766_v21   ;;  %v1163_v38 = vmul.f32 %v2307_v55, %v1148_v22 }
 0x15f   :  { %v1083_v23 = vpop.f32.mrf.mxu2 }
 0x160   :  { %v1176_v52 = vadd.f32 %v2313_v31, %v1163_v38 }
 0x162   :  { %v1185_v13 = vmax.f32 %v1176_v52, 0.0 }
 0x164   :  { %v1194_v25 = vpack.c.bf16 %v1185_v13, %v1185_v13 }
 0x166   :  { %1203 = vst [vmem:[%s2358_s4 + $0x20] sm:$0xf] %v1194_v25 }

// kernel: model_forward.10
= control target key start
LH: loop header
LB: loop body
LE: loop exit
PB: predicated region body
PF: predicated region fallthrough
CT: control target
= control target key end

     0   :  { %s2688_s1 = inlined_call_operand.vmem [shape: bf16[1152,128], index: 1, kind: input, shape index: {}]   ;;  %s2689_s0 = inlined_call_operand.vmem [shape: bf16[72,1152], index: 0, kind: input, shape index: {}]   ;;  %s2690_s5 = inlined_call_operand.vmem [shape: bf16[128,128], index: 5, kind: input, shape index: {}]   ;;  %s2691_s4 = inlined_call_operand.vmem [shape: bf16[72,128], index: 4, kind: input, shape index: {}]   ;;  %s2692_s2 = inlined_call_operand.vmem [shape: f32[1,128], index: 2, kind: input, shape index: {}]   ;;  %s2693_s3 = inlined_call_operand.vmem [shape: f32[1,128], index: 3, kind: input, shape index: {}]   ;;  %s2694_s6 = inlined_call_operand.vmem [shape: f32[1,128], index: 6, kind: input, shape index: {}]   ;;  %s2695_s7 = inlined_call_operand.vmem [shape: f32[1,128], index: 7, kind: input, shape index: {}]   ;;  %s2696_s8 = inlined_call_operand.vmem [shape: bf16[72,128], index: 8, kind: output, shape index: {}]  }
   0x1   :  { %v1912_v0 = vld [vmem:[%s2688_s1 + $0x38] sm:$0xff]  ;;  %v1911_v2 = vld [vmem:[%s2688_s1 + $0x30] sm:$0xff]  ;;  %v1910_v4 = vld [vmem:[%s2688_s1 + $0x28] sm:$0xff] }
   0x2   :  { %v1920_v1 = vld [vmem:[%s2688_s1 + $0x78] sm:$0xff]  ;;  %2012 = vmatpush.bf16.msra.mxu2 %v1912_v0  ;;  %v1919_v3 = vld [vmem:[%s2688_s1 + $0x70] sm:$0xff]  ;;  %866 = vmatpush.bf16.msra.mxu0 %v1912_v0  ;;  %v1918_v5 = vld [vmem:[%s2688_s1 + $0x68] sm:$0xff] }
   0x3   :  { %2020 = vmatpush.bf16.msra.mxu3 %v1920_v1  ;;  %899 = vmatpush.bf16.msra.mxu1 %v1920_v1  ;;  %v1909_v6 = vld [vmem:[%s2688_s1 + $0x20] sm:$0xff]  ;;  %v1908_v8 = vld [vmem:[%s2688_s1 + $0x18] sm:$0xff]  ;;  %v1907_v10 = vld [vmem:[%s2688_s1 + $0x10] sm:$0xff] }
   0x4   :  { %v1917_v7 = vld [vmem:[%s2688_s1 + $0x60] sm:$0xff]  ;;  %v1916_v9 = vld [vmem:[%s2688_s1 + $0x58] sm:$0xff]  ;;  %v1915_v11 = vld [vmem:[%s2688_s1 + $0x50] sm:$0xff] }
   0x5   :  { %v1906_v12 = vld [vmem:[%s2688_s1 + $0x8] sm:$0xff]  ;;  %v1905_v14 = vld [vmem:[%s2688_s1] sm:$0xff]  ;;  %v1463_v16 = vld [vmem:[%s2689_s0 + $0x90] sm:$0xf] }
   0x6   :  { %2013 = vmatpush.bf16.msra.mxu2 %v1911_v2  ;;  %867 = vmatpush.bf16.msra.mxu0 %v1911_v2  ;;  %v1914_v13 = vld [vmem:[%s2688_s1 + $0x48] sm:$0xff]  ;;  %v1913_v15 = vld [vmem:[%s2688_s1 + $0x40] sm:$0xff]  ;;  %v1891_v17 = vld [vmem:[%s2689_s0 + $0xb0] sm:$0xf0] }
   0x7   :  { %2021 = vmatpush.bf16.msra.mxu3 %v1919_v3  ;;  %900 = vmatpush.bf16.msra.mxu1 %v1919_v3  ;;  %v1887_v18 = vld [vmem:[%s2689_s0 + $0x94] sm:$0xf]  ;;  %v1465_v19 = vld [vmem:[%s2689_s0 + $0xb4] sm:$0xf0]  ;;  %v1391_v22 = vld [vmem:[%s2689_s0] sm:$0xf]  ;;  %v1464_v23 = vor.u32 %v1891_v17, %v1463_v16 }
   0x8   :  { %v1928_v20 = vld [vmem:[%s2688_s1 + $0xb8] sm:$0xff]  ;;  %v1468_v24 = vor.u32 %v1887_v18, %v1465_v19  ;;  %v1873_v25 = vld [vmem:[%s2689_s0 + $0x20] sm:$0xf0]  ;;  %v1393_v27 = vld [vmem:[%s2689_s0 + $0x24] sm:$0xf0] }
   0x9   :  { %v1936_v21 = vld [vmem:[%s2688_s1 + $0xf8] sm:$0xff]  ;;  %v1869_v26 = vld [vmem:[%s2689_s0 + $0x4] sm:$0xf]  ;;  %v1927_v30 = vld [vmem:[%s2688_s1 + $0xb0] sm:$0xff]  ;;  %v1392_v32 = vor.u32 %v1873_v25, %v1391_v22 }
   0xa   :  { %2014 = vmatpush.bf16.msra.mxu2 %v1910_v4  ;;  %868 = vmatpush.bf16.msra.mxu0 %v1910_v4  ;;  %v1944_v28 = vld [vmem:[%s2688_s1 + $0x138] sm:$0xff]  ;;  %v1935_v31 = vld [vmem:[%s2688_s1 + $0xf0] sm:$0xff]  ;;  %v1396_v33 = vor.u32 %v1869_v26, %v1393_v27  ;;  %v1926_v36 = vld [vmem:[%s2688_s1 + $0xa8] sm:$0xff] }
   0xb   :  { %2022 = vmatpush.bf16.msra.mxu3 %v1918_v5  ;;  %901 = vmatpush.bf16.msra.mxu1 %v1918_v5  ;;  %v1952_v29 = vld [vmem:[%s2688_s1 + $0x178] sm:$0xff]  ;;  %v1943_v34 = vld [vmem:[%s2688_s1 + $0x130] sm:$0xff]  ;;  %v1934_v37 = vld [vmem:[%s2688_s1 + $0xe8] sm:$0xff] }
   0xc   :  { %v1951_v35 = vld [vmem:[%s2688_s1 + $0x170] sm:$0xff]  ;;  %v1942_v38 = vld [vmem:[%s2688_s1 + $0x128] sm:$0xff]  ;;  %v1925_v40 = vld [vmem:[%s2688_s1 + $0xa0] sm:$0xff] }
   0xd   :  { %v1950_v39 = vld [vmem:[%s2688_s1 + $0x168] sm:$0xff]  ;;  %v1933_v41 = vld [vmem:[%s2688_s1 + $0xe0] sm:$0xff]  ;;  %v1499_v42 = vld [vmem:[%s2689_s0 + $0xd8] sm:$0xf] }
   0xe   :  { %2015 = vmatpush.bf16.msra.mxu2 %v1909_v6  ;;  %869 = vmatpush.bf16.msra.mxu0 %v1909_v6  ;;  %v1900_v43 = vld [vmem:[%s2689_s0 + $0xf8] sm:$0xf0]  ;;  %v1501_v45 = vld [vmem:[%s2689_s0 + $0xfc] sm:$0xf0]  ;;  %v1427_v50 = vld [vmem:[%s2689_s0 + $0x48] sm:$0xf] }
   0xf   :  { %2023 = vmatpush.bf16.msra.mxu3 %v1917_v7  ;;  %902 = vmatpush.bf16.msra.mxu1 %v1917_v7  ;;  %v1896_v44 = vld [vmem:[%s2689_s0 + $0xdc] sm:$0xf]  ;;  %v1941_v46 = vld [vmem:[%s2688_s1 + $0x120] sm:$0xff]  ;;  %v1500_v51 = vor.u32 %v1900_v43, %v1499_v42  ;;  %v1882_v53 = vld [vmem:[%s2689_s0 + $0x68] sm:$0xf0] }
  0x10   :  { %v1949_v47 = vld [vmem:[%s2688_s1 + $0x160] sm:$0xff]  ;;  %v1924_v48 = vld [vmem:[%s2688_s1 + $0x98] sm:$0xff]  ;;  %v1504_v52 = vor.u32 %v1896_v44, %v1501_v45  ;;  %v1878_v54 = vld [vmem:[%s2689_s0 + $0x4c] sm:$0xf]  ;;  %v1428_v60 = vor.u32 %v1882_v53, %v1427_v50 }
  0x11   :  { %v1932_v49 = vld [vmem:[%s2688_s1 + $0xd8] sm:$0xff]  ;;  %v1429_v55 = vld [vmem:[%s2689_s0 + $0x6c] sm:$0xf0]  ;;  %v1922_v0 = vld [vmem:[%s2688_s1 + $0x88] sm:$0xff] }
  0x12   :  { %2016 = vmatpush.bf16.msra.mxu2 %v1908_v8  ;;  %870 = vmatpush.bf16.msra.mxu0 %v1908_v8  ;;  %v1940_v56 = vld [vmem:[%s2688_s1 + $0x118] sm:$0xff]  ;;  %v1923_v58 = vld [vmem:[%s2688_s1 + $0x90] sm:$0xff]  ;;  %v1432_v61 = vor.u32 %v1878_v54, %v1429_v55  ;;  %v1930_v1 = vld [vmem:[%s2688_s1 + $0xc8] sm:$0xff] }
  0x13   :  { %2024 = vmatpush.bf16.msra.mxu3 %v1916_v9  ;;  %903 = vmatpush.bf16.msra.mxu1 %v1916_v9  ;;  %v1948_v57 = vld [vmem:[%s2688_s1 + $0x158] sm:$0xff]  ;;  %v1931_v59 = vld [vmem:[%s2688_s1 + $0xd0] sm:$0xff]  ;;  %v69_v2 = vld [vmem:[%s2689_s0 + $0x120] sm:$0xff] }
  0x14   :  { %v1939_v62 = vld [vmem:[%s2688_s1 + $0x110] sm:$0xff]  ;;  %v1938_v3 = vld [vmem:[%s2688_s1 + $0x108] sm:$0xff]  ;;  %v1921_v5 = vld [vmem:[%s2688_s1 + $0x80] sm:$0xff]  ;;  %v335_v9 = vunpack.c.l.b16 %v69_v2 }
  0x15   :  { %v1947_v63 = vld [vmem:[%s2688_s1 + $0x150] sm:$0xff]  ;;  %v1946_v4 = vld [vmem:[%s2688_s1 + $0x148] sm:$0xff]  ;;  %v1929_v6 = vld [vmem:[%s2688_s1 + $0xc0] sm:$0xff] }
  0x16   :  { %2017 = vmatpush.bf16.msra.mxu2 %v1907_v10  ;;  %871 = vmatpush.bf16.msra.mxu0 %v1907_v10  ;;  %v1960_v7 = vld [vmem:[%s2688_s1 + $0x1b8] sm:$0xff]  ;;  %v336_v10 = vunpack.c.h.b16 %v69_v2  ;;  %v1959_v16 = vld [vmem:[%s2688_s1 + $0x1b0] sm:$0xff]  ;;  %v380_v18 = vpack.c.b16 %v335_v9, %v335_v9  ;;  %v1958_v25 = vld [vmem:[%s2688_s1 + $0x1a8] sm:$0xff] }
  0x17   :  { %2025 = vmatpush.bf16.msra.mxu3 %v1915_v11  ;;  %904 = vmatpush.bf16.msra.mxu1 %v1915_v11  ;;  %v1968_v8 = vld [vmem:[%s2688_s1 + $0x1f8] sm:$0xff]  ;;  %v1937_v11 = vld [vmem:[%s2688_s1 + $0x100] sm:$0xff]  ;;  %v1967_v17 = vld [vmem:[%s2688_s1 + $0x1f0] sm:$0xff] }
  0x18   :  { %v381_v19 = vpack.c.b16 %v336_v10, %v336_v10  ;;  %v1409_v22 = vld [vmem:[%s2689_s0 + $0x34] sm:$0xf0]  ;;  %v1975_v26 = vld [vmem:[%s2688_s1 + $0x230] sm:$0xff]  ;;  %v1966_v27 = vld [vmem:[%s2688_s1 + $0x1e8] sm:$0xff] }
  0x19   :  { %v1965_v43 = vld [vmem:[%s2688_s1 + $0x1e0] sm:$0xff]  ;;  %v1986_v44 = vld [vmem:[%s2690_s5 + $0x28] sm:$0xff]  ;;  %v1956_v45 = vld [vmem:[%s2688_s1 + $0x198] sm:$0xff] }
  0x1a   :  { %2018 = vmatpush.bf16.msra.mxu2 %v1906_v12  ;;  %872 = vmatpush.bf16.msra.mxu0 %v1906_v12  ;;  %v1945_v12 = vld [vmem:[%s2688_s1 + $0x140] sm:$0xff]  ;;  %v1883_v50 = vld [vmem:[%s2689_s0 + $0x70] sm:$0xf0] }
  0x1b   :  { %2026 = vmatpush.bf16.msra.mxu3 %v1914_v13  ;;  %905 = vmatpush.bf16.msra.mxu1 %v1914_v13  ;;  %v1976_v13 = vld [vmem:[%s2688_s1 + $0x238] sm:$0xff]  ;;  %v1479_v53 = vld [vmem:[%s2689_s0 + $0xa0] sm:$0xf]  ;;  %v1971_v2 = vld [vmem:[%s2688_s1 + $0x210] sm:$0xff] }
  0x1e   :  { %2019 = vmatpush.bf16.msra.mxu2 %v1905_v14  ;;  %873 = vmatpush.bf16.msra.mxu0 %v1905_v14  ;;  %v1988_v14 = vld [vmem:[%s2690_s5 + $0x38] sm:$0xff] }
  0x1f   :  { %2027 = vmatpush.bf16.msra.mxu3 %v1913_v15  ;;  %906 = vmatpush.bf16.msra.mxu1 %v1913_v15  ;;  %v1407_v15 = vld [vmem:[%s2689_s0 + $0x10] sm:$0xf] }
  0x21   :  { %884 = vmatmul.bf16.vlgmr.msra.gmra.mxu2 %v1464_v23  ;;  %874 = vmatmul.bf16.vlgmr.msra.gmra.mxu0 %v1392_v32  ;;  %v1874_v32 = vld [vmem:[%s2689_s0 + $0x28] sm:$0xf0] }
  0x22   :  { %932 = vmatpush.bf16.msrb.mxu2 %v1928_v20  ;;  %917 = vmatmul.bf16.vlgmr.msra.gmra.mxu3 %v1468_v24  ;;  %v1875_v20 = vld [vmem:[%s2689_s0 + $0x30] sm:$0xf0] }
  0x23   :  { %965 = vmatpush.bf16.msrb.mxu3 %v1936_v21  ;;  %998 = vmatpush.bf16.msrb.mxu0 %v1944_v28  ;;  %v1871_v21 = vld [vmem:[%s2689_s0 + $0x14] sm:$0xf]  ;;  %v1408_v23 = vor.u32 %v1875_v20, %v1407_v15  ;;  %v1982_v20 = vld [vmem:[%s2690_s5 + $0x8] sm:$0xff] }
  0x24   :  { %1031 = vmatpush.bf16.msrb.mxu1 %v1952_v29  ;;  %v1412_v24 = vor.u32 %v1871_v21, %v1409_v22  ;;  %v1987_v28 = vld [vmem:[%s2690_s5 + $0x30] sm:$0xff]  ;;  %v1974_v29 = vld [vmem:[%s2688_s1 + $0x228] sm:$0xff]  ;;  %v1969_v21 = vld [vmem:[%s2688_s1 + $0x200] sm:$0xff] }
  0x25   :  { %907 = vmatmul.bf16.vlgmr.msra.gmra.mxu1 %v1396_v33  ;;  %v1870_v33 = vld [vmem:[%s2689_s0 + $0xc] sm:$0xf]  ;;  %v1507_v22 = vld [vmem:[%s2689_s0 + $0xe0] sm:$0xf] }
  0x26   :  { %933 = vmatpush.bf16.msrb.mxu2 %v1927_v30  ;;  %v1957_v30 = vld [vmem:[%s2688_s1 + $0x1a0] sm:$0xff] }
  0x27   :  { %966 = vmatpush.bf16.msrb.mxu3 %v1935_v31  ;;  %999 = vmatpush.bf16.msrb.mxu0 %v1943_v34  ;;  %v1399_v31 = vld [vmem:[%s2689_s0 + $0x8] sm:$0xf]  ;;  %v1401_v34 = vld [vmem:[%s2689_s0 + $0x2c] sm:$0xf0] }
  0x28   :  { %1032 = vmatpush.bf16.msrb.mxu1 %v1951_v35  ;;  %v1443_v35 = vld [vmem:[%s2689_s0 + $0x58] sm:$0xf] }
  0x2a   :  { %934 = vmatpush.bf16.msrb.mxu2 %v1926_v36  ;;  %v1400_v36 = vor.u32 %v1874_v32, %v1399_v31 }
  0x2b   :  { %967 = vmatpush.bf16.msrb.mxu3 %v1934_v37  ;;  %1000 = vmatpush.bf16.msrb.mxu0 %v1942_v38  ;;  %v1404_v37 = vor.u32 %v1870_v33, %v1401_v34  ;;  %v1884_v38 = vld [vmem:[%s2689_s0 + $0x78] sm:$0xf0]  ;;  %v1981_v33 = vld [vmem:[%s2690_s5] sm:$0xff]  ;;  %v70_v34 = vld [vmem:[%s2689_s0 + $0x128] sm:$0xff] }
  0x2c   :  { %1033 = vmatpush.bf16.msrb.mxu1 %v1950_v39  ;;  %v1880_v39 = vld [vmem:[%s2689_s0 + $0x5c] sm:$0xf] }
  0x2e   :  { %935 = vmatpush.bf16.msrb.mxu2 %v1925_v40  ;;  %v1445_v40 = vld [vmem:[%s2689_s0 + $0x7c] sm:$0xf0] }
  0x2f   :  { %968 = vmatpush.bf16.msrb.mxu3 %v1933_v41  ;;  %1001 = vmatpush.bf16.msrb.mxu0 %v1941_v46  ;;  %v1444_v41 = vor.u32 %v1884_v38, %v1443_v35  ;;  %v1448_v42 = vor.u32 %v1880_v39, %v1445_v40  ;;  %v1973_v46 = vld [vmem:[%s2688_s1 + $0x220] sm:$0xff]  ;;  %v337_v35 = vunpack.c.l.b16 %v70_v34 }
  0x30   :  { %1034 = vmatpush.bf16.msrb.mxu1 %v1949_v47  ;;  %v1964_v47 = vld [vmem:[%s2688_s1 + $0x1d8] sm:$0xff]  ;;  %v1423_v39 = vld [vmem:[%s2689_s0 + $0x20] sm:$0xf]  ;;  %v1877_v40 = vld [vmem:[%s2689_s0 + $0x40] sm:$0xf0] }
  0x31   :  { %889 = vmatmul.bf16.gmra.mxu2 %v1500_v51  ;;  %879 = vmatmul.bf16.gmra.mxu0 %v1428_v60  ;;  %v1879_v51 = vld [vmem:[%s2689_s0 + $0x54] sm:$0xf] }
  0x32   :  { %936 = vmatpush.bf16.msrb.mxu2 %v1924_v48  ;;  %922 = vmatmul.bf16.gmra.mxu3 %v1504_v52  ;;  %v1985_v48 = vld [vmem:[%s2690_s5 + $0x20] sm:$0xff]  ;;  %v1437_v52 = vld [vmem:[%s2689_s0 + $0x74] sm:$0xf0] }
  0x33   :  { %969 = vmatpush.bf16.msrb.mxu3 %v1932_v49  ;;  %1002 = vmatpush.bf16.msrb.mxu0 %v1940_v56  ;;  %v1435_v49 = vld [vmem:[%s2689_s0 + $0x50] sm:$0xf]  ;;  %v1440_v55 = vor.u32 %v1879_v51, %v1437_v52  ;;  %v1893_v56 = vld [vmem:[%s2689_s0 + $0xc0] sm:$0xf0]  ;;  %v1978_v52 = vld [vmem:[%s2691_s4 + $0x8] sm:$0xff] }
  0x34   :  { %1035 = vmatpush.bf16.msrb.mxu1 %v1948_v57  ;;  %v1436_v54 = vor.u32 %v1883_v50, %v1435_v49  ;;  %v1889_v57 = vld [vmem:[%s2689_s0 + $0xa4] sm:$0xf]  ;;  %v1459_v49 = vld [vmem:[%s2689_s0 + $0x68] sm:$0xf]  ;;  %v1886_v50 = vld [vmem:[%s2689_s0 + $0x88] sm:$0xf0] }
  0x35   :  { %912 = vmatmul.bf16.gmra.mxu1 %v1432_v61  ;;  %v1955_v61 = vld [vmem:[%s2688_s1 + $0x190] sm:$0xff]  ;;  %v1460_v51 = vor.u32 %v1886_v50, %v1459_v49 }
  0x36   :  { %937 = vmatpush.bf16.msrb.mxu2 %v1923_v58  ;;  %v1481_v58 = vld [vmem:[%s2689_s0 + $0xc4] sm:$0xf0] }
  0x37   :  { %970 = vmatpush.bf16.msrb.mxu3 %v1931_v59  ;;  %1003 = vmatpush.bf16.msrb.mxu0 %v1939_v62  ;;  %v1480_v59 = vor.u32 %v1893_v56, %v1479_v53  ;;  %v1484_v60 = vor.u32 %v1889_v57, %v1481_v58  ;;  %v1972_v62 = vld [vmem:[%s2688_s1 + $0x218] sm:$0xff] }
  0x38   :  { %1036 = vmatpush.bf16.msrb.mxu1 %v1947_v63  ;;  %v1963_v63 = vld [vmem:[%s2688_s1 + $0x1d0] sm:$0xff] }
  0x3a   :  { %938 = vmatpush.bf16.msrb.mxu2 %v1922_v0  ;;  %v1984_v0 = vld [vmem:[%s2690_s5 + $0x18] sm:$0xff] }
  0x3b   :  { %971 = vmatpush.bf16.msrb.mxu3 %v1930_v1  ;;  %1004 = vmatpush.bf16.msrb.mxu0 %v1938_v3  ;;  %v1954_v1 = vld [vmem:[%s2688_s1 + $0x188] sm:$0xff] }
  0x3c   :  { %1037 = vmatpush.bf16.msrb.mxu1 %v1946_v4  ;;  %v1962_v3 = vld [vmem:[%s2688_s1 + $0x1c8] sm:$0xff]  ;;  %v1471_v4 = vld [vmem:[%s2689_s0 + $0x98] sm:$0xf] }
  0x3e   :  { %939 = vmatpush.bf16.msrb.mxu2 %v1921_v5  ;;  %v1892_v5 = vld [vmem:[%s2689_s0 + $0xb8] sm:$0xf0] }
  0x3f   :  { %972 = vmatpush.bf16.msrb.mxu3 %v1929_v6  ;;  %1005 = vmatpush.bf16.msrb.mxu0 %v1937_v11  ;;  %v1888_v6 = vld [vmem:[%s2689_s0 + $0x9c] sm:$0xf]  ;;  %v1472_v9 = vor.u32 %v1892_v5, %v1471_v4  ;;  %v1902_v11 = vld [vmem:[%s2689_s0 + $0x108] sm:$0xf0] }
  0x40   :  { %1038 = vmatpush.bf16.msrb.mxu1 %v1945_v12  ;;  %v1898_v12 = vld [vmem:[%s2689_s0 + $0xec] sm:$0xf] }
  0x41   :  { %894 = vmatmul.bf16.gmra.mxu2 %v380_v18  ;;  %v1970_v18 = vld [vmem:[%s2688_s1 + $0x208] sm:$0xff] }
  0x42   :  { %1064 = vmatpush.bf16.msra.mxu2 %v1960_v7  ;;  %927 = vmatmul.bf16.gmra.mxu3 %v381_v19  ;;  %v1473_v7 = vld [vmem:[%s2689_s0 + $0xbc] sm:$0xf0] }
  0x43   :  { %1097 = vmatpush.bf16.msra.mxu3 %v1968_v8  ;;  %1130 = vmatpush.bf16.msra.mxu0 %v1976_v13  ;;  %v1515_v8 = vld [vmem:[%s2689_s0 + $0xe8] sm:$0xf]  ;;  %v1476_v10 = vor.u32 %v1888_v6, %v1473_v7  ;;  %v1517_v13 = vld [vmem:[%s2689_s0 + $0x10c] sm:$0xf0]  ;;  %v1961_v19 = vld [vmem:[%s2688_s1 + $0x1c0] sm:$0xff] }
  0x44   :  { %1290 = vmatpush.bf16.msra.mxu1 %v1988_v14  ;;  %1006 = vmatmul.bf16.vlgmr.msrb.gmra.mxu0 %v1408_v23  ;;  %v1516_v14 = vor.u32 %v1902_v11, %v1515_v8  ;;  %v1520_v15 = vor.u32 %v1898_v12, %v1517_v13  ;;  %v71_v23 = vld [vmem:[%s2689_s0 + $0x130] sm:$0xff] }
  0x45   :  { %1039 = vmatmul.bf16.vlgmr.msrb.gmra.mxu1 %v1412_v24  ;;  %v1901_v24 = vld [vmem:[%s2689_s0 + $0x100] sm:$0xf0]  ;;  %v1495_v7 = vld [vmem:[%s2689_s0 + $0xb0] sm:$0xf]  ;;  %v1895_v8 = vld [vmem:[%s2689_s0 + $0xd0] sm:$0xf0] }
  0x46   :  { %1065 = vmatpush.bf16.msra.mxu2 %v1959_v16  ;;  %v1983_v16 = vld [vmem:[%s2690_s5 + $0x10] sm:$0xff] }
  0x47   :  { %1098 = vmatpush.bf16.msra.mxu3 %v1967_v17  ;;  %1131 = vmatpush.bf16.msra.mxu0 %v1975_v26  ;;  %v1953_v17 = vld [vmem:[%s2688_s1 + $0x180] sm:$0xff]  ;;  %v1509_v26 = vld [vmem:[%s2689_s0 + $0x104] sm:$0xf0] }
  0x48   :  { %1291 = vmatpush.bf16.msra.mxu1 %v1987_v28  ;;  %v340_v28 = vunpack.c.h.b16 %v71_v23 }
  0x4a   :  { %1066 = vmatpush.bf16.msra.mxu2 %v1958_v25  ;;  %v1897_v25 = vld [vmem:[%s2689_s0 + $0xe4] sm:$0xf]  ;;  %v385_v32 = vpack.c.b16 %v340_v28, %v340_v28 }
  0x4b   :  { %1099 = vmatpush.bf16.msra.mxu3 %v1966_v27  ;;  %1132 = vmatpush.bf16.msra.mxu0 %v1974_v29  ;;  %v339_v27 = vunpack.c.l.b16 %v71_v23  ;;  %v1508_v29 = vor.u32 %v1901_v24, %v1507_v22  ;;  %v1489_v22 = vld [vmem:[%s2689_s0 + $0xcc] sm:$0xf0] }
  0x4c   :  { %1292 = vmatpush.bf16.msra.mxu1 %v1986_v44  ;;  %v1876_v44 = vld [vmem:[%s2689_s0 + $0x38] sm:$0xf0] }
  0x4d   :  { %v384_v31 = vpack.c.b16 %v339_v27, %v339_v27 }
  0x4e   :  { %1067 = vmatpush.bf16.msra.mxu2 %v1957_v30  ;;  %v1512_v30 = vor.u32 %v1897_v25, %v1509_v26 }
  0x4f   :  { %1100 = vmatpush.bf16.msra.mxu3 %v1965_v43  ;;  %1133 = vmatpush.bf16.msra.mxu0 %v1973_v46  ;;  %v1415_v43 = vld [vmem:[%s2689_s0 + $0x18] sm:$0xf]  ;;  %v1417_v46 = vld [vmem:[%s2689_s0 + $0x3c] sm:$0xf0] }
  0x50   :  { %1293 = vmatpush.bf16.msra.mxu1 %v1985_v48 }
  0x51   :  { %940 = vmatmul.bf16.vlgmr.msrb.gmra.mxu2 %v1400_v36  ;;  %v338_v36 = vunpack.c.h.b16 %v70_v34 }
  0x52   :  { %973 = vmatmul.bf16.vlgmr.msrb.gmra.mxu3 %v1404_v37  ;;  %1068 = vmatpush.bf16.msra.mxu2 %v1956_v45  ;;  %v382_v37 = vpack.c.b16 %v337_v35, %v337_v35  ;;  %v1872_v45 = vld [vmem:[%s2689_s0 + $0x1c] sm:$0xf] }
  0x53   :  { %1101 = vmatpush.bf16.msra.mxu3 %v1964_v47  ;;  %1134 = vmatpush.bf16.msra.mxu0 %v1972_v62  ;;  %v383_v38 = vpack.c.b16 %v338_v36, %v338_v36  ;;  %v1416_v47 = vor.u32 %v1876_v44, %v1415_v43  ;;  %v1420_v48 = vor.u32 %v1872_v45, %v1417_v46  ;;  %v1885_v62 = vld [vmem:[%s2689_s0 + $0x80] sm:$0xf0]  ;;  %v1903_v43 = vld [vmem:[%s2689_s0 + $0x110] sm:$0xf0]  ;;  %v1525_v45 = vld [vmem:[%s2689_s0 + $0x114] sm:$0xf0] }
  0x54   :  { %1011 = vmatmul.bf16.gmra.mxu0 %v1444_v41  ;;  %1294 = vmatpush.bf16.msra.mxu1 %v1984_v0  ;;  %v1424_v41 = vor.u32 %v1877_v40, %v1423_v39  ;;  %v1453_v0 = vld [vmem:[%s2689_s0 + $0x84] sm:$0xf0]  ;;  %v1899_v44 = vld [vmem:[%s2689_s0 + $0xf4] sm:$0xf] }
  0x55   :  { %1044 = vmatmul.bf16.gmra.mxu1 %v1448_v42  ;;  %v1977_v42 = vld [vmem:[%s2691_s4] sm:$0xff] }
  0x56   :  { %1069 = vmatpush.bf16.msra.mxu2 %v1955_v61 }
  0x57   :  { %1102 = vmatpush.bf16.msra.mxu3 %v1963_v63  ;;  %1135 = vmatpush.bf16.msra.mxu0 %v1971_v2  ;;  %v1881_v63 = vld [vmem:[%s2689_s0 + $0x64] sm:$0xf] }
  0x58   :  { %1295 = vmatpush.bf16.msra.mxu1 %v1983_v16  ;;  %v1456_v6 = vor.u32 %v1881_v63, %v1453_v0 }
  0x5a   :  { %1070 = vmatpush.bf16.msra.mxu2 %v1954_v1 }
  0x5b   :  { %1103 = vmatpush.bf16.msra.mxu3 %v1962_v3  ;;  %1136 = vmatpush.bf16.msra.mxu0 %v1970_v18 }
  0x5c   :  { %1296 = vmatpush.bf16.msra.mxu1 %v1982_v20  ;;  %v1894_v20 = vld [vmem:[%s2689_s0 + $0xc8] sm:$0xf0] }
  0x5e   :  { %1071 = vmatpush.bf16.msra.mxu2 %v1953_v17  ;;  %v1487_v17 = vld [vmem:[%s2689_s0 + $0xa8] sm:$0xf] }
  0x5f   :  { %1104 = vmatpush.bf16.msra.mxu3 %v1961_v19  ;;  %1137 = vmatpush.bf16.msra.mxu0 %v1969_v21  ;;  %v1890_v21 = vld [vmem:[%s2689_s0 + $0xac] sm:$0xf]  ;;  %v1488_v27 = vor.u32 %v1894_v20, %v1487_v17 }
  0x60   :  { %1297 = vmatpush.bf16.msra.mxu1 %v1981_v33  ;;  %v1492_v28 = vor.u32 %v1890_v21, %v1489_v22 }
  0x61   :  { %945 = vmatmul.bf16.gmra.mxu2 %v1436_v54 }
  0x62   :  { %978 = vmatmul.bf16.gmra.mxu3 %v1440_v55 }
  0x64   :  { %1016 = vmatmul.bf16.gmra.mxu0 %v1480_v59  ;;  %v1451_v59 = vld [vmem:[%s2689_s0 + $0x60] sm:$0xf] }
  0x65   :  { %1049 = vmatmul.bf16.gmra.mxu1 %v1484_v60  ;;  %v1452_v5 = vor.u32 %v1885_v62, %v1451_v59 }
  0x71   :  { %950 = vmatmul.bf16.gmra.mxu2 %v1472_v9  ;;  %v1496_v9 = vor.u32 %v1895_v8, %v1495_v7 }
  0x72   :  { %983 = vmatmul.bf16.gmra.mxu3 %v1476_v10  ;;  %v1979_v10 = vld [vmem:[%s2691_s4 + $0x10] sm:$0xff] }
  0x74   :  { %1021 = vmatmul.bf16.gmra.mxu0 %v1516_v14 }
  0x75   :  { %1054 = vmatmul.bf16.gmra.mxu1 %v1520_v15 }
  0x81   :  { %955 = vmatmul.bf16.gmra.mxu2 %v1508_v29  ;;  %v1531_v29 = vld [vmem:[%s2689_s0 + $0xf8] sm:$0xf] }
  0x82   :  { %988 = vmatmul.bf16.gmra.mxu3 %v1512_v30  ;;  %v1904_v30 = vld [vmem:[%s2689_s0 + $0x118] sm:$0xf0] }
  0x84   :  { %1026 = vmatmul.bf16.gmra.mxu0 %v384_v31  ;;  %v1532_v31 = vor.u32 %v1904_v30, %v1531_v29 }
  0x85   :  { %1059 = vmatmul.bf16.gmra.mxu1 %v385_v32  ;;  %v1980_v32 = vld [vmem:[%s2691_s4 + $0x18] sm:$0xff] }
  0x91   :  { %960 = vmatmul.bf16.gmra.mxu2 %v382_v37 }
  0x92   :  { %993 = vmatmul.bf16.gmra.mxu3 %v383_v38  ;;  %v1523_v38 = vld [vmem:[%s2689_s0 + $0xf0] sm:$0xf] }
  0x93   :  { %v1524_v50 = vor.u32 %v1903_v43, %v1523_v38 }
  0x94   :  { %1138 = vmatmul.bf16.vlgmr.msra.gmra.mxu0 %v1424_v41  ;;  %v73_v41 = vld [vmem:[%s2689_s0 + $0x140] sm:$0xf] }
  0x95   :  { %1298 = vmatmul.bf16.vlgmr.msra.gmra.mxu1 %v1977_v42  ;;  %v1197_v42 = vld [vmem:[%s2691_s4 + $0x20] sm:$0xf] }
  0x96   :  { %v1231_v49 = vunpack.c.l.b16 %v1197_v42 }
  0x9e   :  { %v875_v53 = vpop.f32.mrf.mxu0 }
  0xa1   :  { %1072 = vmatmul.bf16.vlgmr.msra.gmra.mxu2 %v1416_v47 }
  0xa2   :  { %1105 = vmatmul.bf16.vlgmr.msra.gmra.mxu3 %v1420_v48  ;;  %v908_v54 = vpop.f32.mrf.mxu1  ;;  %v343_v48 = vunpack.c.l.b16 %v73_v41 }
  0xa3   :  { %v2500_v55 = vadd.f32 %v908_v54, %v875_v53  ;;  %v1236_v53 = vpack.c.b16 %v1231_v49, %v1231_v49 }
  0xa4   :  { %v885_v56 = vpop.f32.mrf.mxu2  ;;  %1143 = vmatmul.bf16.gmra.mxu0 %v1460_v51  ;;  %v1528_v51 = vor.u32 %v1899_v44, %v1525_v45 }
  0xa5   :  { %v918_v57 = vpop.f32.mrf.mxu3  ;;  %1303 = vmatmul.bf16.gmra.mxu1 %v1978_v52  ;;  %v388_v52 = vpack.c.b16 %v343_v48, %v343_v48 }
  0xa6   :  { %v2502_v58 = vadd.f32 %v918_v57, %v885_v56  ;;  %v877_v60 = vpop.f32.mrf.mxu0 }
  0xaa   :  { %v910_v61 = vpop.f32.mrf.mxu1 }
  0xab   :  { %v2516_v1 = vadd.f32 %v910_v61, %v877_v60  ;;  %v72_v61 = vld [vmem:[%s2689_s0 + $0x138] sm:$0xff] }
  0xac   :  { %v887_v2 = vpop.f32.mrf.mxu2  ;;  %v341_v0 = vunpack.c.l.b16 %v72_v61 }
  0xad   :  { %v920_v3 = vpop.f32.mrf.mxu3 }
  0xae   :  { %v2518_v4 = vadd.f32 %v920_v3, %v887_v2  ;;  %v880_v11 = vpop.f32.mrf.mxu0  ;;  %v342_v2 = vunpack.c.h.b16 %v72_v61 }
  0xb1   :  { %1077 = vmatmul.bf16.gmra.mxu2 %v1452_v5 }
  0xb2   :  { %1110 = vmatmul.bf16.gmra.mxu3 %v1456_v6  ;;  %v913_v12 = vpop.f32.mrf.mxu1 }
  0xb3   :  { %v2529_v13 = vadd.f32 %v913_v12, %v880_v11  ;;  %v387_v11 = vpack.c.b16 %v342_v2, %v342_v2 }
  0xb4   :  { %v890_v14 = vpop.f32.mrf.mxu2  ;;  %1148 = vmatmul.bf16.gmra.mxu0 %v1496_v9 }
  0xb5   :  { %v923_v15 = vpop.f32.mrf.mxu3  ;;  %1308 = vmatmul.bf16.gmra.mxu1 %v1979_v10  ;;  %v386_v10 = vpack.c.b16 %v341_v0, %v341_v0 }
  0xb6   :  { %v2531_v16 = vadd.f32 %v923_v15, %v890_v14  ;;  %v882_v18 = vpop.f32.mrf.mxu0 }
  0xba   :  { %v915_v19 = vpop.f32.mrf.mxu1 }
  0xbb   :  { %v2545_v23 = vadd.f32 %v915_v19, %v882_v18 }
  0xbc   :  { %v892_v24 = vpop.f32.mrf.mxu2 }
  0xbd   :  { %v925_v25 = vpop.f32.mrf.mxu3 }
  0xbe   :  { %v2547_v26 = vadd.f32 %v925_v25, %v892_v24 }
  0xc1   :  { %1082 = vmatmul.bf16.gmra.mxu2 %v1488_v27  ;;  %v1007_v33 = vpop.f32.mrf.mxu0 }
  0xc2   :  { %1115 = vmatmul.bf16.gmra.mxu3 %v1492_v28  ;;  %v1040_v34 = vpop.f32.mrf.mxu1 }
  0xc4   :  { %v895_v35 = vpop.f32.mrf.mxu2  ;;  %1153 = vmatmul.bf16.gmra.mxu0 %v1532_v31 }
  0xc5   :  { %v928_v36 = vpop.f32.mrf.mxu3  ;;  %1313 = vmatmul.bf16.gmra.mxu1 %v1980_v32 }
  0xc6   :  { %v2558_v37 = vadd.f32 %v928_v36, %v895_v35 }
  0xc9   :  { %v1009_v39 = vpop.f32.mrf.mxu0 }
  0xca   :  { %v1042_v40 = vpop.f32.mrf.mxu1 }
  0xcc   :  { %v897_v46 = vpop.f32.mrf.mxu2 }
  0xcd   :  { %v930_v47 = vpop.f32.mrf.mxu3 }
  0xd1   :  { %1087 = vmatmul.bf16.gmra.mxu2 %v1524_v50  ;;  %v1012_v54 = vpop.f32.mrf.mxu0 }
  0xd2   :  { %1120 = vmatmul.bf16.gmra.mxu3 %v1528_v51  ;;  %v1045_v56 = vpop.f32.mrf.mxu1 }
  0xd4   :  { %v941_v57 = vpop.f32.mrf.mxu2  ;;  %1158 = vmatmul.bf16.gmra.mxu0 %v388_v52 }
  0xd5   :  { %v974_v59 = vpop.f32.mrf.mxu3  ;;  %1318 = vmatmul.bf16.gmra.mxu1 %v1236_v53  ;;  %v942_v60 = vadd.f32 %v941_v57, %v2500_v55 }
  0xd7   :  { %v975_v62 = vadd.f32 %v974_v59, %v942_v60 }
  0xd9   :  { %v1008_v63 = vadd.f32 %v1007_v33, %v975_v62  ;;  %v1014_v3 = vpop.f32.mrf.mxu0 }
  0xda   :  { %v1047_v5 = vpop.f32.mrf.mxu1 }
  0xdb   :  { %v2582_v6 = vadd.f32 %v1040_v34, %v1008_v63 }
  0xdc   :  { %v943_v7 = vpop.f32.mrf.mxu2 }
  0xdd   :  { %v976_v8 = vpop.f32.mrf.mxu3  ;;  %v944_v9 = vadd.f32 %v943_v7, %v2516_v1 }
  0xdf   :  { %v977_v12 = vadd.f32 %v976_v8, %v944_v9 }
  0xe1   :  { %v1010_v55 = vadd.f32 %v1009_v39, %v977_v12  ;;  %1092 = vmatmul.bf16.gmra.mxu2 %v386_v10  ;;  %v1017_v14 = vpop.f32.mrf.mxu0 }
  0xe2   :  { %1125 = vmatmul.bf16.gmra.mxu3 %v387_v11  ;;  %v1050_v15 = vpop.f32.mrf.mxu1 }
  0xe3   :  { %v2585_v17 = vadd.f32 %v1042_v40, %v1010_v55 }
  0xe4   :  { %v946_v18 = vpop.f32.mrf.mxu2 }
  0xe5   :  { %v979_v19 = vpop.f32.mrf.mxu3  ;;  %v947_v20 = vadd.f32 %v946_v18, %v2529_v13 }
  0xe7   :  { %v980_v21 = vadd.f32 %v979_v19, %v947_v20 }
  0xe9   :  { %v1013_v22 = vadd.f32 %v1012_v54, %v980_v21  ;;  %v1019_v24 = vpop.f32.mrf.mxu0  ;;  %v2612_v21 = vld [vmem:[%s2692_s2] ss:$0 sm:$0xff] }
  0xea   :  { %v1052_v25 = vpop.f32.mrf.mxu1 }
  0xeb   :  { %v2588_v27 = vadd.f32 %v1045_v56, %v1013_v22 }
  0xec   :  { %v948_v1 = vpop.f32.mrf.mxu2 }
  0xed   :  { %v981_v28 = vpop.f32.mrf.mxu3  ;;  %v949_v29 = vadd.f32 %v948_v1, %v2545_v23  ;;  %v2618_v1 = vld [vmem:[%s2693_s3] ss:$0 sm:$0xff] }
  0xef   :  { %v982_v30 = vadd.f32 %v981_v28, %v949_v29 }
  0xf1   :  { %v1015_v31 = vadd.f32 %v1014_v3, %v982_v30  ;;  %v1022_v32 = vpop.f32.mrf.mxu0 }
  0xf2   :  { %v1055_v33 = vpop.f32.mrf.mxu1 }
  0xf3   :  { %v2591_v34 = vadd.f32 %v1047_v5, %v1015_v31 }
  0xf4   :  { %v951_v35 = vpop.f32.mrf.mxu2 }
  0xf5   :  { %v984_v36 = vpop.f32.mrf.mxu3  ;;  %v952_v13 = vadd.f32 %v951_v35, %v2502_v58 }
  0xf7   :  { %v985_v38 = vadd.f32 %v984_v36, %v952_v13 }
  0xf9   :  { %v1018_v39 = vadd.f32 %v1017_v14, %v985_v38  ;;  %v1024_v40 = vpop.f32.mrf.mxu0 }
  0xfa   :  { %v1057_v41 = vpop.f32.mrf.mxu1 }
  0xfb   :  { %v2594_v42 = vadd.f32 %v1050_v15, %v1018_v39  ;;  %v2631_v39 = vld [vmem:[%s2695_s7] ss:$0 sm:$0xff] }
  0xfc   :  { %v953_v43 = vpop.f32.mrf.mxu2 }
  0xfd   :  { %v986_v44 = vpop.f32.mrf.mxu3  ;;  %v954_v23 = vadd.f32 %v953_v43, %v2518_v4 }
  0xff   :  { %v987_v45 = vadd.f32 %v986_v44, %v954_v23 }
 0x101   :  { %v1020_v46 = vadd.f32 %v1019_v24, %v987_v45  ;;  %v1027_v47 = vpop.f32.mrf.mxu0 }
 0x102   :  { %v1060_v48 = vpop.f32.mrf.mxu1 }
 0x103   :  { %v2597_v49 = vadd.f32 %v1052_v25, %v1020_v46 }
 0x104   :  { %v956_v50 = vpop.f32.mrf.mxu2 }
 0x105   :  { %v989_v51 = vpop.f32.mrf.mxu3  ;;  %v957_v58 = vadd.f32 %v956_v50, %v2531_v16 }
 0x107   :  { %v990_v52 = vadd.f32 %v989_v51, %v957_v58 }
 0x109   :  { %v1023_v53 = vadd.f32 %v1022_v32, %v990_v52  ;;  %v1029_v54 = vpop.f32.mrf.mxu0 }
 0x10a   :  { %v1062_v56 = vpop.f32.mrf.mxu1 }
 0x10b   :  { %v2600_v57 = vadd.f32 %v1055_v33, %v1023_v53 }
 0x10c   :  { %v958_v59 = vpop.f32.mrf.mxu2 }
 0x10d   :  { %v991_v60 = vpop.f32.mrf.mxu3  ;;  %v959_v4 = vadd.f32 %v958_v59, %v2547_v26 }
 0x10f   :  { %v992_v61 = vadd.f32 %v991_v60, %v959_v4 }
 0x111   :  { %v1025_v62 = vadd.f32 %v1024_v40, %v992_v61  ;;  %v1139_v63 = vpop.f32.mrf.mxu0 }
 0x112   :  { %v1299_v0 = vpop.f32.mrf.mxu1 }
 0x113   :  { %v2603_v2 = vadd.f32 %v1057_v41, %v1025_v62 }
 0x114   :  { %v961_v3 = vpop.f32.mrf.mxu2 }
 0x115   :  { %v994_v5 = vpop.f32.mrf.mxu3  ;;  %v962_v16 = vadd.f32 %v961_v3, %v2558_v37 }
 0x117   :  { %v995_v7 = vadd.f32 %v994_v5, %v962_v16 }
 0x119   :  { %v1028_v8 = vadd.f32 %v1027_v47, %v995_v7  ;;  %v1141_v9 = vpop.f32.mrf.mxu0 }
 0x11a   :  { %v1301_v10 = vpop.f32.mrf.mxu1 }
 0x11b   :  { %v2606_v11 = vadd.f32 %v1060_v48, %v1028_v8 }
 0x11c   :  { %v963_v12 = vpop.f32.mrf.mxu2 }
 0x11d   :  { %v996_v55 = vpop.f32.mrf.mxu3 }
 0x121   :  { %v1144_v14 = vpop.f32.mrf.mxu0 }
 0x122   :  { %v1304_v26 = vpop.f32.mrf.mxu1 }
 0x124   :  { %v1073_v15 = vpop.f32.mrf.mxu2 }
 0x125   :  { %v1106_v18 = vpop.f32.mrf.mxu3  ;;  %v1074_v19 = vadd.f32 %v1073_v15, %v2582_v6  ;;  %v2623_v6 = vld [vmem:[%s2694_s6] ss:$0 sm:$0xff] }
 0x126   :  { %v1327_v32 = vmul.f32 %v2623_v6, %v1299_v0  ;;  %v1328_v44 = vmul.f32 %v2623_v6, %v1301_v10  ;;  %v1329_v61 = vmul.f32 %v2623_v6, %v1304_v26 }
 0x127   :  { %v1107_v20 = vadd.f32 %v1106_v18, %v1074_v19 }
 0x129   :  { %v1140_v37 = vadd.f32 %v1139_v63, %v1107_v20  ;;  %v1146_v22 = vpop.f32.mrf.mxu0 }
 0x12a   :  { %v1306_v24 = vpop.f32.mrf.mxu1 }
 0x12b   :  { %v1167_v25 = vmul.f32 %v2612_v21, %v1140_v37 }
 0x12c   :  { %v1075_v28 = vpop.f32.mrf.mxu2 }
 0x12d   :  { %v1108_v29 = vpop.f32.mrf.mxu3  ;;  %v1076_v30 = vadd.f32 %v1075_v28, %v2585_v17  ;;  %v1180_v31 = vadd.f32 %v2618_v1, %v1167_v25 }
 0x12f   :  { %v1109_v33 = vadd.f32 %v1108_v29, %v1076_v30  ;;  %v1336_v38 = vadd.f32 %v1327_v32, %v1180_v31 }
 0x131   :  { %v1142_v35 = vadd.f32 %v1141_v9, %v1109_v33  ;;  %v1149_v36 = vpop.f32.mrf.mxu0  ;;  %v1349_v45 = vadd.f32 %v2631_v39, %v1336_v38 }
 0x132   :  { %v1309_v13 = vpop.f32.mrf.mxu1 }
 0x133   :  { %v1168_v40 = vmul.f32 %v2612_v21, %v1142_v35  ;;  %v1358_v52 = vmax.f32 %v1349_v45, 0.0  ;;  %v1331_v30 = vmul.f32 %v2623_v6, %v1309_v13 }
 0x134   :  { %v1078_v41 = vpop.f32.mrf.mxu2 }
 0x135   :  { %v1111_v43 = vpop.f32.mrf.mxu3  ;;  %v1181_v17 = vadd.f32 %v2618_v1, %v1168_v40  ;;  %v1079_v23 = vadd.f32 %v1078_v41, %v2588_v27 }
 0x137   :  { %v1337_v46 = vadd.f32 %v1328_v44, %v1181_v17  ;;  %v1112_v47 = vadd.f32 %v1111_v43, %v1079_v23 }
 0x139   :  { %v1350_v48 = vadd.f32 %v2631_v39, %v1337_v46  ;;  %v1145_v50 = vadd.f32 %v1144_v14, %v1112_v47  ;;  %v1151_v51 = vpop.f32.mrf.mxu0 }
 0x13a   :  { %v1311_v58 = vpop.f32.mrf.mxu1 }
 0x13b   :  { %v1359_v53 = vmax.f32 %v1350_v48, 0.0  ;;  %v1169_v54 = vmul.f32 %v2612_v21, %v1145_v50 }
 0x13c   :  { %v1080_v56 = vpop.f32.mrf.mxu2 }
 0x13d   :  { %v1113_v59 = vpop.f32.mrf.mxu3  ;;  %v1992_v60 = vpack.c.bf16 %v1359_v53, %v1358_v52  ;;  %v1081_v4 = vadd.f32 %v1080_v56, %v2591_v34  ;;  %v1182_v27 = vadd.f32 %v2618_v1, %v1169_v54  ;;  %v1330_v34 = vmul.f32 %v2623_v6, %v1306_v24 }
 0x13f   :  { %1993 = vst [vmem:[%s2696_s8] sm:$0xff] %v1992_v60   ;;  %v1114_v62 = vadd.f32 %v1113_v59, %v1081_v4  ;;  %v1338_v5 = vadd.f32 %v1329_v61, %v1182_v27 }
 0x141   :  { %v1147_v63 = vadd.f32 %v1146_v22, %v1114_v62  ;;  %v1154_v0 = vpop.f32.mrf.mxu0  ;;  %v1351_v12 = vadd.f32 %v2631_v39, %v1338_v5 }
 0x142   :  { %v1314_v3 = vpop.f32.mrf.mxu1 }
 0x143   :  { %v1170_v16 = vmul.f32 %v2612_v21, %v1147_v63  ;;  %v1360_v20 = vmax.f32 %v1351_v12, 0.0  ;;  %v1333_v59 = vmul.f32 %v2623_v6, %v1314_v3 }
 0x144   :  { %v1083_v7 = vpop.f32.mrf.mxu2 }
 0x145   :  { %v1116_v8 = vpop.f32.mrf.mxu3  ;;  %v1183_v9 = vadd.f32 %v2618_v1, %v1170_v16  ;;  %v1084_v10 = vadd.f32 %v1083_v7, %v2594_v42 }
 0x147   :  { %v1339_v55 = vadd.f32 %v1330_v34, %v1183_v9  ;;  %v1117_v14 = vadd.f32 %v1116_v8, %v1084_v10 }
 0x149   :  { %v1352_v26 = vadd.f32 %v2631_v39, %v1339_v55  ;;  %v1150_v15 = vadd.f32 %v1149_v36, %v1117_v14  ;;  %v1156_v18 = vpop.f32.mrf.mxu0 }
 0x14a   :  { %v1316_v19 = vpop.f32.mrf.mxu1 }
 0x14b   :  { %v1361_v37 = vmax.f32 %v1352_v26, 0.0  ;;  %v1171_v22 = vmul.f32 %v2612_v21, %v1150_v15  ;;  %v1334_v5 = vmul.f32 %v2623_v6, %v1316_v19 }
 0x14c   :  { %v1085_v25 = vpop.f32.mrf.mxu2 }
 0x14d   :  { %v1118_v28 = vpop.f32.mrf.mxu3  ;;  %v1997_v29 = vpack.c.bf16 %v1361_v37, %v1360_v20  ;;  %v1086_v24 = vadd.f32 %v1085_v25, %v2597_v49  ;;  %v1184_v42 = vadd.f32 %v2618_v1, %v1171_v22  ;;  %v1332_v49 = vmul.f32 %v2623_v6, %v1311_v58 }
 0x14f   :  { %2009 = vst [vmem:[%s2696_s8 + $0x8] sm:$0xff] %v1997_v29   ;;  %v1119_v31 = vadd.f32 %v1118_v28, %v1086_v24  ;;  %v1340_v36 = vadd.f32 %v1331_v30, %v1184_v42 }
 0x151   :  { %v1152_v32 = vadd.f32 %v1151_v51, %v1119_v31  ;;  %v1159_v33 = vpop.f32.mrf.mxu0  ;;  %v1353_v44 = vadd.f32 %v2631_v39, %v1340_v36 }
 0x152   :  { %v1319_v35 = vpop.f32.mrf.mxu1 }
 0x153   :  { %v1172_v38 = vmul.f32 %v2612_v21, %v1152_v32  ;;  %v1362_v50 = vmax.f32 %v1353_v44, 0.0  ;;  %v1335_v55 = vmul.f32 %v2623_v6, %v1319_v35 }
 0x154   :  { %v1088_v40 = vpop.f32.mrf.mxu2 }
 0x155   :  { %v1121_v41 = vpop.f32.mrf.mxu3  ;;  %v1185_v43 = vadd.f32 %v2618_v1, %v1172_v38  ;;  %v1089_v17 = vadd.f32 %v1088_v40, %v2600_v57 }
 0x157   :  { %v1341_v23 = vadd.f32 %v1332_v49, %v1185_v43  ;;  %v1122_v45 = vadd.f32 %v1121_v41, %v1089_v17 }
 0x159   :  { %v1354_v13 = vadd.f32 %v2631_v39, %v1341_v23  ;;  %v1155_v46 = vadd.f32 %v1154_v0, %v1122_v45  ;;  %v1161_v47 = vpop.f32.mrf.mxu0 }
 0x15a   :  { %v1321_v48 = vpop.f32.mrf.mxu1 }
 0x15b   :  { %v1363_v51 = vmax.f32 %v1354_v13, 0.0  ;;  %v1173_v52 = vmul.f32 %v2612_v21, %v1155_v46 }
 0x15c   :  { %v1090_v53 = vpop.f32.mrf.mxu2 }
 0x15d   :  { %v1123_v54 = vpop.f32.mrf.mxu3  ;;  %v2002_v56 = vpack.c.bf16 %v1363_v51, %v1362_v50  ;;  %v1091_v58 = vadd.f32 %v1090_v53, %v2603_v2  ;;  %v1186_v57 = vadd.f32 %v2618_v1, %v1173_v52 }
 0x15f   :  { %2010 = vst [vmem:[%s2696_s8 + $0x10] sm:$0xff] %v2002_v56   ;;  %v1124_v60 = vadd.f32 %v1123_v54, %v1091_v58  ;;  %v1342_v27 = vadd.f32 %v1333_v59, %v1186_v57 }
 0x161   :  { %v1157_v4 = vadd.f32 %v1156_v18, %v1124_v60  ;;  %v1355_v16 = vadd.f32 %v2631_v39, %v1342_v27 }
 0x163   :  { %v1174_v61 = vmul.f32 %v2612_v21, %v1157_v4  ;;  %v1364_v34 = vmax.f32 %v1355_v16, 0.0 }
 0x164   :  { %v1093_v62 = vpop.f32.mrf.mxu2 }
 0x165   :  { %v1126_v63 = vpop.f32.mrf.mxu3  ;;  %v1187_v0 = vadd.f32 %v2618_v1, %v1174_v61  ;;  %v1094_v2 = vadd.f32 %v1093_v62, %v2606_v11 }
 0x167   :  { %v1343_v7 = vadd.f32 %v1334_v5, %v1187_v0  ;;  %v1127_v8 = vadd.f32 %v1126_v63, %v1094_v2 }
 0x169   :  { %v1356_v9 = vadd.f32 %v2631_v39, %v1343_v7  ;;  %v1160_v3 = vadd.f32 %v1159_v33, %v1127_v8 }
 0x16b   :  { %v1365_v10 = vmax.f32 %v1356_v9, 0.0  ;;  %v1175_v12 = vmul.f32 %v2612_v21, %v1160_v3 }
 0x16c   :  { %v1095_v14 = vpop.f32.mrf.mxu2 }
 0x16d   :  { %v1128_v26 = vpop.f32.mrf.mxu3  ;;  %v2007_v15 = vpack.c.bf16 %v1365_v10, %v1364_v34  ;;  %v1188_v18 = vadd.f32 %v2618_v1, %v1175_v12 }
 0x16f   :  { %2011 = vst [vmem:[%s2696_s8 + $0x18] sm:$0xff] %v2007_v15   ;;  %v1344_v11 = vadd.f32 %v1335_v55, %v1188_v18 }
 0x171   :  { %v1357_v19 = vadd.f32 %v2631_v39, %v1344_v11 }
 0x173   :  { %v1366_v20 = vmax.f32 %v1357_v19, 0.0 }
 0x175   :  { %v1375_v37 = vpack.c.bf16 %v1366_v20, %v1366_v20 }
 0x177   :  { %1384 = vst [vmem:[%s2696_s8 + $0x20] sm:$0xf] %v1375_v37 }

// kernel: model_forward.11
= control target key start
LH: loop header
LB: loop body
LE: loop exit
PB: predicated region body
PF: predicated region fallthrough
CT: control target
= control target key end

     0   :  { %s2334_s1 = inlined_call_operand.vmem [shape: bf16[1152,128], index: 1, kind: input, shape index: {}]   ;;  %s2335_s0 = inlined_call_operand.vmem [shape: bf16[72,1152], index: 0, kind: input, shape index: {}]   ;;  %s2336_s2 = inlined_call_operand.vmem [shape: f32[1,128], index: 2, kind: input, shape index: {}]   ;;  %s2337_s3 = inlined_call_operand.vmem [shape: f32[1,128], index: 3, kind: input, shape index: {}]   ;;  %s2338_s4 = inlined_call_operand.vmem [shape: f32[72,128], index: 4, kind: output, shape index: {}]  }
   0x1   :  { %v1674_v0 = vld [vmem:[%s2334_s1 + $0x38] sm:$0xff]  ;;  %v1673_v1 = vld [vmem:[%s2334_s1 + $0x30] sm:$0xff]  ;;  %v1672_v4 = vld [vmem:[%s2334_s1 + $0x28] sm:$0xff] }
   0x2   :  { %854 = vmatpush.bf16.msra.mxu0 %v1674_v0  ;;  %1739 = vmatpush.bf16.msra.mxu1 %v1674_v0  ;;  %v1698_v2 = vld [vmem:[%s2334_s1 + $0xf8] sm:$0xff]  ;;  %v1697_v3 = vld [vmem:[%s2334_s1 + $0xf0] sm:$0xff]  ;;  %v1696_v5 = vld [vmem:[%s2334_s1 + $0xe8] sm:$0xff] }
   0x3   :  { %1740 = vmatpush.bf16.msra.mxu2 %v1674_v0  ;;  %953 = vmatpush.bf16.msra.mxu3 %v1698_v2  ;;  %v1671_v6 = vld [vmem:[%s2334_s1 + $0x20] sm:$0xff]  ;;  %v1670_v8 = vld [vmem:[%s2334_s1 + $0x18] sm:$0xff]  ;;  %v1669_v10 = vld [vmem:[%s2334_s1 + $0x10] sm:$0xff] }
   0x4   :  { %v1695_v7 = vld [vmem:[%s2334_s1 + $0xe0] sm:$0xff]  ;;  %v1694_v9 = vld [vmem:[%s2334_s1 + $0xd8] sm:$0xff]  ;;  %v1693_v11 = vld [vmem:[%s2334_s1 + $0xd0] sm:$0xff] }
   0x5   :  { %v1668_v12 = vld [vmem:[%s2334_s1 + $0x8] sm:$0xff]  ;;  %v1824_v13 = vld [vmem:[%s2335_s0 + $0x120] sm:$0xff]  ;;  %v1273_v18 = vld [vmem:[%s2335_s0 + $0x90] sm:$0xf] }
   0x6   :  { %855 = vmatpush.bf16.msra.mxu0 %v1673_v1  ;;  %1741 = vmatpush.bf16.msra.mxu1 %v1673_v1  ;;  %v1692_v14 = vld [vmem:[%s2334_s1 + $0xc8] sm:$0xff]  ;;  %v1667_v15 = vld [vmem:[%s2334_s1] sm:$0xff]  ;;  %v1653_v19 = vld [vmem:[%s2335_s0 + $0xb0] sm:$0xf0]  ;;  %v323_v20 = vunpack.c.l.b16 %v1824_v13 }
   0x7   :  { %1742 = vmatpush.bf16.msra.mxu2 %v1673_v1  ;;  %954 = vmatpush.bf16.msra.mxu3 %v1697_v3  ;;  %v1201_v16 = vld [vmem:[%s2335_s0] sm:$0xf]  ;;  %v1635_v17 = vld [vmem:[%s2335_s0 + $0x20] sm:$0xf0]  ;;  %v1682_v21 = vld [vmem:[%s2334_s1 + $0x78] sm:$0xff]  ;;  %v1274_v25 = vor.u32 %v1653_v19, %v1273_v18 }
   0x8   :  { %v1690_v22 = vld [vmem:[%s2334_s1 + $0xb8] sm:$0xff]  ;;  %v1202_v24 = vor.u32 %v1635_v17, %v1201_v16  ;;  %v368_v26 = vpack.c.b16 %v323_v20, %v323_v20  ;;  %v1691_v27 = vld [vmem:[%s2334_s1 + $0xc0] sm:$0xff]  ;;  %v1632_v28 = vld [vmem:[%s2335_s0 + $0xc] sm:$0xf] }
   0x9   :  { %v1706_v23 = vld [vmem:[%s2334_s1 + $0x138] sm:$0xff]  ;;  %v1211_v29 = vld [vmem:[%s2335_s0 + $0x2c] sm:$0xf0]  ;;  %v1680_v35 = vld [vmem:[%s2334_s1 + $0x68] sm:$0xff] }
   0xa   :  { %856 = vmatpush.bf16.msra.mxu0 %v1672_v4  ;;  %1743 = vmatpush.bf16.msra.mxu1 %v1672_v4  ;;  %v1681_v30 = vld [vmem:[%s2334_s1 + $0x70] sm:$0xff]  ;;  %v1730_v31 = vld [vmem:[%s2334_s1 + $0x1f8] sm:$0xff]  ;;  %v1214_v34 = vor.u32 %v1632_v28, %v1211_v29  ;;  %v1688_v37 = vld [vmem:[%s2334_s1 + $0xa8] sm:$0xff] }
   0xb   :  { %1744 = vmatpush.bf16.msra.mxu2 %v1672_v4  ;;  %955 = vmatpush.bf16.msra.mxu3 %v1696_v5  ;;  %v1689_v32 = vld [vmem:[%s2334_s1 + $0xb0] sm:$0xff]  ;;  %v1704_v38 = vld [vmem:[%s2334_s1 + $0x128] sm:$0xff]  ;;  %v1679_v39 = vld [vmem:[%s2334_s1 + $0x60] sm:$0xff] }
   0xc   :  { %v1705_v33 = vld [vmem:[%s2334_s1 + $0x130] sm:$0xff]  ;;  %v1687_v40 = vld [vmem:[%s2334_s1 + $0xa0] sm:$0xff]  ;;  %v1237_v42 = vld [vmem:[%s2335_s0 + $0x48] sm:$0xf] }
   0xd   :  { %v1729_v36 = vld [vmem:[%s2334_s1 + $0x1f0] sm:$0xff]  ;;  %v1703_v41 = vld [vmem:[%s2334_s1 + $0x120] sm:$0xff]  ;;  %v1644_v43 = vld [vmem:[%s2335_s0 + $0x68] sm:$0xf0] }
   0xe   :  { %857 = vmatpush.bf16.msra.mxu0 %v1671_v6  ;;  %1745 = vmatpush.bf16.msra.mxu1 %v1671_v6  ;;  %v1309_v44 = vld [vmem:[%s2335_s0 + $0xd8] sm:$0xf]  ;;  %v1662_v45 = vld [vmem:[%s2335_s0 + $0xf8] sm:$0xf0]  ;;  %v1238_v49 = vor.u32 %v1644_v43, %v1237_v42  ;;  %v1641_v51 = vld [vmem:[%s2335_s0 + $0x54] sm:$0xf] }
   0xf   :  { %1746 = vmatpush.bf16.msra.mxu2 %v1671_v6  ;;  %956 = vmatpush.bf16.msra.mxu3 %v1695_v7  ;;  %v1678_v46 = vld [vmem:[%s2334_s1 + $0x58] sm:$0xff]  ;;  %v1310_v50 = vor.u32 %v1662_v45, %v1309_v44  ;;  %v1677_v53 = vld [vmem:[%s2334_s1 + $0x50] sm:$0xff]  ;;  %v1728_v57 = vld [vmem:[%s2334_s1 + $0x1e8] sm:$0xff] }
  0x10   :  { %v1686_v47 = vld [vmem:[%s2334_s1 + $0x98] sm:$0xff]  ;;  %v1685_v54 = vld [vmem:[%s2334_s1 + $0x90] sm:$0xff]  ;;  %v1676_v58 = vld [vmem:[%s2334_s1 + $0x48] sm:$0xff] }
  0x11   :  { %v1702_v48 = vld [vmem:[%s2334_s1 + $0x118] sm:$0xff]  ;;  %v1701_v55 = vld [vmem:[%s2334_s1 + $0x110] sm:$0xff]  ;;  %v1684_v59 = vld [vmem:[%s2334_s1 + $0x88] sm:$0xff] }
  0x12   :  { %858 = vmatpush.bf16.msra.mxu0 %v1670_v8  ;;  %1747 = vmatpush.bf16.msra.mxu1 %v1670_v8  ;;  %v1247_v52 = vld [vmem:[%s2335_s0 + $0x74] sm:$0xf0]  ;;  %v1700_v60 = vld [vmem:[%s2334_s1 + $0x108] sm:$0xff]  ;;  %v1683_v61 = vld [vmem:[%s2334_s1 + $0x80] sm:$0xff] }
  0x13   :  { %1748 = vmatpush.bf16.msra.mxu2 %v1670_v8  ;;  %957 = vmatpush.bf16.msra.mxu3 %v1694_v9  ;;  %v1250_v56 = vor.u32 %v1641_v51, %v1247_v52  ;;  %v1675_v62 = vld [vmem:[%s2334_s1 + $0x40] sm:$0xff]  ;;  %v1209_v63 = vld [vmem:[%s2335_s0 + $0x8] sm:$0xf]  ;;  %v1636_v0 = vld [vmem:[%s2335_s0 + $0x28] sm:$0xf0] }
  0x14   :  { %v1699_v1 = vld [vmem:[%s2334_s1 + $0x100] sm:$0xff]  ;;  %v1722_v2 = vld [vmem:[%s2334_s1 + $0x1b8] sm:$0xff]  ;;  %v1203_v4 = vld [vmem:[%s2335_s0 + $0x24] sm:$0xf0]  ;;  %v1210_v9 = vor.u32 %v1636_v0, %v1209_v63 }
  0x15   :  { %v1631_v3 = vld [vmem:[%s2335_s0 + $0x4] sm:$0xf]  ;;  %v1714_v5 = vld [vmem:[%s2334_s1 + $0x178] sm:$0xff]  ;;  %v1217_v6 = vld [vmem:[%s2335_s0 + $0x10] sm:$0xf] }
  0x16   :  { %859 = vmatpush.bf16.msra.mxu0 %v1669_v10  ;;  %1749 = vmatpush.bf16.msra.mxu1 %v1669_v10  ;;  %v1637_v7 = vld [vmem:[%s2335_s0 + $0x30] sm:$0xf0]  ;;  %v1738_v8 = vld [vmem:[%s2334_s1 + $0x238] sm:$0xff]  ;;  %v1283_v16 = vld [vmem:[%s2335_s0 + $0xbc] sm:$0xf0] }
  0x17   :  { %1750 = vmatpush.bf16.msra.mxu2 %v1669_v10  ;;  %958 = vmatpush.bf16.msra.mxu3 %v1693_v11  ;;  %v1206_v10 = vor.u32 %v1631_v3, %v1203_v4  ;;  %v1218_v11 = vor.u32 %v1637_v7, %v1217_v6  ;;  %v1737_v17 = vld [vmem:[%s2334_s1 + $0x230] sm:$0xff]  ;;  %v1727_v18 = vld [vmem:[%s2334_s1 + $0x1e0] sm:$0xff]  ;;  %v1720_v20 = vld [vmem:[%s2334_s1 + $0x1a8] sm:$0xff] }
  0x18   :  { %v1645_v28 = vld [vmem:[%s2335_s0 + $0x70] sm:$0xf0]  ;;  %v1640_v29 = vld [vmem:[%s2335_s0 + $0x4c] sm:$0xf]  ;;  %v1275_v51 = vld [vmem:[%s2335_s0 + $0xb4] sm:$0xf0] }
  0x19   :  { %v1725_v43 = vld [vmem:[%s2334_s1 + $0x1d0] sm:$0xff]  ;;  %v1716_v45 = vld [vmem:[%s2334_s1 + $0x188] sm:$0xff]  ;;  %v1289_v52 = vld [vmem:[%s2335_s0 + $0xa0] sm:$0xf] }
  0x1a   :  { %860 = vmatpush.bf16.msra.mxu0 %v1668_v12  ;;  %1751 = vmatpush.bf16.msra.mxu1 %v1668_v12  ;;  %v1709_v44 = vld [vmem:[%s2334_s1 + $0x150] sm:$0xff]  ;;  %v1723_v63 = vld [vmem:[%s2334_s1 + $0x1c0] sm:$0xff]  ;;  %v1658_v3 = vld [vmem:[%s2335_s0 + $0xdc] sm:$0xf] }
  0x1b   :  { %1752 = vmatpush.bf16.msra.mxu2 %v1668_v12  ;;  %959 = vmatpush.bf16.msra.mxu3 %v1692_v14  ;;  %v1721_v12 = vld [vmem:[%s2334_s1 + $0x1b0] sm:$0xff]  ;;  %v1707_v0 = vld [vmem:[%s2334_s1 + $0x140] sm:$0xff]  ;;  %v1664_v6 = vld [vmem:[%s2335_s0 + $0x108] sm:$0xf0] }
  0x1c   :  { %v1713_v14 = vld [vmem:[%s2334_s1 + $0x170] sm:$0xff]  ;;  %v1311_v4 = vld [vmem:[%s2335_s0 + $0xfc] sm:$0xf0] }
  0x1e   :  { %861 = vmatpush.bf16.msra.mxu0 %v1667_v15  ;;  %1753 = vmatpush.bf16.msra.mxu1 %v1667_v15 }
  0x1f   :  { %1754 = vmatpush.bf16.msra.mxu2 %v1667_v15  ;;  %960 = vmatpush.bf16.msra.mxu3 %v1691_v27  ;;  %v1650_v15 = vld [vmem:[%s2335_s0 + $0x9c] sm:$0xf]  ;;  %v1245_v27 = vld [vmem:[%s2335_s0 + $0x50] sm:$0xf] }
  0x20   :  { %v1286_v19 = vor.u32 %v1650_v15, %v1283_v16  ;;  %v2136_v15 = vld [vmem:[%s2335_s0 + $0x130] sm:$0xff] }
  0x21   :  { %862 = vmatmul.bf16.vlgmr.msra.gmra.mxu0 %v1202_v24  ;;  %872 = vmatmul.bf16.vlgmr.msra.gmra.mxu1 %v1274_v25  ;;  %v1719_v24 = vld [vmem:[%s2334_s1 + $0x1a0] sm:$0xff] }
  0x22   :  { %887 = vmatpush.bf16.msrb.mxu1 %v1682_v21  ;;  %986 = vmatpush.bf16.msrb.mxu0 %v1706_v23  ;;  %v1712_v21 = vld [vmem:[%s2334_s1 + $0x168] sm:$0xff]  ;;  %v1726_v23 = vld [vmem:[%s2334_s1 + $0x1d8] sm:$0xff]  ;;  %v1711_v25 = vld [vmem:[%s2334_s1 + $0x160] sm:$0xff] }
  0x23   :  { %920 = vmatpush.bf16.msrb.mxu2 %v1690_v22  ;;  %1085 = vmatpush.bf16.msrb.mxu3 %v1730_v31  ;;  %v1736_v22 = vld [vmem:[%s2334_s1 + $0x228] sm:$0xff]  ;;  %v1253_v31 = vld [vmem:[%s2335_s0 + $0x58] sm:$0xf] }
  0x24   :  { %882 = vmatmul.bf16.vlgmr.msra.gmra.mxu2 %v368_v26  ;;  %961 = vmatmul.bf16.vlgmr.msra.gmra.mxu3 %v1214_v34  ;;  %v1735_v26 = vld [vmem:[%s2334_s1 + $0x220] sm:$0xff]  ;;  %v1710_v34 = vld [vmem:[%s2334_s1 + $0x158] sm:$0xff] }
  0x26   :  { %888 = vmatpush.bf16.msrb.mxu1 %v1681_v30  ;;  %987 = vmatpush.bf16.msrb.mxu0 %v1705_v33  ;;  %v1239_v30 = vld [vmem:[%s2335_s0 + $0x6c] sm:$0xf0]  ;;  %v1718_v33 = vld [vmem:[%s2334_s1 + $0x198] sm:$0xff] }
  0x27   :  { %921 = vmatpush.bf16.msrb.mxu2 %v1689_v32  ;;  %1086 = vmatpush.bf16.msrb.mxu3 %v1729_v36  ;;  %v1646_v32 = vld [vmem:[%s2335_s0 + $0x78] sm:$0xf0]  ;;  %v1242_v36 = vor.u32 %v1640_v29, %v1239_v30  ;;  %v1639_v29 = vld [vmem:[%s2335_s0 + $0x40] sm:$0xf0] }
  0x2a   :  { %889 = vmatpush.bf16.msrb.mxu1 %v1680_v35  ;;  %988 = vmatpush.bf16.msrb.mxu0 %v1704_v38  ;;  %v1246_v35 = vor.u32 %v1645_v28, %v1245_v27  ;;  %v1659_v38 = vld [vmem:[%s2335_s0 + $0xe4] sm:$0xf]  ;;  %v1219_v27 = vld [vmem:[%s2335_s0 + $0x34] sm:$0xf0]  ;;  %v1233_v28 = vld [vmem:[%s2335_s0 + $0x20] sm:$0xf] }
  0x2b   :  { %922 = vmatpush.bf16.msrb.mxu2 %v1688_v37  ;;  %1087 = vmatpush.bf16.msrb.mxu3 %v1728_v57  ;;  %v1254_v37 = vor.u32 %v1646_v32, %v1253_v31  ;;  %v1234_v32 = vor.u32 %v1639_v29, %v1233_v28  ;;  %v61_v28 = vld [vmem:[%s2335_s0 + $0x140] sm:$0xf] }
  0x2e   :  { %890 = vmatpush.bf16.msrb.mxu1 %v1679_v39  ;;  %989 = vmatpush.bf16.msrb.mxu0 %v1703_v41  ;;  %v1319_v39 = vld [vmem:[%s2335_s0 + $0x104] sm:$0xf0]  ;;  %v1734_v41 = vld [vmem:[%s2334_s1 + $0x218] sm:$0xff] }
  0x2f   :  { %923 = vmatpush.bf16.msrb.mxu2 %v1687_v40  ;;  %1088 = vmatpush.bf16.msrb.mxu3 %v1727_v18  ;;  %v1717_v40 = vld [vmem:[%s2334_s1 + $0x190] sm:$0xff]  ;;  %v1322_v42 = vor.u32 %v1659_v38, %v1319_v39  ;;  %v327_v18 = vunpack.c.l.b16 %v2136_v15  ;;  %v1642_v38 = vld [vmem:[%s2335_s0 + $0x5c] sm:$0xf]  ;;  %v1255_v39 = vld [vmem:[%s2335_s0 + $0x7c] sm:$0xf0] }
  0x31   :  { %867 = vmatmul.bf16.gmra.mxu0 %v1238_v49  ;;  %877 = vmatmul.bf16.gmra.mxu1 %v1310_v50  ;;  %v1654_v49 = vld [vmem:[%s2335_s0 + $0xb8] sm:$0xf0]  ;;  %v1649_v50 = vld [vmem:[%s2335_s0 + $0x94] sm:$0xf] }
  0x32   :  { %891 = vmatpush.bf16.msrb.mxu1 %v1678_v46  ;;  %990 = vmatpush.bf16.msrb.mxu0 %v1702_v48  ;;  %v1733_v46 = vld [vmem:[%s2334_s1 + $0x210] sm:$0xff]  ;;  %v1281_v48 = vld [vmem:[%s2335_s0 + $0x98] sm:$0xf] }
  0x33   :  { %924 = vmatpush.bf16.msrb.mxu2 %v1686_v47  ;;  %1089 = vmatpush.bf16.msrb.mxu3 %v1726_v23  ;;  %v1724_v47 = vld [vmem:[%s2334_s1 + $0x1c8] sm:$0xff] }
  0x34   :  { %966 = vmatmul.bf16.gmra.mxu3 %v1250_v56  ;;  %v1278_v56 = vor.u32 %v1649_v50, %v1275_v51  ;;  %v1263_v23 = vld [vmem:[%s2335_s0 + $0x84] sm:$0xf0] }
  0x36   :  { %892 = vmatpush.bf16.msrb.mxu1 %v1677_v53  ;;  %991 = vmatpush.bf16.msrb.mxu0 %v1701_v55  ;;  %v1655_v53 = vld [vmem:[%s2335_s0 + $0xc0] sm:$0xf0]  ;;  %v1282_v55 = vor.u32 %v1654_v49, %v1281_v48  ;;  %v1335_v48 = vld [vmem:[%s2335_s0 + $0x114] sm:$0xf0] }
  0x37   :  { %925 = vmatpush.bf16.msrb.mxu2 %v1685_v54  ;;  %1090 = vmatpush.bf16.msrb.mxu3 %v1725_v43  ;;  %v58_v54 = vld [vmem:[%s2335_s0 + $0x128] sm:$0xff]  ;;  %v1290_v57 = vor.u32 %v1655_v53, %v1289_v52  ;;  %v1258_v43 = vor.u32 %v1642_v38, %v1255_v39 }
  0x38   :  { %v325_v16 = vunpack.c.l.b16 %v58_v54  ;;  %v1297_v53 = vld [vmem:[%s2335_s0 + $0xa8] sm:$0xf] }
  0x3a   :  { %893 = vmatpush.bf16.msrb.mxu1 %v1676_v58  ;;  %992 = vmatpush.bf16.msrb.mxu0 %v1700_v60  ;;  %v326_v58 = vunpack.c.h.b16 %v58_v54  ;;  %v1656_v54 = vld [vmem:[%s2335_s0 + $0xc8] sm:$0xf0] }
  0x3b   :  { %926 = vmatpush.bf16.msrb.mxu2 %v1684_v59  ;;  %1091 = vmatpush.bf16.msrb.mxu3 %v1724_v47  ;;  %v1708_v59 = vld [vmem:[%s2334_s1 + $0x148] sm:$0xff]  ;;  %v1661_v47 = vld [vmem:[%s2335_s0 + $0xf4] sm:$0xf] }
  0x3c   :  { %v371_v60 = vpack.c.b16 %v326_v58, %v326_v58  ;;  %v1338_v49 = vor.u32 %v1661_v47, %v1335_v48  ;;  %v1305_v58 = vld [vmem:[%s2335_s0 + $0xb0] sm:$0xf] }
  0x3e   :  { %894 = vmatpush.bf16.msrb.mxu1 %v1675_v62  ;;  %993 = vmatpush.bf16.msrb.mxu0 %v1699_v1  ;;  %v1732_v62 = vld [vmem:[%s2334_s1 + $0x208] sm:$0xff]  ;;  %v1317_v1 = vld [vmem:[%s2335_s0 + $0xe0] sm:$0xf] }
  0x3f   :  { %927 = vmatpush.bf16.msrb.mxu2 %v1683_v61  ;;  %v1715_v61 = vld [vmem:[%s2334_s1 + $0x180] sm:$0xff]  ;;  %1092 = vmatpush.bf16.msrb.mxu3 %v1723_v63 }
  0x41   :  { %895 = vmatmul.bf16.vlgmr.msrb.gmra.mxu1 %v1206_v10  ;;  %994 = vmatmul.bf16.vlgmr.msrb.gmra.mxu0 %v1218_v11  ;;  %v1731_v10 = vld [vmem:[%s2334_s1 + $0x200] sm:$0xff]  ;;  %v1634_v11 = vld [vmem:[%s2335_s0 + $0x1c] sm:$0xf] }
  0x42   :  { %1019 = vmatpush.bf16.msra.mxu1 %v1714_v5  ;;  %1118 = vmatpush.bf16.msra.mxu0 %v1738_v8  ;;  %v1325_v5 = vld [vmem:[%s2335_s0 + $0xe8] sm:$0xf]  ;;  %v1314_v8 = vor.u32 %v1658_v3, %v1311_v4 }
  0x43   :  { %1052 = vmatpush.bf16.msra.mxu2 %v1722_v2  ;;  %v1663_v2 = vld [vmem:[%s2335_s0 + $0x100] sm:$0xf0] }
  0x44   :  { %928 = vmatmul.bf16.vlgmr.msrb.gmra.mxu2 %v1210_v9  ;;  %971 = vmatmul.bf16.gmra.mxu3 %v1286_v19  ;;  %v1318_v7 = vor.u32 %v1663_v2, %v1317_v1  ;;  %v1326_v9 = vor.u32 %v1664_v6, %v1325_v5  ;;  %v370_v19 = vpack.c.b16 %v325_v16, %v325_v16  ;;  %v1666_v16 = vld [vmem:[%s2335_s0 + $0x118] sm:$0xf0] }
  0x46   :  { %1020 = vmatpush.bf16.msra.mxu1 %v1713_v14  ;;  %1119 = vmatpush.bf16.msra.mxu0 %v1737_v17  ;;  %v324_v17 = vunpack.c.h.b16 %v1824_v13  ;;  %v1225_v13 = vld [vmem:[%s2335_s0 + $0x18] sm:$0xf] }
  0x47   :  { %1053 = vmatpush.bf16.msra.mxu2 %v1721_v12  ;;  %v1227_v12 = vld [vmem:[%s2335_s0 + $0x3c] sm:$0xf0] }
  0x48   :  { %v1230_v14 = vor.u32 %v1634_v11, %v1227_v12  ;;  %v1660_v11 = vld [vmem:[%s2335_s0 + $0xec] sm:$0xf]  ;;  %v1327_v12 = vld [vmem:[%s2335_s0 + $0x10c] sm:$0xf0] }
  0x4a   :  { %1021 = vmatpush.bf16.msra.mxu1 %v1712_v21  ;;  %1120 = vmatpush.bf16.msra.mxu0 %v1736_v22  ;;  %v372_v21 = vpack.c.b16 %v327_v18, %v327_v18  ;;  %v1643_v22 = vld [vmem:[%s2335_s0 + $0x64] sm:$0xf]  ;;  %v1330_v18 = vor.u32 %v1660_v11, %v1327_v12 }
  0x4b   :  { %1054 = vmatpush.bf16.msra.mxu2 %v1720_v20  ;;  %v369_v20 = vpack.c.b16 %v324_v17, %v324_v17 }
  0x4e   :  { %1022 = vmatpush.bf16.msra.mxu1 %v1711_v25  ;;  %1121 = vmatpush.bf16.msra.mxu0 %v1735_v26  ;;  %v1638_v25 = vld [vmem:[%s2335_s0 + $0x38] sm:$0xf0]  ;;  %v1633_v26 = vld [vmem:[%s2335_s0 + $0x14] sm:$0xf] }
  0x4f   :  { %1055 = vmatpush.bf16.msra.mxu2 %v1719_v24  ;;  %v1266_v24 = vor.u32 %v1643_v22, %v1263_v23  ;;  %v1226_v30 = vor.u32 %v1638_v25, %v1225_v13  ;;  %v1222_v31 = vor.u32 %v1633_v26, %v1219_v27 }
  0x51   :  { %900 = vmatmul.bf16.gmra.mxu1 %v1242_v36  ;;  %999 = vmatmul.bf16.gmra.mxu0 %v1254_v37  ;;  %v1261_v36 = vld [vmem:[%s2335_s0 + $0x60] sm:$0xf]  ;;  %v1647_v37 = vld [vmem:[%s2335_s0 + $0x80] sm:$0xf0] }
  0x52   :  { %1023 = vmatpush.bf16.msra.mxu1 %v1710_v34  ;;  %1122 = vmatpush.bf16.msra.mxu0 %v1734_v41  ;;  %v1299_v34 = vld [vmem:[%s2335_s0 + $0xcc] sm:$0xf0]  ;;  %v1648_v41 = vld [vmem:[%s2335_s0 + $0x88] sm:$0xf0] }
  0x53   :  { %1056 = vmatpush.bf16.msra.mxu2 %v1718_v33  ;;  %v1652_v33 = vld [vmem:[%s2335_s0 + $0xac] sm:$0xf] }
  0x54   :  { %933 = vmatmul.bf16.gmra.mxu2 %v1246_v35  ;;  %976 = vmatmul.bf16.gmra.mxu3 %v1322_v42  ;;  %v1302_v35 = vor.u32 %v1652_v33, %v1299_v34  ;;  %v1262_v42 = vor.u32 %v1647_v37, %v1261_v36  ;;  %v328_v33 = vunpack.c.h.b16 %v2136_v15  ;;  %v331_v34 = vunpack.c.l.b16 %v61_v28 }
  0x56   :  { %1024 = vmatpush.bf16.msra.mxu1 %v1709_v44  ;;  %1123 = vmatpush.bf16.msra.mxu0 %v1733_v46  ;;  %v373_v39 = vpack.c.b16 %v328_v33, %v328_v33 }
  0x57   :  { %1057 = vmatpush.bf16.msra.mxu2 %v1717_v40  ;;  %v1269_v40 = vld [vmem:[%s2335_s0 + $0x68] sm:$0xf] }
  0x58   :  { %v1270_v44 = vor.u32 %v1648_v41, %v1269_v40  ;;  %v376_v40 = vpack.c.b16 %v331_v34, %v331_v34 }
  0x5a   :  { %1025 = vmatpush.bf16.msra.mxu1 %v1708_v59  ;;  %1124 = vmatpush.bf16.msra.mxu0 %v1732_v62  ;;  %v1657_v59 = vld [vmem:[%s2335_s0 + $0xd0] sm:$0xf0] }
  0x5b   :  { %1058 = vmatpush.bf16.msra.mxu2 %v1716_v45 }
  0x5e   :  { %1026 = vmatpush.bf16.msra.mxu1 %v1707_v0  ;;  %1125 = vmatpush.bf16.msra.mxu0 %v1731_v10  ;;  %v1306_v0 = vor.u32 %v1657_v59, %v1305_v58 }
  0x5f   :  { %1059 = vmatpush.bf16.msra.mxu2 %v1715_v61  ;;  %v1298_v61 = vor.u32 %v1656_v54, %v1297_v53 }
  0x61   :  { %905 = vmatmul.bf16.gmra.mxu1 %v1278_v56  ;;  %1004 = vmatmul.bf16.gmra.mxu0 %v1290_v57  ;;  %v1651_v56 = vld [vmem:[%s2335_s0 + $0xa4] sm:$0xf]  ;;  %v1291_v57 = vld [vmem:[%s2335_s0 + $0xc4] sm:$0xf0] }
  0x62   :  { %v1294_v63 = vor.u32 %v1651_v56, %v1291_v57 }
  0x64   :  { %938 = vmatmul.bf16.gmra.mxu2 %v1282_v55  ;;  %981 = vmatmul.bf16.gmra.mxu3 %v371_v60  ;;  %v60_v60 = vld [vmem:[%s2335_s0 + $0x138] sm:$0xff] }
  0x65   :  { %v330_v1 = vunpack.c.h.b16 %v60_v60 }
  0x67   :  { %v375_v5 = vpack.c.b16 %v330_v1, %v330_v1 }
  0x71   :  { %910 = vmatmul.bf16.gmra.mxu1 %v1314_v8  ;;  %1009 = vmatmul.bf16.gmra.mxu0 %v1326_v9  ;;  %v1333_v8 = vld [vmem:[%s2335_s0 + $0xf0] sm:$0xf]  ;;  %v1665_v9 = vld [vmem:[%s2335_s0 + $0x110] sm:$0xf0] }
  0x72   :  { %v1334_v17 = vor.u32 %v1665_v9, %v1333_v8 }
  0x74   :  { %943 = vmatmul.bf16.gmra.mxu2 %v1318_v7  ;;  %1093 = vmatmul.bf16.vlgmr.msrb.gmra.mxu3 %v1230_v14  ;;  %v1341_v14 = vld [vmem:[%s2335_s0 + $0xf8] sm:$0xf] }
  0x81   :  { %915 = vmatmul.bf16.gmra.mxu1 %v369_v20  ;;  %1014 = vmatmul.bf16.gmra.mxu0 %v372_v21 }
  0x84   :  { %948 = vmatmul.bf16.gmra.mxu2 %v370_v19  ;;  %1098 = vmatmul.bf16.gmra.mxu3 %v1266_v24  ;;  %v1342_v19 = vor.u32 %v1666_v16, %v1341_v14 }
  0x91   :  { %1027 = vmatmul.bf16.vlgmr.msra.gmra.mxu1 %v1222_v31  ;;  %1126 = vmatmul.bf16.vlgmr.msra.gmra.mxu0 %v1234_v32 }
  0x94   :  { %1060 = vmatmul.bf16.vlgmr.msra.gmra.mxu2 %v1226_v30  ;;  %1103 = vmatmul.bf16.gmra.mxu3 %v1302_v35  ;;  %v329_v30 = vunpack.c.l.b16 %v60_v60 }
  0x96   :  { %v374_v37 = vpack.c.b16 %v329_v30, %v329_v30 }
  0x9e   :  { %v863_v45 = vpop.f32.mrf.mxu0  ;;  %v2188_v46 = vpop.f32.mrf.mxu1 }
  0xa1   :  { %1032 = vmatmul.bf16.gmra.mxu1 %v1258_v43  ;;  %1131 = vmatmul.bf16.gmra.mxu0 %v1270_v44 }
  0xa4   :  { %1065 = vmatmul.bf16.gmra.mxu2 %v1262_v42  ;;  %1108 = vmatmul.bf16.gmra.mxu3 %v1338_v49 }
  0xa6   :  { %v865_v51 = vpop.f32.mrf.mxu0  ;;  %v2198_v52 = vpop.f32.mrf.mxu1 }
  0xa7   :  { %v2196_v50 = vpop.f32.mrf.mxu2  ;;  %v962_v55 = vpop.f32.mrf.mxu3 }
  0xae   :  { %v868_v2 = vpop.f32.mrf.mxu0  ;;  %v2221_v3 = vpop.f32.mrf.mxu1 }
  0xaf   :  { %v885_v62 = vpop.f32.mrf.mxu2  ;;  %v964_v4 = vpop.f32.mrf.mxu3 }
  0xb1   :  { %1037 = vmatmul.bf16.gmra.mxu1 %v1294_v63  ;;  %1136 = vmatmul.bf16.gmra.mxu0 %v1306_v0 }
  0xb4   :  { %1070 = vmatmul.bf16.gmra.mxu2 %v1298_v61  ;;  %1113 = vmatmul.bf16.gmra.mxu3 %v375_v5 }
  0xb6   :  { %v870_v6 = vpop.f32.mrf.mxu0  ;;  %v2223_v7 = vpop.f32.mrf.mxu1 }
  0xb7   :  { %v967_v10 = vpop.f32.mrf.mxu3 }
  0xbe   :  { %v896_v20 = vpop.f32.mrf.mxu1  ;;  %v995_v21 = vpop.f32.mrf.mxu0 }
  0xbf   :  { %v897_v22 = vadd.f32 %v896_v20, %v863_v45  ;;  %v969_v23 = vpop.f32.mrf.mxu3 }
  0xc1   :  { %1042 = vmatmul.bf16.gmra.mxu1 %v1330_v18  ;;  %1141 = vmatmul.bf16.gmra.mxu0 %v1342_v19 }
  0xc4   :  { %1075 = vmatmul.bf16.gmra.mxu2 %v1334_v17 }
  0xc6   :  { %v898_v26 = vpop.f32.mrf.mxu1  ;;  %v997_v27 = vpop.f32.mrf.mxu0 }
  0xc7   :  { %v929_v24 = vpop.f32.mrf.mxu2  ;;  %v899_v29 = vadd.f32 %v898_v26, %v865_v51  ;;  %v972_v32 = vpop.f32.mrf.mxu3 }
  0xc8   :  { %v930_v13 = vadd.f32 %v929_v24, %v897_v22 }
  0xca   :  { %v963_v25 = vadd.f32 %v962_v55, %v930_v13 }
  0xcc   :  { %v2246_v31 = vadd.f32 %v995_v21, %v963_v25 }
  0xce   :  { %v901_v41 = vpop.f32.mrf.mxu1  ;;  %v1000_v42 = vpop.f32.mrf.mxu0 }
  0xcf   :  { %v931_v35 = vpop.f32.mrf.mxu2  ;;  %v902_v43 = vadd.f32 %v901_v41, %v868_v2  ;;  %v974_v45 = vpop.f32.mrf.mxu3 }
  0xd0   :  { %v932_v36 = vadd.f32 %v931_v35, %v899_v29 }
  0xd1   :  { %1047 = vmatmul.bf16.gmra.mxu1 %v373_v39  ;;  %1146 = vmatmul.bf16.gmra.mxu0 %v376_v40 }
  0xd2   :  { %v965_v38 = vadd.f32 %v964_v4, %v932_v36 }
  0xd4   :  { %1080 = vmatmul.bf16.gmra.mxu2 %v374_v37  ;;  %v2249_v44 = vadd.f32 %v997_v27, %v965_v38 }
  0xd6   :  { %v903_v15 = vpop.f32.mrf.mxu1  ;;  %v1002_v51 = vpop.f32.mrf.mxu0 }
  0xd7   :  { %v934_v47 = vpop.f32.mrf.mxu2  ;;  %v904_v53 = vadd.f32 %v903_v15, %v870_v6  ;;  %v977_v55 = vpop.f32.mrf.mxu3 }
  0xd8   :  { %v935_v48 = vadd.f32 %v934_v47, %v902_v43 }
  0xda   :  { %v968_v49 = vadd.f32 %v967_v10, %v935_v48  ;;  %v2274_v48 = vld [vmem:[%s2336_s2] ss:$0 sm:$0xff] }
  0xdc   :  { %v2251_v54 = vadd.f32 %v1000_v42, %v968_v49 }
  0xde   :  { %v906_v59 = vpop.f32.mrf.mxu1  ;;  %v1005_v60 = vpop.f32.mrf.mxu0 }
  0xdf   :  { %v936_v56 = vpop.f32.mrf.mxu2  ;;  %v907_v61 = vadd.f32 %v906_v59, %v2188_v46  ;;  %v979_v63 = vpop.f32.mrf.mxu3 }
  0xe0   :  { %v937_v57 = vadd.f32 %v936_v56, %v904_v53  ;;  %v2279_v53 = vld [vmem:[%s2337_s3] ss:$0 sm:$0xff] }
  0xe2   :  { %v970_v58 = vadd.f32 %v969_v23, %v937_v57 }
  0xe4   :  { %v2254_v62 = vadd.f32 %v1002_v51, %v970_v58 }
  0xe6   :  { %v908_v4 = vpop.f32.mrf.mxu1  ;;  %v1007_v5 = vpop.f32.mrf.mxu0 }
  0xe7   :  { %v939_v0 = vpop.f32.mrf.mxu2  ;;  %v909_v6 = vadd.f32 %v908_v4, %v2198_v52  ;;  %v982_v9 = vpop.f32.mrf.mxu3 }
  0xe8   :  { %v940_v1 = vadd.f32 %v939_v0, %v907_v61 }
  0xea   :  { %v973_v2 = vadd.f32 %v972_v32, %v940_v1 }
  0xec   :  { %v2257_v8 = vadd.f32 %v1005_v60, %v973_v2 }
  0xee   :  { %v911_v14 = vpop.f32.mrf.mxu1  ;;  %v1010_v16 = vpop.f32.mrf.mxu0 }
  0xef   :  { %v941_v10 = vpop.f32.mrf.mxu2  ;;  %v912_v46 = vadd.f32 %v911_v14, %v2221_v3  ;;  %v984_v18 = vpop.f32.mrf.mxu3 }
  0xf0   :  { %v942_v11 = vadd.f32 %v941_v10, %v909_v6 }
  0xf2   :  { %v975_v12 = vadd.f32 %v974_v45, %v942_v11 }
  0xf4   :  { %v2260_v17 = vadd.f32 %v1007_v5, %v975_v12 }
  0xf6   :  { %v913_v22 = vpop.f32.mrf.mxu1  ;;  %v1012_v23 = vpop.f32.mrf.mxu0 }
  0xf7   :  { %v944_v19 = vpop.f32.mrf.mxu2  ;;  %v914_v52 = vadd.f32 %v913_v22, %v2223_v7  ;;  %v1094_v13 = vpop.f32.mrf.mxu3 }
  0xf8   :  { %v945_v20 = vadd.f32 %v944_v19, %v912_v46 }
  0xfa   :  { %v978_v21 = vadd.f32 %v977_v55, %v945_v20 }
  0xfc   :  { %v2263_v24 = vadd.f32 %v1010_v16, %v978_v21 }
  0xfe   :  { %v916_v28 = vpop.f32.mrf.mxu1  ;;  %v1015_v29 = vpop.f32.mrf.mxu0 }
  0xff   :  { %v946_v25 = vpop.f32.mrf.mxu2  ;;  %v917_v3 = vadd.f32 %v916_v28, %v2196_v50  ;;  %v1096_v32 = vpop.f32.mrf.mxu3 }
 0x100   :  { %v947_v26 = vadd.f32 %v946_v25, %v914_v52 }
 0x102   :  { %v980_v27 = vadd.f32 %v979_v63, %v947_v26 }
 0x104   :  { %v2266_v30 = vadd.f32 %v1012_v23, %v980_v27 }
 0x106   :  { %v918_v36 = vpop.f32.mrf.mxu1  ;;  %v1017_v37 = vpop.f32.mrf.mxu0 }
 0x107   :  { %v949_v33 = vpop.f32.mrf.mxu2  ;;  %v1099_v7 = vpop.f32.mrf.mxu3 }
 0x108   :  { %v950_v34 = vadd.f32 %v949_v33, %v917_v3 }
 0x10a   :  { %v983_v35 = vadd.f32 %v982_v9, %v950_v34 }
 0x10c   :  { %v2268_v38 = vadd.f32 %v1015_v29, %v983_v35 }
 0x10e   :  { %v1028_v40 = vpop.f32.mrf.mxu1  ;;  %v1127_v41 = vpop.f32.mrf.mxu0 }
 0x10f   :  { %v951_v39 = vpop.f32.mrf.mxu2  ;;  %v1029_v42 = vadd.f32 %v1028_v40, %v2246_v31  ;;  %v1101_v43 = vpop.f32.mrf.mxu3 }
 0x116   :  { %v1030_v49 = vpop.f32.mrf.mxu1  ;;  %v1129_v15 = vpop.f32.mrf.mxu0 }
 0x117   :  { %v1061_v45 = vpop.f32.mrf.mxu2  ;;  %v1031_v55 = vadd.f32 %v1030_v49, %v2249_v44  ;;  %v1104_v31 = vpop.f32.mrf.mxu3 }
 0x118   :  { %v1062_v47 = vadd.f32 %v1061_v45, %v1029_v42 }
 0x11a   :  { %v1095_v50 = vadd.f32 %v1094_v13, %v1062_v47 }
 0x11c   :  { %v1128_v51 = vadd.f32 %v1127_v41, %v1095_v50 }
 0x11e   :  { %v1155_v56 = vmul.f32 %v2274_v48, %v1128_v51  ;;  %v1033_v63 = vpop.f32.mrf.mxu1  ;;  %v1132_v0 = vpop.f32.mrf.mxu0 }
 0x11f   :  { %v1063_v57 = vpop.f32.mrf.mxu2  ;;  %v1034_v2 = vadd.f32 %v1033_v63, %v2251_v54  ;;  %v1106_v4 = vpop.f32.mrf.mxu3 }
 0x120   :  { %v1168_v58 = vadd.f32 %v2279_v53, %v1155_v56  ;;  %v1064_v59 = vadd.f32 %v1063_v57, %v1031_v55 }
 0x122   :  { %v1177_v60 = vmax.f32 %v1168_v58, 0.0  ;;  %v1097_v61 = vadd.f32 %v1096_v32, %v1064_v59 }
 0x124   :  { %1186 = vst [vmem:[%s2338_s4] sm:$0xff] %v1177_v60  ;;  %v1130_v1 = vadd.f32 %v1129_v15, %v1097_v61 }
 0x126   :  { %v1156_v44 = vmul.f32 %v2274_v48, %v1130_v1  ;;  %v1035_v12 = vpop.f32.mrf.mxu1  ;;  %v1134_v14 = vpop.f32.mrf.mxu0 }
 0x127   :  { %v1066_v5 = vpop.f32.mrf.mxu2  ;;  %v1036_v46 = vadd.f32 %v1035_v12, %v2254_v62  ;;  %v1109_v18 = vpop.f32.mrf.mxu3 }
 0x128   :  { %v1169_v6 = vadd.f32 %v2279_v53, %v1156_v44  ;;  %v1067_v9 = vadd.f32 %v1066_v5, %v1034_v2 }
 0x12a   :  { %v1178_v10 = vmax.f32 %v1169_v6, 0.0  ;;  %v1100_v11 = vadd.f32 %v1099_v7, %v1067_v9 }
 0x12c   :  { %1187 = vst [vmem:[%s2338_s4 + $0x8] sm:$0xff] %v1178_v10  ;;  %v1133_v16 = vadd.f32 %v1132_v0, %v1100_v11 }
 0x12e   :  { %v1157_v54 = vmul.f32 %v2274_v48, %v1133_v16  ;;  %v1038_v52 = vpop.f32.mrf.mxu1  ;;  %v1137_v13 = vpop.f32.mrf.mxu0 }
 0x12f   :  { %v1068_v19 = vpop.f32.mrf.mxu2  ;;  %v1039_v26 = vadd.f32 %v1038_v52, %v2257_v8  ;;  %v1111_v27 = vpop.f32.mrf.mxu3 }
 0x130   :  { %v1170_v20 = vadd.f32 %v2279_v53, %v1157_v54  ;;  %v1069_v21 = vadd.f32 %v1068_v19, %v1036_v46 }
 0x132   :  { %v1179_v22 = vmax.f32 %v1170_v20, 0.0  ;;  %v1102_v23 = vadd.f32 %v1101_v43, %v1069_v21 }
 0x134   :  { %1188 = vst [vmem:[%s2338_s4 + $0x10] sm:$0xff] %v1179_v22  ;;  %v1135_v25 = vadd.f32 %v1134_v14, %v1102_v23 }
 0x136   :  { %v1158_v62 = vmul.f32 %v2274_v48, %v1135_v25  ;;  %v1040_v34 = vpop.f32.mrf.mxu1  ;;  %v1139_v35 = vpop.f32.mrf.mxu0 }
 0x137   :  { %v1071_v28 = vpop.f32.mrf.mxu2  ;;  %v1041_v37 = vadd.f32 %v1040_v34, %v2260_v17  ;;  %v1114_v7 = vpop.f32.mrf.mxu3 }
 0x138   :  { %v1171_v29 = vadd.f32 %v2279_v53, %v1158_v62  ;;  %v1072_v3 = vadd.f32 %v1071_v28, %v1039_v26 }
 0x13a   :  { %v1180_v32 = vmax.f32 %v1171_v29, 0.0  ;;  %v1105_v33 = vadd.f32 %v1104_v31, %v1072_v3 }
 0x13c   :  { %1189 = vst [vmem:[%s2338_s4 + $0x18] sm:$0xff] %v1180_v32  ;;  %v1138_v36 = vadd.f32 %v1137_v13, %v1105_v33 }
 0x13e   :  { %v1159_v8 = vmul.f32 %v2274_v48, %v1138_v36  ;;  %v1043_v45 = vpop.f32.mrf.mxu1  ;;  %v1142_v47 = vpop.f32.mrf.mxu0 }
 0x13f   :  { %v1073_v39 = vpop.f32.mrf.mxu2  ;;  %v1044_v49 = vadd.f32 %v1043_v45, %v2263_v24  ;;  %v1116_v15 = vpop.f32.mrf.mxu3 }
 0x140   :  { %v1172_v40 = vadd.f32 %v2279_v53, %v1159_v8  ;;  %v1074_v41 = vadd.f32 %v1073_v39, %v1041_v37 }
 0x142   :  { %v1181_v42 = vmax.f32 %v1172_v40, 0.0  ;;  %v1107_v43 = vadd.f32 %v1106_v4, %v1074_v41 }
 0x144   :  { %1190 = vst [vmem:[%s2338_s4 + $0x20] sm:$0xff] %v1181_v42  ;;  %v1140_v50 = vadd.f32 %v1139_v35, %v1107_v43 }
 0x146   :  { %v1160_v17 = vmul.f32 %v2274_v48, %v1140_v50  ;;  %v1045_v58 = vpop.f32.mrf.mxu1  ;;  %v1144_v59 = vpop.f32.mrf.mxu0 }
 0x147   :  { %v1076_v51 = vpop.f32.mrf.mxu2  ;;  %v1046_v61 = vadd.f32 %v1045_v58, %v2266_v30 }
 0x148   :  { %v1173_v55 = vadd.f32 %v2279_v53, %v1160_v17  ;;  %v1077_v31 = vadd.f32 %v1076_v51, %v1044_v49 }
 0x14a   :  { %v1182_v56 = vmax.f32 %v1173_v55, 0.0  ;;  %v1110_v57 = vadd.f32 %v1109_v18, %v1077_v31 }
 0x14c   :  { %1191 = vst [vmem:[%s2338_s4 + $0x28] sm:$0xff] %v1182_v56  ;;  %v1143_v60 = vadd.f32 %v1142_v47, %v1110_v57 }
 0x14e   :  { %v1161_v24 = vmul.f32 %v2274_v48, %v1143_v60  ;;  %v1048_v44 = vpop.f32.mrf.mxu1  ;;  %v1147_v5 = vpop.f32.mrf.mxu0 }
 0x14f   :  { %v1078_v63 = vpop.f32.mrf.mxu2  ;;  %v1049_v9 = vadd.f32 %v1048_v44, %v2268_v38 }
 0x150   :  { %v1174_v0 = vadd.f32 %v2279_v53, %v1161_v24  ;;  %v1079_v1 = vadd.f32 %v1078_v63, %v1046_v61 }
 0x152   :  { %v1183_v2 = vmax.f32 %v1174_v0, 0.0  ;;  %v1112_v4 = vadd.f32 %v1111_v27, %v1079_v1 }
 0x154   :  { %1192 = vst [vmem:[%s2338_s4 + $0x30] sm:$0xff] %v1183_v2  ;;  %v1145_v6 = vadd.f32 %v1144_v59, %v1112_v4 }
 0x156   :  { %v1162_v10 = vmul.f32 %v2274_v48, %v1145_v6  ;;  %v1050_v46 = vpop.f32.mrf.mxu1  ;;  %v1149_v18 = vpop.f32.mrf.mxu0 }
 0x157   :  { %v1081_v30 = vpop.f32.mrf.mxu2 }
 0x158   :  { %v1175_v11 = vadd.f32 %v2279_v53, %v1162_v10  ;;  %v1082_v12 = vadd.f32 %v1081_v30, %v1049_v9 }
 0x15a   :  { %v1184_v14 = vmax.f32 %v1175_v11, 0.0  ;;  %v1115_v16 = vadd.f32 %v1114_v7, %v1082_v12 }
 0x15c   :  { %1193 = vst [vmem:[%s2338_s4 + $0x38] sm:$0xff] %v1184_v14  ;;  %v1148_v54 = vadd.f32 %v1147_v5, %v1115_v16 }
 0x15e   :  { %v1163_v19 = vmul.f32 %v2274_v48, %v1148_v54 }
 0x15f   :  { %v1083_v20 = vpop.f32.mrf.mxu2 }
 0x160   :  { %v1176_v38 = vadd.f32 %v2279_v53, %v1163_v19 }
 0x162   :  { %v1185_v21 = vmax.f32 %v1176_v38, 0.0 }
 0x164   :  { %1194 = vst [vmem:[%s2338_s4 + $0x40] sm:$0xff] %v1185_v21 }

// kernel: model_forward.12
= control target key start
LH: loop header
LB: loop body
LE: loop exit
PB: predicated region body
PF: predicated region fallthrough
CT: control target
= control target key end

     0   :  { %s106_s0 = inlined_call_operand.vmem [shape: f32[4,18,128], index: 0, kind: input, shape index: {}]   ;;  %s107_s1 = inlined_call_operand.vmem [shape: f32[18,128], index: 1, kind: output, shape index: {}]  }
   0x1   :  { %v8_v0 = vld [vmem:[%s106_s0] sm:$0xff]  ;;  %v42_v1 = vld [vmem:[%s106_s0 + $0x18] sm:$0xff]  ;;  %v45_v2 = vld [vmem:[%s106_s0 + $0x30] sm:$0xff] }
   0x2   :  { %v15_v3 = vadd.f32 %v42_v1, %v8_v0  ;;  %v9_v4 = vld [vmem:[%s106_s0 + $0x8] sm:$0xff]  ;;  %v43_v5 = vld [vmem:[%s106_s0 + $0x20] sm:$0xff]  ;;  %v46_v8 = vld [vmem:[%s106_s0 + $0x38] sm:$0xff] }
   0x3   :  { %v48_v6 = vld [vmem:[%s106_s0 + $0x48] sm:$0xff]  ;;  %v16_v7 = vadd.f32 %v43_v5, %v9_v4  ;;  %v10_v9 = vld [vmem:[%s106_s0 + $0x10] sm:$0x3]  ;;  %v47_v13 = vld [vmem:[%s106_s0 + $0x40] sm:$0x3] }
   0x4   :  { %v22_v10 = vadd.f32 %v45_v2, %v15_v3  ;;  %v49_v11 = vld [vmem:[%s106_s0 + $0x50] sm:$0xff]  ;;  %v44_v12 = vld [vmem:[%s106_s0 + $0x28] sm:$0x3]  ;;  %v50_v17 = vld [vmem:[%s106_s0 + $0x58] sm:$0x3] }
   0x5   :  { %v23_v14 = vadd.f32 %v46_v8, %v16_v7  ;;  %v17_v15 = vadd.f32 %v44_v12, %v10_v9 }
   0x6   :  { %v29_v16 = vadd.f32 %v48_v6, %v22_v10 }
   0x7   :  { %v30_v18 = vadd.f32 %v49_v11, %v23_v14  ;;  %v24_v19 = vadd.f32 %v47_v13, %v17_v15 }
   0x8   :  { %v32_v20 = vmul.f32 0.25, %v29_v16 }
   0x9   :  { %v33_v21 = vmul.f32 0.25, %v30_v18  ;;  %v31_v22 = vadd.f32 %v50_v17, %v24_v19 }
   0xa   :  { %35 = vst [vmem:[%s107_s1] sm:$0xff] %v32_v20 }
   0xb   :  { %36 = vst [vmem:[%s107_s1 + $0x8] sm:$0xff] %v33_v21  ;;  %v34_v23 = vmul.f32 0.25, %v31_v22 }
   0xd   :  { %37 = vst [vmem:[%s107_s1 + $0x10] sm:$0x3] %v34_v23 }

// kernel: model_forward.13
= control target key start
LH: loop header
LB: loop body
LE: loop exit
PB: predicated region body
PF: predicated region fallthrough
CT: control target
= control target key end

     0   :  { %s234_s0 = inlined_call_operand.vmem [shape: f32[2,144], index: 0, kind: input, shape index: {}]   ;;  %s235_s1 = inlined_call_operand.vmem [shape: f32[144,128], index: 1, kind: input, shape index: {}]   ;;  %s236_s2 = inlined_call_operand.vmem [shape: f32[1,128], index: 2, kind: input, shape index: {}]   ;;  %s237_s3 = inlined_call_operand.vmem [shape: f32[1,128], index: 3, kind: input, shape index: {}]   ;;  %s238_s4 = inlined_call_operand.hbm [shape: f32[2,128], index: 4, kind: output, shape index: {}]  }
   0x1   :  { %v34_v0 = vld [vmem:[%s235_s1 + $0x78] sm:$0xff]  ;;  %v33_v1 = vld [vmem:[%s235_s1 + $0x70] sm:$0xff]  ;;  %v32_v2 = vld [vmem:[%s235_s1 + $0x68] sm:$0xff] }
   0x2   :  { %45 = vmatpush.msra.mxu0 %v34_v0  ;;  %v31_v3 = vld [vmem:[%s235_s1 + $0x60] sm:$0xff]  ;;  %v30_v4 = vld [vmem:[%s235_s1 + $0x58] sm:$0xff]  ;;  %v36_v5 = vld [vmem:[%s235_s1 + $0x88] sm:$0xff] }
   0x3   :  { %v35_v6 = vld [vmem:[%s235_s1 + $0x80] sm:$0xff]  ;;  %79 = vmatpush.msra.mxu1 %v36_v5 }
   0x4   :  { %46 = vmatpush.msra.mxu0 %v33_v1  ;;  %v18_v7 = vld [vmem:[%s234_s0] sm:$0xf] }
   0x6   :  { %47 = vmatpush.msra.mxu0 %v32_v2 }
   0x7   :  { %9 = vsyncpa [#allocation3], 0  ;;  %38 = vst [vmem:[#allocation1] ss:$4 sm:$0xff] %v18_v7  ;;  %v29_v8 = vld [vmem:[%s235_s1 + $0x50] sm:$0xff]  ;;  %80 = vmatpush.msra.mxu1 %v35_v6  ;;  %v28_v9 = vld [vmem:[%s235_s1 + $0x48] sm:$0xff] }
   0x8   :  { %48 = vmatpush.msra.mxu0 %v31_v3  ;;  %v27_v10 = vld [vmem:[%s235_s1 + $0x40] sm:$0xff]  ;;  %vm42_vm0 = vcmask 130048   ;;  %v26_v11 = vld [vmem:[%s235_s1 + $0x38] sm:$0xff]  ;;  %v25_v13 = vld [vmem:[%s235_s1 + $0x30] sm:$0xff]  ;;  %s142_s30 = smov [#allocation2]  }
   0x9   :  { %v24_v14 = vld [vmem:[%s235_s1 + $0x28] sm:$0xff]  ;;  %v23_v15 = vld [vmem:[%s235_s1 + $0x20] sm:$0xff]  ;;  %v22_v16 = vld [vmem:[%s235_s1 + $0x18] sm:$0xff]  ;;  %s101_s5 = sshll.u32 %s142_s30, 4  ;;  %s102_s5 = int_to_ptr.vmem [resolvable:$true] %s101_s5 }
   0xa   :  { %49 = vmatpush.msra.mxu0 %v30_v4  ;;  %v21_v17 = vld [vmem:[%s235_s1 + $0x10] sm:$0xff]  ;;  %v20_v18 = vld [vmem:[%s235_s1 + $0x8] sm:$0xff]  ;;  %v19_v19 = vld [vmem:[%s235_s1] sm:$0xff]  ;;  %s103_s1 = sshll.u32 %s238_s4, 4  ;;  %s104_s1 = int_to_ptr.hbm [resolvable:$true] %s103_s1 }
   0xb   :  { %v114_v22 = vld [vmem:[%s236_s2] ss:$0 sm:$0xff] }
   0xc   :  { %50 = vmatpush.msra.mxu0 %v29_v8  ;;  %v115_v25 = vld [vmem:[%s237_s3] ss:$0 sm:$0xff] }
   0xe   :  { %51 = vmatpush.msra.mxu0 %v28_v9  ;;  %v40_v12 = vld.sshfl [vmem:[#allocation1 + $0x8] sm:$0xff pattern:$0x73625140]  ;;  %v39_v20 = vld.sshfl [vmem:[#allocation1] sm:$0xff pattern:$0x73625140] }
   0xf   :  { %112 = vmatmul.msk.f32.vlgmr.msra.gmra.mxu1 %vm42_vm0, %v40_v12 }
  0x10   :  { %52 = vmatpush.msra.mxu0 %v27_v10 }
  0x12   :  { %53 = vmatpush.msra.mxu0 %v26_v11 }
  0x14   :  { %54 = vmatpush.msra.mxu0 %v25_v13 }
  0x16   :  { %55 = vmatpush.msra.mxu0 %v24_v14 }
  0x18   :  { %56 = vmatpush.msra.mxu0 %v23_v15 }
  0x1a   :  { %57 = vmatpush.msra.mxu0 %v22_v16 }
  0x1c   :  { %58 = vmatpush.msra.mxu0 %v21_v17 }
  0x1e   :  { %59 = vmatpush.msra.mxu0 %v20_v18 }
  0x20   :  { %60 = vmatpush.msra.mxu0 %v19_v19 }
  0x21   :  { %61 = vmatmul.f32.vlgmr.msra.gmra.mxu0 %v39_v20 }
  0x8c   :  { %v82_v21 = vpop.f32.mrf.mxu1 }
  0x9e   :  { %v62_v23 = vpop.f32.mrf.mxu0 }
  0x9f   :  { %v83_v24 = vadd.f32 %v82_v21, %v62_v23 }
  0xa1   :  { %v89_v26 = vmul.f32 %v114_v22, %v83_v24 }
  0xa3   :  { %v94_v27 = vadd.f32 %v115_v25, %v89_v26 }
  0xa5   :  { %95 = vst [vmem:[#allocation2] sm:$0x3] %v94_v27 }
  0xa6   :  { %106 = dma.vmem_to_hbm [thread:$0]  %s102_s5, 32, %s104_s1, [#allocation3]  }
  0xa7   :  { %140 = dma.done.wait [#allocation3], 32  }
  0xa8   :  { %141 = vsyncadd [#allocation3], 4294967264 }
  0xa9   :  { %111 = vsyncpa [#allocation3], 1 }

</bundles_post_ra>
